<compile_context>
chip_gen: v6e
topology: v6e:2x2x1
jax: 0.10.0
libtpu: 0.0.40
codegen_flags: <defaults>
</compile_context>

<pallas_src>
import functools

import jax
import jax.numpy as jnp
from jax.experimental import pallas as pl
from jax.experimental.pallas import tpu as pltpu


_LANE = 512        # lane-dense last dim: multiple of 128 (vreg lanes) and of 4 (coords)
_MAX_TILE_M = 1024  # rows per block cap: 2 MiB f32 / buffer; 2x(in+out) = 8 MiB VMEM


def _round_up(x, m):
    return ((x + m - 1) // m) * m


def _num_tensorcores_per_chip():
    """v7x has 2 TensorCores per chip; v5e/v6e have 1."""
    try:
        kind = jax.devices()[0].device_kind.lower()
        if "v7" in kind or "7x" in kind:
            return 2
    except Exception:
        pass
    return 1


def _pick_tile_m(rows, sub, n_cores, cap=_MAX_TILE_M):
    """Row-tile size.

    Single-TC chips: one big tile (fewer grid steps, ~roofline streaming).
    v7x (2 TCs): target >= 8 roughly even grid steps so neither core idles on a
    ragged / padded final block.
    """
    if n_cores <= 1:
        return rows if rows <= cap else cap
    target_steps = 8
    tile = _round_up(pl.cdiv(rows, target_steps), sub)
    tile = max(sub, min(tile, cap))
    return rows if tile >= rows else tile


def _clip_boxes_kernel(x_ref, o_ref, *, w_max, h_max):
    """Lane-dense elementwise clamp on the VPU.

    x_ref / o_ref: (tile_m, _LANE) VMEM tiles of the flattened boxes array.
    Even lanes are x coords (max = W-1), odd lanes are y coords (max = H-1);
    this holds because _LANE is a multiple of 4 and the flat layout repeats
    (x1, y1, x2, y2).  The (1, _LANE) bound row broadcasts through the minimum.
    """
    x = x_ref[...]
    lane = jax.lax.broadcasted_iota(jnp.int32, (1, x.shape[-1]), 1)
    maxv = jnp.where((lane & 1) == 0,
                     jnp.asarray(w_max, x.dtype),
                     jnp.asarray(h_max, x.dtype))
    o_ref[...] = jnp.minimum(jnp.maximum(x, jnp.zeros((), x.dtype)), maxv)


def _clip_boxes_jax(batch_boxes, w, h):
    """Pure-JAX path (also the reference); lets XLA fuse small problems."""
    b = jnp.maximum(batch_boxes, jnp.zeros((), batch_boxes.dtype))
    maxv = jnp.array([w - 1, h - 1, w - 1, h - 1], dtype=batch_boxes.dtype)
    return jnp.minimum(b, maxv)


def clip_boxes(batch_imgs, batch_boxes, *, min_pallas_bytes=1 << 20, donate=False):
    """Pallas implementation of ClipBoxes.forward.

    batch_imgs : [B, C, H, W]  (only static H, W are consumed)
    batch_boxes: [B, N, 4]     last dim = (x1, y1, x2, y2)
    donate     : alias the boxes buffer to the output (only set True when the
                 caller donates batch_boxes; otherwise XLA adds a copy).
    returns    : [B, N, 4] clipped boxes, same dtype as input.
    """
    h, w = batch_imgs.shape[2], batch_imgs.shape[3]
    B, N, four = batch_boxes.shape
    assert four == 4, "boxes last dim must be (x1, y1, x2, y2)"
    dtype = batch_boxes.dtype
    itemsize = jnp.dtype(dtype).itemsize
    total = B * N * 4

    # Small-problem fallback: launch + pipeline prologue dominate a tiny
    # elementwise op; fusing into surrounding XLA is faster.
    if total * itemsize < min_pallas_bytes:
        return _clip_boxes_jax(batch_boxes, w, h)

    # ---- lane-dense flattening -------------------------------------------
    rows = pl.cdiv(total, _LANE)
    # Sublane multiple for the (8, 128) block rule: 8 f32, 16 bf16, 32 int8.
    sub = 8 * max(1, 4 // itemsize)
    tile_m = _pick_tile_m(rows, sub, _num_tensorcores_per_chip())
    grid = (pl.cdiv(rows, tile_m),)   # ragged last block handled by Pallas

    flat = batch_boxes.reshape(-1)
    pad = rows * _LANE - total
    if pad:  # only when B*N is not a multiple of 128
        flat = jnp.pad(flat, (0, pad))
    slab = flat.reshape(rows, _LANE)

    kernel = functools.partial(_clip_boxes_kernel, w_max=w - 1, h_max=h - 1)

    out = pl.pallas_call(
        kernel,
        out_shape=jax.ShapeDtypeStruct((rows, _LANE), dtype),
        grid_spec=pltpu.PrefetchScalarGridSpec(
            num_scalar_prefetch=0,
            grid=grid,
            in_specs=[pl.BlockSpec((tile_m, _LANE), lambda i: (i, 0))],
            out_specs=pl.BlockSpec((tile_m, _LANE), lambda i: (i, 0)),
        ),
        compiler_params=pltpu.CompilerParams(
            dimension_semantics=("parallel",)),
        cost_estimate=pl.CostEstimate(
            flops=2 * rows * _LANE,
            transcendentals=0,
            bytes_accessed=2 * rows * _LANE * itemsize),
        input_output_aliases=({0: 0} if donate else {}),
    )(slab)

    if pad:
        return out.reshape(-1)[:total].reshape(B, N, 4)
    return out.reshape(B, N, 4)


if __name__ == "__main__":
    key = jax.random.PRNGKey(0)
    k_img, k_small, k_large = jax.random.split(key, 3)

    B, C, H, W = 2, 4, 16, 16
    batch_imgs = jax.random.normal(k_img, (B, C, H, W), dtype=jnp.float32)

    # 1) Small case (B=2, N=8): routed through the fused pure-JAX fallback.
    small_boxes = jax.random.uniform(
        k_small, (B, 8, 4), dtype=jnp.float32, minval=-10.0, maxval=30.0)
    out_small = jax.block_until_ready(clip_boxes(batch_imgs, small_boxes))
    ref_small = _clip_boxes_jax(small_boxes, W, H)
    assert out_small.shape == ref_small.shape
    assert out_small.dtype == ref_small.dtype
    assert jnp.allclose(out_small, ref_small), "small-case mismatch"

    # 2) Larger case (2 MiB of boxes): exercises the lane-dense Pallas kernel.
    #    rows = 1024; single-TC chips run 1 big tile, v7x runs 8 parallel steps.
    N = 65536
    large_boxes = jax.random.uniform(
        k_large, (B, N, 4), dtype=jnp.float32, minval=-10.0, maxval=30.0)
    out_large = jax.block_until_ready(clip_boxes(batch_imgs, large_boxes))
    ref_large = _clip_boxes_jax(large_boxes, W, H)
    assert out_large.shape == ref_large.shape
    assert out_large.dtype == ref_large.dtype
    assert jnp.allclose(out_large, ref_large), "Pallas output mismatch vs reference"

    print("KERNEL_OK")
</pallas_src>

<mosaic_0001>
module attributes {stable_mosaic.version = 11 : i64} {
  func.func @_clip_boxes_kernel(%arg0: i32, %arg1: memref<1024x512xf32, #tpu.memory_space<vmem>>, %arg2: memref<1024x512xf32, #tpu.memory_space<vmem>>) attributes {dimension_semantics = [#tpu.dimension_semantics<parallel>], iteration_bounds = array<i64: 1>, scalar_prefetch = 0 : i64, scratch_operands = 0 : i64, tpu.core_type = #tpu.core_type<tc>, window_params = [{transform_indices = @transform_0, window_bounds = array<i64: 1024, 512>}, {transform_indices = @transform_1, window_bounds = array<i64: 1024, 512>}]} {
    %c0 = arith.constant 0 : index
    %c0_0 = arith.constant 0 : index
    %0 = vector.load %arg1[%c0, %c0_0] : memref<1024x512xf32, #tpu.memory_space<vmem>>, vector<1024x512xf32>
    %1 = tpu.iota {dimensions = array<i32: 1>} : vector<1x512xi32>
    %c1_i32 = arith.constant 1 : i32
    %2 = vector.broadcast %c1_i32 : i32 to vector<1x512xi32>
    %3 = arith.andi %1, %2 : vector<1x512xi32>
    %c0_i32 = arith.constant 0 : i32
    %4 = vector.broadcast %c0_i32 : i32 to vector<1x512xi32>
    %5 = arith.cmpi eq, %3, %4 : vector<1x512xi32>
    %cst = arith.constant 1.500000e+01 : f32
    %cst_1 = arith.constant 1.500000e+01 : f32
    %6 = vector.broadcast %cst : f32 to vector<1x512xf32>
    %7 = vector.broadcast %cst_1 : f32 to vector<1x512xf32>
    %8 = arith.select %5, %6, %7 : vector<1x512xi1>, vector<1x512xf32>
    %cst_2 = arith.constant 0.000000e+00 : f32
    %9 = vector.broadcast %cst_2 : f32 to vector<1024x512xf32>
    %10 = arith.maximumf %0, %9 : vector<1024x512xf32>
    %11 = vector.broadcast %8 : vector<1x512xf32> to vector<1024x512xf32>
    %12 = arith.minimumf %10, %11 : vector<1024x512xf32>
    %c0_3 = arith.constant 0 : index
    %c0_4 = arith.constant 0 : index
    %13 = vector.load %arg2[%c0_3, %c0_4] : memref<1024x512xf32, #tpu.memory_space<vmem>>, vector<1024x512xf32>
    tpu.vector_store %arg2[%c0_3, %c0_4], %12 {strides = array<i32>} : memref<1024x512xf32, #tpu.memory_space<vmem>>, vector<1024x512xf32>,
    return
  }
  func.func @transform_0(%arg0: i32) -> (i32, i32) {
    %c0_i32 = arith.constant 0 : i32
    %c0_i32_0 = arith.constant 0 : i32
    return %arg0, %c0_i32 : i32, i32
  }
  func.func @transform_1(%arg0: i32) -> (i32, i32) {
    %c0_i32 = arith.constant 0 : i32
    %c0_i32_0 = arith.constant 0 : i32
    return %arg0, %c0_i32 : i32, i32
  }
}

</mosaic_0001>

<bundles_post_ra>
// kernel: tpu_custom_call.1
= control target key start
LH: loop header
LB: loop body
LE: loop exit
PB: predicated region body
PF: predicated region fallthrough
CT: control target
= control target key end

     0   :  { %6 = vsyncpa [#allocation3], 0  ;;  %s2162_s0 = inlined_call_operand.hbm [shape: f32[1024,512], index: 0, kind: input, shape index: {}]   ;;  %s2163_s1 = inlined_call_operand.hbm [shape: f32[1024,512], index: 1, kind: output, shape index: {}]  }
   0x1   :  { %7 = vsyncpa [#allocation4], 0  ;;  %s2136_s6 = smov [#allocation2]  }
   0x2   :  { %s13_s7 = sshll.u32 %s2136_s6, 4  ;;  %s14_s7 = int_to_ptr.vmem [resolvable:$true] %s13_s7 }
   0x3   :  { %s2100_s8 = scalar_lea.vmem %s14_s7, 65536  ;;  %p2105_p1 = scmp.lt.s32.totalorder %s14_s7, %s14_s7 }
   0x4   :  { %p2101_p0 = scmp.ne.s32.totalorder %s14_s7, %s2100_s8  ;;  %p2106_p2 = scmp.lt.s32.totalorder %s2100_s8, %s2100_s8 }
   0x6   :  { %p2107_p3 = por %p2106_p2, %p2105_p1 }
   0x8   :  { %p2108_p4 = pnand %p2107_p3, %p2101_p0 }
   0xa   :  { %2111 = shalt.err (!%p2108_p4)
}
   0xb   :  { %s2137_s9 = smov 512   ;;  %s2138_s10 = smov 32  }
   0xc   :  { %19 = dma.hbm_to_vmem [thread:$0]  %s2162_s0, 65536, %s14_s7, [#allocation3], %s2137_s9, %s2137_s9, %s2138_s10  }
   0xd   :  { %2132 = dma.done.wait [#allocation3], 65536  }
   0xe   :  { %2133 = vsyncadd [#allocation3], 4294901760  ;;  %v23_v0 = vld [vmem:[#allocation2] sm:$0xff]  ;;  %v24_v1 = vld [vmem:[#allocation2 + $0x8] sm:$0xff]  ;;  %s2139_s0 = smov [#allocation5]  }
   0xf   :  { %v25_v2 = vld [vmem:[#allocation2 + $0x10] sm:$0xff]  ;;  %v535_v3 = vmax.f32 %v23_v0, 0.0  ;;  %v536_v4 = vmax.f32 %v24_v1, 0.0  ;;  %v26_v6 = vld [vmem:[#allocation2 + $0x18] sm:$0xff]  ;;  %v27_v7 = vld [vmem:[#allocation2 + $0x20] sm:$0xff]  ;;  %s2076_s13 = sshll.u32 %s2139_s0, 4  ;;  %s2077_s13 = int_to_ptr.vmem [resolvable:$true] %s2076_s13 }
  0x10   :  { %v537_v5 = vmax.f32 %v25_v2, 0.0  ;;  %v28_v8 = vld [vmem:[#allocation2 + $0x28] sm:$0xff]  ;;  %v538_v9 = vmax.f32 %v26_v6, 0.0  ;;  %v539_v10 = vmax.f32 %v27_v7, 0.0  ;;  %v29_v12 = vld [vmem:[#allocation2 + $0x30] sm:$0xff]  ;;  %v30_v13 = vld [vmem:[#allocation2 + $0x38] sm:$0xff]  ;;  %p2117_p6 = scmp.lt.s32.totalorder %s2077_s13, %s2077_s13 }
  0x11   :  { %v540_v11 = vmax.f32 %v28_v8, 0.0  ;;  %v31_v14 = vld [vmem:[#allocation2 + $0x40] sm:$0xff]  ;;  %v1047_v15 = vmin.f32 %v535_v3, 15.0  ;;  %v1048_v16 = vmin.f32 %v536_v4, 15.0  ;;  %v541_v18 = vmax.f32 %v29_v12, 0.0  ;;  %v32_v19 = vld [vmem:[#allocation2 + $0x48] sm:$0xff] }
  0x12   :  { %v1049_v17 = vmin.f32 %v537_v5, 15.0  ;;  %v33_v20 = vld [vmem:[#allocation2 + $0x50] sm:$0xff]  ;;  %v1050_v21 = vmin.f32 %v538_v9, 15.0  ;;  %v1051_v22 = vmin.f32 %v539_v10, 15.0  ;;  %v542_v24 = vmax.f32 %v30_v13, 0.0  ;;  %v34_v25 = vld [vmem:[#allocation2 + $0x58] sm:$0xff] }
  0x13   :  { %v1052_v23 = vmin.f32 %v540_v11, 15.0  ;;  %v35_v26 = vld [vmem:[#allocation2 + $0x60] sm:$0xff]  ;;  %1559 = vst [vmem:[#allocation5] sm:$0xff] %v1047_v15  ;;  %1560 = vst [vmem:[#allocation5 + $0x8] sm:$0xff] %v1048_v16  ;;  %v1053_v27 = vmin.f32 %v541_v18, 15.0  ;;  %v543_v28 = vmax.f32 %v31_v14, 0.0 }
  0x14   :  { %1561 = vst [vmem:[#allocation5 + $0x10] sm:$0xff] %v1049_v17  ;;  %v544_v29 = vmax.f32 %v32_v19, 0.0  ;;  %v545_v30 = vmax.f32 %v33_v20, 0.0  ;;  %v36_v31 = vld [vmem:[#allocation2 + $0x68] sm:$0xff]  ;;  %v37_v32 = vld [vmem:[#allocation2 + $0x70] sm:$0xff]  ;;  %1562 = vst [vmem:[#allocation5 + $0x18] sm:$0xff] %v1050_v21 }
  0x15   :  { %1563 = vst [vmem:[#allocation5 + $0x20] sm:$0xff] %v1051_v22  ;;  %1564 = vst [vmem:[#allocation5 + $0x28] sm:$0xff] %v1052_v23  ;;  %v1054_v33 = vmin.f32 %v542_v24, 15.0  ;;  %v546_v34 = vmax.f32 %v34_v25, 0.0  ;;  %v547_v35 = vmax.f32 %v35_v26, 0.0  ;;  %v548_v36 = vmax.f32 %v36_v31, 0.0 }
  0x16   :  { %v38_v37 = vld [vmem:[#allocation2 + $0x78] sm:$0xff]  ;;  %v39_v38 = vld [vmem:[#allocation2 + $0x80] sm:$0xff]  ;;  %1565 = vst [vmem:[#allocation5 + $0x30] sm:$0xff] %v1053_v27  ;;  %v1055_v39 = vmin.f32 %v543_v28, 15.0  ;;  %v1056_v40 = vmin.f32 %v544_v29, 15.0  ;;  %v1057_v41 = vmin.f32 %v545_v30, 15.0 }
  0x17   :  { %v549_v42 = vmax.f32 %v37_v32, 0.0  ;;  %v40_v43 = vld [vmem:[#allocation2 + $0x88] sm:$0xff]  ;;  %v41_v44 = vld [vmem:[#allocation2 + $0x90] sm:$0xff]  ;;  %1566 = vst [vmem:[#allocation5 + $0x38] sm:$0xff] %v1054_v33  ;;  %v1058_v45 = vmin.f32 %v546_v34, 15.0  ;;  %v1059_v46 = vmin.f32 %v547_v35, 15.0 }
  0x18   :  { %v1060_v47 = vmin.f32 %v548_v36, 15.0  ;;  %v550_v48 = vmax.f32 %v38_v37, 0.0  ;;  %v42_v49 = vld [vmem:[#allocation2 + $0x98] sm:$0xff]  ;;  %v43_v50 = vld [vmem:[#allocation2 + $0xa0] sm:$0xff]  ;;  %1567 = vst [vmem:[#allocation5 + $0x40] sm:$0xff] %v1055_v39  ;;  %1568 = vst [vmem:[#allocation5 + $0x48] sm:$0xff] %v1056_v40 }
  0x19   :  { %1569 = vst [vmem:[#allocation5 + $0x50] sm:$0xff] %v1057_v41  ;;  %v1061_v51 = vmin.f32 %v549_v42, 15.0  ;;  %v551_v52 = vmax.f32 %v39_v38, 0.0  ;;  %v552_v53 = vmax.f32 %v40_v43, 0.0  ;;  %v553_v54 = vmax.f32 %v41_v44, 0.0  ;;  %v44_v55 = vld [vmem:[#allocation2 + $0xa8] sm:$0xff] }
  0x1a   :  { %v45_v56 = vld [vmem:[#allocation2 + $0xb0] sm:$0xff]  ;;  %1570 = vst [vmem:[#allocation5 + $0x58] sm:$0xff] %v1058_v45  ;;  %1571 = vst [vmem:[#allocation5 + $0x60] sm:$0xff] %v1059_v46  ;;  %v1062_v57 = vmin.f32 %v550_v48, 15.0  ;;  %v554_v58 = vmax.f32 %v42_v49, 0.0  ;;  %v555_v59 = vmax.f32 %v43_v50, 0.0 }
  0x1b   :  { %1572 = vst [vmem:[#allocation5 + $0x68] sm:$0xff] %v1060_v47  ;;  %v556_v60 = vmax.f32 %v44_v55, 0.0  ;;  %v46_v61 = vld [vmem:[#allocation2 + $0xb8] sm:$0xff]  ;;  %v47_v62 = vld [vmem:[#allocation2 + $0xc0] sm:$0xff]  ;;  %1573 = vst [vmem:[#allocation5 + $0x70] sm:$0xff] %v1061_v51  ;;  %v1063_v63 = vmin.f32 %v551_v52, 15.0 }
  0x1c   :  { %v1064_v0 = vmin.f32 %v552_v53, 15.0  ;;  %v1065_v1 = vmin.f32 %v553_v54, 15.0  ;;  %v557_v2 = vmax.f32 %v45_v56, 0.0  ;;  %v48_v3 = vld [vmem:[#allocation2 + $0xc8] sm:$0xff]  ;;  %v49_v4 = vld [vmem:[#allocation2 + $0xd0] sm:$0xff]  ;;  %1574 = vst [vmem:[#allocation5 + $0x78] sm:$0xff] %v1062_v57 }
  0x1d   :  { %v1066_v5 = vmin.f32 %v554_v58, 15.0  ;;  %v1067_v6 = vmin.f32 %v555_v59, 15.0  ;;  %v1068_v7 = vmin.f32 %v556_v60, 15.0  ;;  %v558_v8 = vmax.f32 %v46_v61, 0.0  ;;  %v50_v9 = vld [vmem:[#allocation2 + $0xd8] sm:$0xff]  ;;  %v51_v10 = vld [vmem:[#allocation2 + $0xe0] sm:$0xff] }
  0x1e   :  { %1575 = vst [vmem:[#allocation5 + $0x80] sm:$0xff] %v1063_v63  ;;  %1576 = vst [vmem:[#allocation5 + $0x88] sm:$0xff] %v1064_v0  ;;  %v1069_v11 = vmin.f32 %v557_v2, 15.0  ;;  %v559_v12 = vmax.f32 %v47_v62, 0.0  ;;  %v560_v13 = vmax.f32 %v48_v3, 0.0  ;;  %v561_v14 = vmax.f32 %v49_v4, 0.0 }
  0x1f   :  { %1577 = vst [vmem:[#allocation5 + $0x90] sm:$0xff] %v1065_v1  ;;  %v52_v15 = vld [vmem:[#allocation2 + $0xe8] sm:$0xff]  ;;  %v53_v16 = vld [vmem:[#allocation2 + $0xf0] sm:$0xff]  ;;  %1578 = vst [vmem:[#allocation5 + $0x98] sm:$0xff] %v1066_v5  ;;  %v1070_v17 = vmin.f32 %v558_v8, 15.0  ;;  %v562_v18 = vmax.f32 %v50_v9, 0.0 }
  0x20   :  { %1579 = vst [vmem:[#allocation5 + $0xa0] sm:$0xff] %v1067_v6  ;;  %1580 = vst [vmem:[#allocation5 + $0xa8] sm:$0xff] %v1068_v7  ;;  %v563_v19 = vmax.f32 %v51_v10, 0.0  ;;  %v564_v20 = vmax.f32 %v52_v15, 0.0  ;;  %v54_v21 = vld [vmem:[#allocation2 + $0xf8] sm:$0xff]  ;;  %v55_v22 = vld [vmem:[#allocation2 + $0x100] sm:$0xff] }
  0x21   :  { %1581 = vst [vmem:[#allocation5 + $0xb0] sm:$0xff] %v1069_v11  ;;  %v1071_v23 = vmin.f32 %v559_v12, 15.0  ;;  %v1072_v24 = vmin.f32 %v560_v13, 15.0  ;;  %v1073_v25 = vmin.f32 %v561_v14, 15.0  ;;  %v565_v26 = vmax.f32 %v53_v16, 0.0  ;;  %v56_v27 = vld [vmem:[#allocation2 + $0x108] sm:$0xff] }
  0x22   :  { %v57_v28 = vld [vmem:[#allocation2 + $0x110] sm:$0xff]  ;;  %1582 = vst [vmem:[#allocation5 + $0xb8] sm:$0xff] %v1070_v17  ;;  %v1074_v29 = vmin.f32 %v562_v18, 15.0  ;;  %v1075_v30 = vmin.f32 %v563_v19, 15.0  ;;  %v1076_v31 = vmin.f32 %v564_v20, 15.0  ;;  %v566_v32 = vmax.f32 %v54_v21, 0.0 }
  0x23   :  { %v58_v33 = vld [vmem:[#allocation2 + $0x118] sm:$0xff]  ;;  %v59_v34 = vld [vmem:[#allocation2 + $0x120] sm:$0xff]  ;;  %1583 = vst [vmem:[#allocation5 + $0xc0] sm:$0xff] %v1071_v23  ;;  %1584 = vst [vmem:[#allocation5 + $0xc8] sm:$0xff] %v1072_v24  ;;  %v1077_v35 = vmin.f32 %v565_v26, 15.0  ;;  %v567_v36 = vmax.f32 %v55_v22, 0.0 }
  0x24   :  { %1585 = vst [vmem:[#allocation5 + $0xd0] sm:$0xff] %v1073_v25  ;;  %v568_v37 = vmax.f32 %v56_v27, 0.0  ;;  %v569_v38 = vmax.f32 %v57_v28, 0.0  ;;  %v60_v39 = vld [vmem:[#allocation2 + $0x128] sm:$0xff]  ;;  %v61_v40 = vld [vmem:[#allocation2 + $0x130] sm:$0xff]  ;;  %1586 = vst [vmem:[#allocation5 + $0xd8] sm:$0xff] %v1074_v29 }
  0x25   :  { %1587 = vst [vmem:[#allocation5 + $0xe0] sm:$0xff] %v1075_v30  ;;  %1588 = vst [vmem:[#allocation5 + $0xe8] sm:$0xff] %v1076_v31  ;;  %v1078_v41 = vmin.f32 %v566_v32, 15.0  ;;  %v570_v42 = vmax.f32 %v58_v33, 0.0  ;;  %v571_v43 = vmax.f32 %v59_v34, 0.0  ;;  %v572_v44 = vmax.f32 %v60_v39, 0.0 }
  0x26   :  { %v62_v45 = vld [vmem:[#allocation2 + $0x138] sm:$0xff]  ;;  %v63_v46 = vld [vmem:[#allocation2 + $0x140] sm:$0xff]  ;;  %1589 = vst [vmem:[#allocation5 + $0xf0] sm:$0xff] %v1077_v35  ;;  %v1079_v47 = vmin.f32 %v567_v36, 15.0  ;;  %v1080_v48 = vmin.f32 %v568_v37, 15.0  ;;  %v1081_v49 = vmin.f32 %v569_v38, 15.0 }
  0x27   :  { %v573_v50 = vmax.f32 %v61_v40, 0.0  ;;  %v64_v51 = vld [vmem:[#allocation2 + $0x148] sm:$0xff]  ;;  %v65_v52 = vld [vmem:[#allocation2 + $0x150] sm:$0xff]  ;;  %1590 = vst [vmem:[#allocation5 + $0xf8] sm:$0xff] %v1078_v41  ;;  %v1082_v53 = vmin.f32 %v570_v42, 15.0  ;;  %v1083_v54 = vmin.f32 %v571_v43, 15.0 }
  0x28   :  { %v1084_v55 = vmin.f32 %v572_v44, 15.0  ;;  %v574_v56 = vmax.f32 %v62_v45, 0.0  ;;  %v66_v57 = vld [vmem:[#allocation2 + $0x158] sm:$0xff]  ;;  %v67_v58 = vld [vmem:[#allocation2 + $0x160] sm:$0xff]  ;;  %1591 = vst [vmem:[#allocation5 + $0x100] sm:$0xff] %v1079_v47  ;;  %1592 = vst [vmem:[#allocation5 + $0x108] sm:$0xff] %v1080_v48 }
  0x29   :  { %1593 = vst [vmem:[#allocation5 + $0x110] sm:$0xff] %v1081_v49  ;;  %v1085_v59 = vmin.f32 %v573_v50, 15.0  ;;  %v575_v60 = vmax.f32 %v63_v46, 0.0  ;;  %v576_v61 = vmax.f32 %v64_v51, 0.0  ;;  %v577_v62 = vmax.f32 %v65_v52, 0.0  ;;  %v68_v63 = vld [vmem:[#allocation2 + $0x168] sm:$0xff] }
  0x2a   :  { %v69_v0 = vld [vmem:[#allocation2 + $0x170] sm:$0xff]  ;;  %1594 = vst [vmem:[#allocation5 + $0x118] sm:$0xff] %v1082_v53  ;;  %1595 = vst [vmem:[#allocation5 + $0x120] sm:$0xff] %v1083_v54  ;;  %v1086_v1 = vmin.f32 %v574_v56, 15.0  ;;  %v578_v2 = vmax.f32 %v66_v57, 0.0  ;;  %v579_v3 = vmax.f32 %v67_v58, 0.0 }
  0x2b   :  { %1596 = vst [vmem:[#allocation5 + $0x128] sm:$0xff] %v1084_v55  ;;  %v580_v4 = vmax.f32 %v68_v63, 0.0  ;;  %v70_v5 = vld [vmem:[#allocation2 + $0x178] sm:$0xff]  ;;  %v71_v6 = vld [vmem:[#allocation2 + $0x180] sm:$0xff]  ;;  %1597 = vst [vmem:[#allocation5 + $0x130] sm:$0xff] %v1085_v59  ;;  %v1087_v7 = vmin.f32 %v575_v60, 15.0 }
  0x2c   :  { %v1088_v8 = vmin.f32 %v576_v61, 15.0  ;;  %v1089_v9 = vmin.f32 %v577_v62, 15.0  ;;  %v581_v10 = vmax.f32 %v69_v0, 0.0  ;;  %v72_v11 = vld [vmem:[#allocation2 + $0x188] sm:$0xff]  ;;  %v73_v12 = vld [vmem:[#allocation2 + $0x190] sm:$0xff]  ;;  %1598 = vst [vmem:[#allocation5 + $0x138] sm:$0xff] %v1086_v1 }
  0x2d   :  { %v1090_v13 = vmin.f32 %v578_v2, 15.0  ;;  %v1091_v14 = vmin.f32 %v579_v3, 15.0  ;;  %v1092_v15 = vmin.f32 %v580_v4, 15.0  ;;  %v582_v16 = vmax.f32 %v70_v5, 0.0  ;;  %v74_v17 = vld [vmem:[#allocation2 + $0x198] sm:$0xff]  ;;  %v75_v18 = vld [vmem:[#allocation2 + $0x1a0] sm:$0xff] }
  0x2e   :  { %1599 = vst [vmem:[#allocation5 + $0x140] sm:$0xff] %v1087_v7  ;;  %1600 = vst [vmem:[#allocation5 + $0x148] sm:$0xff] %v1088_v8  ;;  %v1093_v19 = vmin.f32 %v581_v10, 15.0  ;;  %v583_v20 = vmax.f32 %v71_v6, 0.0  ;;  %v584_v21 = vmax.f32 %v72_v11, 0.0  ;;  %v585_v22 = vmax.f32 %v73_v12, 0.0 }
  0x2f   :  { %1601 = vst [vmem:[#allocation5 + $0x150] sm:$0xff] %v1089_v9  ;;  %v76_v23 = vld [vmem:[#allocation2 + $0x1a8] sm:$0xff]  ;;  %v77_v24 = vld [vmem:[#allocation2 + $0x1b0] sm:$0xff]  ;;  %1602 = vst [vmem:[#allocation5 + $0x158] sm:$0xff] %v1090_v13  ;;  %v1094_v25 = vmin.f32 %v582_v16, 15.0  ;;  %v586_v26 = vmax.f32 %v74_v17, 0.0 }
  0x30   :  { %1603 = vst [vmem:[#allocation5 + $0x160] sm:$0xff] %v1091_v14  ;;  %1604 = vst [vmem:[#allocation5 + $0x168] sm:$0xff] %v1092_v15  ;;  %v587_v27 = vmax.f32 %v75_v18, 0.0  ;;  %v588_v28 = vmax.f32 %v76_v23, 0.0  ;;  %v78_v29 = vld [vmem:[#allocation2 + $0x1b8] sm:$0xff]  ;;  %v79_v30 = vld [vmem:[#allocation2 + $0x1c0] sm:$0xff] }
  0x31   :  { %1605 = vst [vmem:[#allocation5 + $0x170] sm:$0xff] %v1093_v19  ;;  %v1095_v31 = vmin.f32 %v583_v20, 15.0  ;;  %v1096_v32 = vmin.f32 %v584_v21, 15.0  ;;  %v1097_v33 = vmin.f32 %v585_v22, 15.0  ;;  %v589_v34 = vmax.f32 %v77_v24, 0.0  ;;  %v80_v35 = vld [vmem:[#allocation2 + $0x1c8] sm:$0xff] }
  0x32   :  { %v81_v36 = vld [vmem:[#allocation2 + $0x1d0] sm:$0xff]  ;;  %1606 = vst [vmem:[#allocation5 + $0x178] sm:$0xff] %v1094_v25  ;;  %v1098_v37 = vmin.f32 %v586_v26, 15.0  ;;  %v1099_v38 = vmin.f32 %v587_v27, 15.0  ;;  %v1100_v39 = vmin.f32 %v588_v28, 15.0  ;;  %v590_v40 = vmax.f32 %v78_v29, 0.0 }
  0x33   :  { %v82_v41 = vld [vmem:[#allocation2 + $0x1d8] sm:$0xff]  ;;  %v83_v42 = vld [vmem:[#allocation2 + $0x1e0] sm:$0xff]  ;;  %1607 = vst [vmem:[#allocation5 + $0x180] sm:$0xff] %v1095_v31  ;;  %1608 = vst [vmem:[#allocation5 + $0x188] sm:$0xff] %v1096_v32  ;;  %v1101_v43 = vmin.f32 %v589_v34, 15.0  ;;  %v591_v44 = vmax.f32 %v79_v30, 0.0 }
  0x34   :  { %1609 = vst [vmem:[#allocation5 + $0x190] sm:$0xff] %v1097_v33  ;;  %v592_v45 = vmax.f32 %v80_v35, 0.0  ;;  %v593_v46 = vmax.f32 %v81_v36, 0.0  ;;  %v84_v47 = vld [vmem:[#allocation2 + $0x1e8] sm:$0xff]  ;;  %v85_v48 = vld [vmem:[#allocation2 + $0x1f0] sm:$0xff]  ;;  %1610 = vst [vmem:[#allocation5 + $0x198] sm:$0xff] %v1098_v37 }
  0x35   :  { %1611 = vst [vmem:[#allocation5 + $0x1a0] sm:$0xff] %v1099_v38  ;;  %1612 = vst [vmem:[#allocation5 + $0x1a8] sm:$0xff] %v1100_v39  ;;  %v1102_v49 = vmin.f32 %v590_v40, 15.0  ;;  %v594_v50 = vmax.f32 %v82_v41, 0.0  ;;  %v595_v51 = vmax.f32 %v83_v42, 0.0  ;;  %v596_v52 = vmax.f32 %v84_v47, 0.0 }
  0x36   :  { %v86_v53 = vld [vmem:[#allocation2 + $0x1f8] sm:$0xff]  ;;  %v87_v54 = vld [vmem:[#allocation2 + $0x200] sm:$0xff]  ;;  %1613 = vst [vmem:[#allocation5 + $0x1b0] sm:$0xff] %v1101_v43  ;;  %v1103_v55 = vmin.f32 %v591_v44, 15.0  ;;  %v1104_v56 = vmin.f32 %v592_v45, 15.0  ;;  %v1105_v57 = vmin.f32 %v593_v46, 15.0 }
  0x37   :  { %v597_v58 = vmax.f32 %v85_v48, 0.0  ;;  %v88_v59 = vld [vmem:[#allocation2 + $0x208] sm:$0xff]  ;;  %v89_v60 = vld [vmem:[#allocation2 + $0x210] sm:$0xff]  ;;  %1614 = vst [vmem:[#allocation5 + $0x1b8] sm:$0xff] %v1102_v49  ;;  %v1106_v61 = vmin.f32 %v594_v50, 15.0  ;;  %v1107_v62 = vmin.f32 %v595_v51, 15.0 }
  0x38   :  { %v1108_v63 = vmin.f32 %v596_v52, 15.0  ;;  %v598_v0 = vmax.f32 %v86_v53, 0.0  ;;  %v90_v1 = vld [vmem:[#allocation2 + $0x218] sm:$0xff]  ;;  %v91_v2 = vld [vmem:[#allocation2 + $0x220] sm:$0xff]  ;;  %1615 = vst [vmem:[#allocation5 + $0x1c0] sm:$0xff] %v1103_v55  ;;  %1616 = vst [vmem:[#allocation5 + $0x1c8] sm:$0xff] %v1104_v56 }
  0x39   :  { %1617 = vst [vmem:[#allocation5 + $0x1d0] sm:$0xff] %v1105_v57  ;;  %v1109_v3 = vmin.f32 %v597_v58, 15.0  ;;  %v599_v4 = vmax.f32 %v87_v54, 0.0  ;;  %v600_v5 = vmax.f32 %v88_v59, 0.0  ;;  %v601_v6 = vmax.f32 %v89_v60, 0.0  ;;  %v92_v7 = vld [vmem:[#allocation2 + $0x228] sm:$0xff] }
  0x3a   :  { %v93_v8 = vld [vmem:[#allocation2 + $0x230] sm:$0xff]  ;;  %1618 = vst [vmem:[#allocation5 + $0x1d8] sm:$0xff] %v1106_v61  ;;  %1619 = vst [vmem:[#allocation5 + $0x1e0] sm:$0xff] %v1107_v62  ;;  %v1110_v9 = vmin.f32 %v598_v0, 15.0  ;;  %v602_v10 = vmax.f32 %v90_v1, 0.0  ;;  %v603_v11 = vmax.f32 %v91_v2, 0.0 }
  0x3b   :  { %1620 = vst [vmem:[#allocation5 + $0x1e8] sm:$0xff] %v1108_v63  ;;  %v604_v12 = vmax.f32 %v92_v7, 0.0  ;;  %v94_v13 = vld [vmem:[#allocation2 + $0x238] sm:$0xff]  ;;  %v95_v14 = vld [vmem:[#allocation2 + $0x240] sm:$0xff]  ;;  %1621 = vst [vmem:[#allocation5 + $0x1f0] sm:$0xff] %v1109_v3  ;;  %v1111_v15 = vmin.f32 %v599_v4, 15.0 }
  0x3c   :  { %v1112_v16 = vmin.f32 %v600_v5, 15.0  ;;  %v1113_v17 = vmin.f32 %v601_v6, 15.0  ;;  %v605_v18 = vmax.f32 %v93_v8, 0.0  ;;  %v96_v19 = vld [vmem:[#allocation2 + $0x248] sm:$0xff]  ;;  %v97_v20 = vld [vmem:[#allocation2 + $0x250] sm:$0xff]  ;;  %1622 = vst [vmem:[#allocation5 + $0x1f8] sm:$0xff] %v1110_v9 }
  0x3d   :  { %v1114_v21 = vmin.f32 %v602_v10, 15.0  ;;  %v1115_v22 = vmin.f32 %v603_v11, 15.0  ;;  %v1116_v23 = vmin.f32 %v604_v12, 15.0  ;;  %v606_v24 = vmax.f32 %v94_v13, 0.0  ;;  %v98_v25 = vld [vmem:[#allocation2 + $0x258] sm:$0xff]  ;;  %v99_v26 = vld [vmem:[#allocation2 + $0x260] sm:$0xff] }
  0x3e   :  { %1623 = vst [vmem:[#allocation5 + $0x200] sm:$0xff] %v1111_v15  ;;  %1624 = vst [vmem:[#allocation5 + $0x208] sm:$0xff] %v1112_v16  ;;  %v1117_v27 = vmin.f32 %v605_v18, 15.0  ;;  %v607_v28 = vmax.f32 %v95_v14, 0.0  ;;  %v608_v29 = vmax.f32 %v96_v19, 0.0  ;;  %v609_v30 = vmax.f32 %v97_v20, 0.0 }
  0x3f   :  { %1625 = vst [vmem:[#allocation5 + $0x210] sm:$0xff] %v1113_v17  ;;  %v100_v31 = vld [vmem:[#allocation2 + $0x268] sm:$0xff]  ;;  %v101_v32 = vld [vmem:[#allocation2 + $0x270] sm:$0xff]  ;;  %1626 = vst [vmem:[#allocation5 + $0x218] sm:$0xff] %v1114_v21  ;;  %v1118_v33 = vmin.f32 %v606_v24, 15.0  ;;  %v610_v34 = vmax.f32 %v98_v25, 0.0 }
  0x40   :  { %1627 = vst [vmem:[#allocation5 + $0x220] sm:$0xff] %v1115_v22  ;;  %1628 = vst [vmem:[#allocation5 + $0x228] sm:$0xff] %v1116_v23  ;;  %v611_v35 = vmax.f32 %v99_v26, 0.0  ;;  %v612_v36 = vmax.f32 %v100_v31, 0.0  ;;  %v102_v37 = vld [vmem:[#allocation2 + $0x278] sm:$0xff]  ;;  %v103_v38 = vld [vmem:[#allocation2 + $0x280] sm:$0xff] }
  0x41   :  { %1629 = vst [vmem:[#allocation5 + $0x230] sm:$0xff] %v1117_v27  ;;  %v1119_v39 = vmin.f32 %v607_v28, 15.0  ;;  %v1120_v40 = vmin.f32 %v608_v29, 15.0  ;;  %v1121_v41 = vmin.f32 %v609_v30, 15.0  ;;  %v613_v42 = vmax.f32 %v101_v32, 0.0  ;;  %v104_v43 = vld [vmem:[#allocation2 + $0x288] sm:$0xff] }
  0x42   :  { %v105_v44 = vld [vmem:[#allocation2 + $0x290] sm:$0xff]  ;;  %1630 = vst [vmem:[#allocation5 + $0x238] sm:$0xff] %v1118_v33  ;;  %v1122_v45 = vmin.f32 %v610_v34, 15.0  ;;  %v1123_v46 = vmin.f32 %v611_v35, 15.0  ;;  %v1124_v47 = vmin.f32 %v612_v36, 15.0  ;;  %v614_v48 = vmax.f32 %v102_v37, 0.0 }
  0x43   :  { %v106_v49 = vld [vmem:[#allocation2 + $0x298] sm:$0xff]  ;;  %v107_v50 = vld [vmem:[#allocation2 + $0x2a0] sm:$0xff]  ;;  %1631 = vst [vmem:[#allocation5 + $0x240] sm:$0xff] %v1119_v39  ;;  %1632 = vst [vmem:[#allocation5 + $0x248] sm:$0xff] %v1120_v40  ;;  %v1125_v51 = vmin.f32 %v613_v42, 15.0  ;;  %v615_v52 = vmax.f32 %v103_v38, 0.0 }
  0x44   :  { %1633 = vst [vmem:[#allocation5 + $0x250] sm:$0xff] %v1121_v41  ;;  %v616_v53 = vmax.f32 %v104_v43, 0.0  ;;  %v617_v54 = vmax.f32 %v105_v44, 0.0  ;;  %v108_v55 = vld [vmem:[#allocation2 + $0x2a8] sm:$0xff]  ;;  %v109_v56 = vld [vmem:[#allocation2 + $0x2b0] sm:$0xff]  ;;  %1634 = vst [vmem:[#allocation5 + $0x258] sm:$0xff] %v1122_v45 }
  0x45   :  { %1635 = vst [vmem:[#allocation5 + $0x260] sm:$0xff] %v1123_v46  ;;  %1636 = vst [vmem:[#allocation5 + $0x268] sm:$0xff] %v1124_v47  ;;  %v1126_v57 = vmin.f32 %v614_v48, 15.0  ;;  %v618_v58 = vmax.f32 %v106_v49, 0.0  ;;  %v619_v59 = vmax.f32 %v107_v50, 0.0  ;;  %v620_v60 = vmax.f32 %v108_v55, 0.0 }
  0x46   :  { %v110_v61 = vld [vmem:[#allocation2 + $0x2b8] sm:$0xff]  ;;  %v111_v62 = vld [vmem:[#allocation2 + $0x2c0] sm:$0xff]  ;;  %1637 = vst [vmem:[#allocation5 + $0x270] sm:$0xff] %v1125_v51  ;;  %v1127_v63 = vmin.f32 %v615_v52, 15.0  ;;  %v1128_v0 = vmin.f32 %v616_v53, 15.0  ;;  %v1129_v1 = vmin.f32 %v617_v54, 15.0 }
  0x47   :  { %v621_v2 = vmax.f32 %v109_v56, 0.0  ;;  %v112_v3 = vld [vmem:[#allocation2 + $0x2c8] sm:$0xff]  ;;  %v113_v4 = vld [vmem:[#allocation2 + $0x2d0] sm:$0xff]  ;;  %1638 = vst [vmem:[#allocation5 + $0x278] sm:$0xff] %v1126_v57  ;;  %v1130_v5 = vmin.f32 %v618_v58, 15.0  ;;  %v1131_v6 = vmin.f32 %v619_v59, 15.0 }
  0x48   :  { %v1132_v7 = vmin.f32 %v620_v60, 15.0  ;;  %v622_v8 = vmax.f32 %v110_v61, 0.0  ;;  %v114_v9 = vld [vmem:[#allocation2 + $0x2d8] sm:$0xff]  ;;  %v115_v10 = vld [vmem:[#allocation2 + $0x2e0] sm:$0xff]  ;;  %1639 = vst [vmem:[#allocation5 + $0x280] sm:$0xff] %v1127_v63  ;;  %1640 = vst [vmem:[#allocation5 + $0x288] sm:$0xff] %v1128_v0 }
  0x49   :  { %1641 = vst [vmem:[#allocation5 + $0x290] sm:$0xff] %v1129_v1  ;;  %v1133_v11 = vmin.f32 %v621_v2, 15.0  ;;  %v623_v12 = vmax.f32 %v111_v62, 0.0  ;;  %v624_v13 = vmax.f32 %v112_v3, 0.0  ;;  %v625_v14 = vmax.f32 %v113_v4, 0.0  ;;  %v116_v15 = vld [vmem:[#allocation2 + $0x2e8] sm:$0xff] }
  0x4a   :  { %v117_v16 = vld [vmem:[#allocation2 + $0x2f0] sm:$0xff]  ;;  %1642 = vst [vmem:[#allocation5 + $0x298] sm:$0xff] %v1130_v5  ;;  %1643 = vst [vmem:[#allocation5 + $0x2a0] sm:$0xff] %v1131_v6  ;;  %v1134_v17 = vmin.f32 %v622_v8, 15.0  ;;  %v626_v18 = vmax.f32 %v114_v9, 0.0  ;;  %v627_v19 = vmax.f32 %v115_v10, 0.0 }
  0x4b   :  { %1644 = vst [vmem:[#allocation5 + $0x2a8] sm:$0xff] %v1132_v7  ;;  %v628_v20 = vmax.f32 %v116_v15, 0.0  ;;  %v118_v21 = vld [vmem:[#allocation2 + $0x2f8] sm:$0xff]  ;;  %v119_v22 = vld [vmem:[#allocation2 + $0x300] sm:$0xff]  ;;  %1645 = vst [vmem:[#allocation5 + $0x2b0] sm:$0xff] %v1133_v11  ;;  %v1135_v23 = vmin.f32 %v623_v12, 15.0 }
  0x4c   :  { %v1136_v24 = vmin.f32 %v624_v13, 15.0  ;;  %v1137_v25 = vmin.f32 %v625_v14, 15.0  ;;  %v629_v26 = vmax.f32 %v117_v16, 0.0  ;;  %v120_v27 = vld [vmem:[#allocation2 + $0x308] sm:$0xff]  ;;  %v121_v28 = vld [vmem:[#allocation2 + $0x310] sm:$0xff]  ;;  %1646 = vst [vmem:[#allocation5 + $0x2b8] sm:$0xff] %v1134_v17 }
  0x4d   :  { %v1138_v29 = vmin.f32 %v626_v18, 15.0  ;;  %v1139_v30 = vmin.f32 %v627_v19, 15.0  ;;  %v1140_v31 = vmin.f32 %v628_v20, 15.0  ;;  %v630_v32 = vmax.f32 %v118_v21, 0.0  ;;  %v122_v33 = vld [vmem:[#allocation2 + $0x318] sm:$0xff]  ;;  %v123_v34 = vld [vmem:[#allocation2 + $0x320] sm:$0xff] }
  0x4e   :  { %1647 = vst [vmem:[#allocation5 + $0x2c0] sm:$0xff] %v1135_v23  ;;  %1648 = vst [vmem:[#allocation5 + $0x2c8] sm:$0xff] %v1136_v24  ;;  %v1141_v35 = vmin.f32 %v629_v26, 15.0  ;;  %v631_v36 = vmax.f32 %v119_v22, 0.0  ;;  %v632_v37 = vmax.f32 %v120_v27, 0.0  ;;  %v633_v38 = vmax.f32 %v121_v28, 0.0 }
  0x4f   :  { %1649 = vst [vmem:[#allocation5 + $0x2d0] sm:$0xff] %v1137_v25  ;;  %v124_v39 = vld [vmem:[#allocation2 + $0x328] sm:$0xff]  ;;  %v125_v40 = vld [vmem:[#allocation2 + $0x330] sm:$0xff]  ;;  %1650 = vst [vmem:[#allocation5 + $0x2d8] sm:$0xff] %v1138_v29  ;;  %v1142_v41 = vmin.f32 %v630_v32, 15.0  ;;  %v634_v42 = vmax.f32 %v122_v33, 0.0 }
  0x50   :  { %1651 = vst [vmem:[#allocation5 + $0x2e0] sm:$0xff] %v1139_v30  ;;  %1652 = vst [vmem:[#allocation5 + $0x2e8] sm:$0xff] %v1140_v31  ;;  %v635_v43 = vmax.f32 %v123_v34, 0.0  ;;  %v636_v44 = vmax.f32 %v124_v39, 0.0  ;;  %v126_v45 = vld [vmem:[#allocation2 + $0x338] sm:$0xff]  ;;  %v127_v46 = vld [vmem:[#allocation2 + $0x340] sm:$0xff] }
  0x51   :  { %1653 = vst [vmem:[#allocation5 + $0x2f0] sm:$0xff] %v1141_v35  ;;  %v1143_v47 = vmin.f32 %v631_v36, 15.0  ;;  %v1144_v48 = vmin.f32 %v632_v37, 15.0  ;;  %v1145_v49 = vmin.f32 %v633_v38, 15.0  ;;  %v637_v50 = vmax.f32 %v125_v40, 0.0  ;;  %v128_v51 = vld [vmem:[#allocation2 + $0x348] sm:$0xff] }
  0x52   :  { %v129_v52 = vld [vmem:[#allocation2 + $0x350] sm:$0xff]  ;;  %1654 = vst [vmem:[#allocation5 + $0x2f8] sm:$0xff] %v1142_v41  ;;  %v1146_v53 = vmin.f32 %v634_v42, 15.0  ;;  %v1147_v54 = vmin.f32 %v635_v43, 15.0  ;;  %v1148_v55 = vmin.f32 %v636_v44, 15.0  ;;  %v638_v56 = vmax.f32 %v126_v45, 0.0 }
  0x53   :  { %v130_v57 = vld [vmem:[#allocation2 + $0x358] sm:$0xff]  ;;  %v131_v58 = vld [vmem:[#allocation2 + $0x360] sm:$0xff]  ;;  %1655 = vst [vmem:[#allocation5 + $0x300] sm:$0xff] %v1143_v47  ;;  %1656 = vst [vmem:[#allocation5 + $0x308] sm:$0xff] %v1144_v48  ;;  %v1149_v59 = vmin.f32 %v637_v50, 15.0  ;;  %v639_v60 = vmax.f32 %v127_v46, 0.0 }
  0x54   :  { %1657 = vst [vmem:[#allocation5 + $0x310] sm:$0xff] %v1145_v49  ;;  %v640_v61 = vmax.f32 %v128_v51, 0.0  ;;  %v641_v62 = vmax.f32 %v129_v52, 0.0  ;;  %v132_v63 = vld [vmem:[#allocation2 + $0x368] sm:$0xff]  ;;  %v133_v0 = vld [vmem:[#allocation2 + $0x370] sm:$0xff]  ;;  %1658 = vst [vmem:[#allocation5 + $0x318] sm:$0xff] %v1146_v53 }
  0x55   :  { %1659 = vst [vmem:[#allocation5 + $0x320] sm:$0xff] %v1147_v54  ;;  %1660 = vst [vmem:[#allocation5 + $0x328] sm:$0xff] %v1148_v55  ;;  %v1150_v1 = vmin.f32 %v638_v56, 15.0  ;;  %v642_v2 = vmax.f32 %v130_v57, 0.0  ;;  %v643_v3 = vmax.f32 %v131_v58, 0.0  ;;  %v644_v4 = vmax.f32 %v132_v63, 0.0 }
  0x56   :  { %v134_v5 = vld [vmem:[#allocation2 + $0x378] sm:$0xff]  ;;  %v135_v6 = vld [vmem:[#allocation2 + $0x380] sm:$0xff]  ;;  %1661 = vst [vmem:[#allocation5 + $0x330] sm:$0xff] %v1149_v59  ;;  %v1151_v7 = vmin.f32 %v639_v60, 15.0  ;;  %v1152_v8 = vmin.f32 %v640_v61, 15.0  ;;  %v1153_v9 = vmin.f32 %v641_v62, 15.0 }
  0x57   :  { %v645_v10 = vmax.f32 %v133_v0, 0.0  ;;  %v136_v11 = vld [vmem:[#allocation2 + $0x388] sm:$0xff]  ;;  %v137_v12 = vld [vmem:[#allocation2 + $0x390] sm:$0xff]  ;;  %1662 = vst [vmem:[#allocation5 + $0x338] sm:$0xff] %v1150_v1  ;;  %v1154_v13 = vmin.f32 %v642_v2, 15.0  ;;  %v1155_v14 = vmin.f32 %v643_v3, 15.0 }
  0x58   :  { %v1156_v15 = vmin.f32 %v644_v4, 15.0  ;;  %v646_v16 = vmax.f32 %v134_v5, 0.0  ;;  %v138_v17 = vld [vmem:[#allocation2 + $0x398] sm:$0xff]  ;;  %v139_v18 = vld [vmem:[#allocation2 + $0x3a0] sm:$0xff]  ;;  %1663 = vst [vmem:[#allocation5 + $0x340] sm:$0xff] %v1151_v7  ;;  %1664 = vst [vmem:[#allocation5 + $0x348] sm:$0xff] %v1152_v8 }
  0x59   :  { %1665 = vst [vmem:[#allocation5 + $0x350] sm:$0xff] %v1153_v9  ;;  %v1157_v19 = vmin.f32 %v645_v10, 15.0  ;;  %v647_v20 = vmax.f32 %v135_v6, 0.0  ;;  %v648_v21 = vmax.f32 %v136_v11, 0.0  ;;  %v649_v22 = vmax.f32 %v137_v12, 0.0  ;;  %v140_v23 = vld [vmem:[#allocation2 + $0x3a8] sm:$0xff] }
  0x5a   :  { %v141_v24 = vld [vmem:[#allocation2 + $0x3b0] sm:$0xff]  ;;  %1666 = vst [vmem:[#allocation5 + $0x358] sm:$0xff] %v1154_v13  ;;  %1667 = vst [vmem:[#allocation5 + $0x360] sm:$0xff] %v1155_v14  ;;  %v1158_v25 = vmin.f32 %v646_v16, 15.0  ;;  %v650_v26 = vmax.f32 %v138_v17, 0.0  ;;  %v651_v27 = vmax.f32 %v139_v18, 0.0 }
  0x5b   :  { %1668 = vst [vmem:[#allocation5 + $0x368] sm:$0xff] %v1156_v15  ;;  %v652_v28 = vmax.f32 %v140_v23, 0.0  ;;  %v142_v29 = vld [vmem:[#allocation2 + $0x3b8] sm:$0xff]  ;;  %v143_v30 = vld [vmem:[#allocation2 + $0x3c0] sm:$0xff]  ;;  %1669 = vst [vmem:[#allocation5 + $0x370] sm:$0xff] %v1157_v19  ;;  %v1159_v31 = vmin.f32 %v647_v20, 15.0 }
  0x5c   :  { %v1160_v32 = vmin.f32 %v648_v21, 15.0  ;;  %v1161_v33 = vmin.f32 %v649_v22, 15.0  ;;  %v653_v34 = vmax.f32 %v141_v24, 0.0  ;;  %v144_v35 = vld [vmem:[#allocation2 + $0x3c8] sm:$0xff]  ;;  %v145_v36 = vld [vmem:[#allocation2 + $0x3d0] sm:$0xff]  ;;  %1670 = vst [vmem:[#allocation5 + $0x378] sm:$0xff] %v1158_v25 }
  0x5d   :  { %v1162_v37 = vmin.f32 %v650_v26, 15.0  ;;  %v1163_v38 = vmin.f32 %v651_v27, 15.0  ;;  %v1164_v39 = vmin.f32 %v652_v28, 15.0  ;;  %v654_v40 = vmax.f32 %v142_v29, 0.0  ;;  %v146_v41 = vld [vmem:[#allocation2 + $0x3d8] sm:$0xff]  ;;  %v147_v42 = vld [vmem:[#allocation2 + $0x3e0] sm:$0xff] }
  0x5e   :  { %1671 = vst [vmem:[#allocation5 + $0x380] sm:$0xff] %v1159_v31  ;;  %1672 = vst [vmem:[#allocation5 + $0x388] sm:$0xff] %v1160_v32  ;;  %v1165_v43 = vmin.f32 %v653_v34, 15.0  ;;  %v655_v44 = vmax.f32 %v143_v30, 0.0  ;;  %v656_v45 = vmax.f32 %v144_v35, 0.0  ;;  %v657_v46 = vmax.f32 %v145_v36, 0.0 }
  0x5f   :  { %1673 = vst [vmem:[#allocation5 + $0x390] sm:$0xff] %v1161_v33  ;;  %v148_v47 = vld [vmem:[#allocation2 + $0x3e8] sm:$0xff]  ;;  %v149_v48 = vld [vmem:[#allocation2 + $0x3f0] sm:$0xff]  ;;  %1674 = vst [vmem:[#allocation5 + $0x398] sm:$0xff] %v1162_v37  ;;  %v1166_v49 = vmin.f32 %v654_v40, 15.0  ;;  %v658_v50 = vmax.f32 %v146_v41, 0.0 }
  0x60   :  { %1675 = vst [vmem:[#allocation5 + $0x3a0] sm:$0xff] %v1163_v38  ;;  %1676 = vst [vmem:[#allocation5 + $0x3a8] sm:$0xff] %v1164_v39  ;;  %v659_v51 = vmax.f32 %v147_v42, 0.0  ;;  %v660_v52 = vmax.f32 %v148_v47, 0.0  ;;  %v150_v53 = vld [vmem:[#allocation2 + $0x3f8] sm:$0xff]  ;;  %v151_v54 = vld [vmem:[#allocation2 + $0x400] sm:$0xff] }
  0x61   :  { %1677 = vst [vmem:[#allocation5 + $0x3b0] sm:$0xff] %v1165_v43  ;;  %v1167_v55 = vmin.f32 %v655_v44, 15.0  ;;  %v1168_v56 = vmin.f32 %v656_v45, 15.0  ;;  %v1169_v57 = vmin.f32 %v657_v46, 15.0  ;;  %v661_v58 = vmax.f32 %v149_v48, 0.0  ;;  %v152_v59 = vld [vmem:[#allocation2 + $0x408] sm:$0xff] }
  0x62   :  { %v153_v60 = vld [vmem:[#allocation2 + $0x410] sm:$0xff]  ;;  %1678 = vst [vmem:[#allocation5 + $0x3b8] sm:$0xff] %v1166_v49  ;;  %v1170_v61 = vmin.f32 %v658_v50, 15.0  ;;  %v1171_v62 = vmin.f32 %v659_v51, 15.0  ;;  %v1172_v63 = vmin.f32 %v660_v52, 15.0  ;;  %v662_v0 = vmax.f32 %v150_v53, 0.0 }
  0x63   :  { %v154_v1 = vld [vmem:[#allocation2 + $0x418] sm:$0xff]  ;;  %v155_v2 = vld [vmem:[#allocation2 + $0x420] sm:$0xff]  ;;  %1679 = vst [vmem:[#allocation5 + $0x3c0] sm:$0xff] %v1167_v55  ;;  %1680 = vst [vmem:[#allocation5 + $0x3c8] sm:$0xff] %v1168_v56  ;;  %v1173_v3 = vmin.f32 %v661_v58, 15.0  ;;  %v663_v4 = vmax.f32 %v151_v54, 0.0 }
  0x64   :  { %1681 = vst [vmem:[#allocation5 + $0x3d0] sm:$0xff] %v1169_v57  ;;  %v664_v5 = vmax.f32 %v152_v59, 0.0  ;;  %v665_v6 = vmax.f32 %v153_v60, 0.0  ;;  %v156_v7 = vld [vmem:[#allocation2 + $0x428] sm:$0xff]  ;;  %v157_v8 = vld [vmem:[#allocation2 + $0x430] sm:$0xff]  ;;  %1682 = vst [vmem:[#allocation5 + $0x3d8] sm:$0xff] %v1170_v61 }
  0x65   :  { %1683 = vst [vmem:[#allocation5 + $0x3e0] sm:$0xff] %v1171_v62  ;;  %1684 = vst [vmem:[#allocation5 + $0x3e8] sm:$0xff] %v1172_v63  ;;  %v1174_v9 = vmin.f32 %v662_v0, 15.0  ;;  %v666_v10 = vmax.f32 %v154_v1, 0.0  ;;  %v667_v11 = vmax.f32 %v155_v2, 0.0  ;;  %v668_v12 = vmax.f32 %v156_v7, 0.0 }
  0x66   :  { %v158_v13 = vld [vmem:[#allocation2 + $0x438] sm:$0xff]  ;;  %v159_v14 = vld [vmem:[#allocation2 + $0x440] sm:$0xff]  ;;  %1685 = vst [vmem:[#allocation5 + $0x3f0] sm:$0xff] %v1173_v3  ;;  %v1175_v15 = vmin.f32 %v663_v4, 15.0  ;;  %v1176_v16 = vmin.f32 %v664_v5, 15.0  ;;  %v1177_v17 = vmin.f32 %v665_v6, 15.0 }
  0x67   :  { %v669_v18 = vmax.f32 %v157_v8, 0.0  ;;  %v160_v19 = vld [vmem:[#allocation2 + $0x448] sm:$0xff]  ;;  %v161_v20 = vld [vmem:[#allocation2 + $0x450] sm:$0xff]  ;;  %1686 = vst [vmem:[#allocation5 + $0x3f8] sm:$0xff] %v1174_v9  ;;  %v1178_v21 = vmin.f32 %v666_v10, 15.0  ;;  %v1179_v22 = vmin.f32 %v667_v11, 15.0 }
  0x68   :  { %v1180_v23 = vmin.f32 %v668_v12, 15.0  ;;  %v670_v24 = vmax.f32 %v158_v13, 0.0  ;;  %v162_v25 = vld [vmem:[#allocation2 + $0x458] sm:$0xff]  ;;  %v163_v26 = vld [vmem:[#allocation2 + $0x460] sm:$0xff]  ;;  %1687 = vst [vmem:[#allocation5 + $0x400] sm:$0xff] %v1175_v15  ;;  %1688 = vst [vmem:[#allocation5 + $0x408] sm:$0xff] %v1176_v16 }
  0x69   :  { %1689 = vst [vmem:[#allocation5 + $0x410] sm:$0xff] %v1177_v17  ;;  %v1181_v27 = vmin.f32 %v669_v18, 15.0  ;;  %v671_v28 = vmax.f32 %v159_v14, 0.0  ;;  %v672_v29 = vmax.f32 %v160_v19, 0.0  ;;  %v673_v30 = vmax.f32 %v161_v20, 0.0  ;;  %v164_v31 = vld [vmem:[#allocation2 + $0x468] sm:$0xff] }
  0x6a   :  { %v165_v32 = vld [vmem:[#allocation2 + $0x470] sm:$0xff]  ;;  %1690 = vst [vmem:[#allocation5 + $0x418] sm:$0xff] %v1178_v21  ;;  %1691 = vst [vmem:[#allocation5 + $0x420] sm:$0xff] %v1179_v22  ;;  %v1182_v33 = vmin.f32 %v670_v24, 15.0  ;;  %v674_v34 = vmax.f32 %v162_v25, 0.0  ;;  %v675_v35 = vmax.f32 %v163_v26, 0.0 }
  0x6b   :  { %1692 = vst [vmem:[#allocation5 + $0x428] sm:$0xff] %v1180_v23  ;;  %v676_v36 = vmax.f32 %v164_v31, 0.0  ;;  %v166_v37 = vld [vmem:[#allocation2 + $0x478] sm:$0xff]  ;;  %v167_v38 = vld [vmem:[#allocation2 + $0x480] sm:$0xff]  ;;  %1693 = vst [vmem:[#allocation5 + $0x430] sm:$0xff] %v1181_v27  ;;  %v1183_v39 = vmin.f32 %v671_v28, 15.0 }
  0x6c   :  { %v1184_v40 = vmin.f32 %v672_v29, 15.0  ;;  %v1185_v41 = vmin.f32 %v673_v30, 15.0  ;;  %v677_v42 = vmax.f32 %v165_v32, 0.0  ;;  %v168_v43 = vld [vmem:[#allocation2 + $0x488] sm:$0xff]  ;;  %v169_v44 = vld [vmem:[#allocation2 + $0x490] sm:$0xff]  ;;  %1694 = vst [vmem:[#allocation5 + $0x438] sm:$0xff] %v1182_v33 }
  0x6d   :  { %v1186_v45 = vmin.f32 %v674_v34, 15.0  ;;  %v1187_v46 = vmin.f32 %v675_v35, 15.0  ;;  %v1188_v47 = vmin.f32 %v676_v36, 15.0  ;;  %v678_v48 = vmax.f32 %v166_v37, 0.0  ;;  %v170_v49 = vld [vmem:[#allocation2 + $0x498] sm:$0xff]  ;;  %v171_v50 = vld [vmem:[#allocation2 + $0x4a0] sm:$0xff] }
  0x6e   :  { %1695 = vst [vmem:[#allocation5 + $0x440] sm:$0xff] %v1183_v39  ;;  %1696 = vst [vmem:[#allocation5 + $0x448] sm:$0xff] %v1184_v40  ;;  %v1189_v51 = vmin.f32 %v677_v42, 15.0  ;;  %v679_v52 = vmax.f32 %v167_v38, 0.0  ;;  %v680_v53 = vmax.f32 %v168_v43, 0.0  ;;  %v681_v54 = vmax.f32 %v169_v44, 0.0 }
  0x6f   :  { %1697 = vst [vmem:[#allocation5 + $0x450] sm:$0xff] %v1185_v41  ;;  %v172_v55 = vld [vmem:[#allocation2 + $0x4a8] sm:$0xff]  ;;  %v173_v56 = vld [vmem:[#allocation2 + $0x4b0] sm:$0xff]  ;;  %1698 = vst [vmem:[#allocation5 + $0x458] sm:$0xff] %v1186_v45  ;;  %v1190_v57 = vmin.f32 %v678_v48, 15.0  ;;  %v682_v58 = vmax.f32 %v170_v49, 0.0 }
  0x70   :  { %1699 = vst [vmem:[#allocation5 + $0x460] sm:$0xff] %v1187_v46  ;;  %1700 = vst [vmem:[#allocation5 + $0x468] sm:$0xff] %v1188_v47  ;;  %v683_v59 = vmax.f32 %v171_v50, 0.0  ;;  %v684_v60 = vmax.f32 %v172_v55, 0.0  ;;  %v174_v61 = vld [vmem:[#allocation2 + $0x4b8] sm:$0xff]  ;;  %v175_v62 = vld [vmem:[#allocation2 + $0x4c0] sm:$0xff] }
  0x71   :  { %1701 = vst [vmem:[#allocation5 + $0x470] sm:$0xff] %v1189_v51  ;;  %v1191_v63 = vmin.f32 %v679_v52, 15.0  ;;  %v1192_v0 = vmin.f32 %v680_v53, 15.0  ;;  %v1193_v1 = vmin.f32 %v681_v54, 15.0  ;;  %v685_v2 = vmax.f32 %v173_v56, 0.0  ;;  %v176_v3 = vld [vmem:[#allocation2 + $0x4c8] sm:$0xff] }
  0x72   :  { %v177_v4 = vld [vmem:[#allocation2 + $0x4d0] sm:$0xff]  ;;  %1702 = vst [vmem:[#allocation5 + $0x478] sm:$0xff] %v1190_v57  ;;  %v1194_v5 = vmin.f32 %v682_v58, 15.0  ;;  %v1195_v6 = vmin.f32 %v683_v59, 15.0  ;;  %v1196_v7 = vmin.f32 %v684_v60, 15.0  ;;  %v686_v8 = vmax.f32 %v174_v61, 0.0 }
  0x73   :  { %v178_v9 = vld [vmem:[#allocation2 + $0x4d8] sm:$0xff]  ;;  %v179_v10 = vld [vmem:[#allocation2 + $0x4e0] sm:$0xff]  ;;  %1703 = vst [vmem:[#allocation5 + $0x480] sm:$0xff] %v1191_v63  ;;  %1704 = vst [vmem:[#allocation5 + $0x488] sm:$0xff] %v1192_v0  ;;  %v1197_v11 = vmin.f32 %v685_v2, 15.0  ;;  %v687_v12 = vmax.f32 %v175_v62, 0.0 }
  0x74   :  { %1705 = vst [vmem:[#allocation5 + $0x490] sm:$0xff] %v1193_v1  ;;  %v688_v13 = vmax.f32 %v176_v3, 0.0  ;;  %v689_v14 = vmax.f32 %v177_v4, 0.0  ;;  %v180_v15 = vld [vmem:[#allocation2 + $0x4e8] sm:$0xff]  ;;  %v181_v16 = vld [vmem:[#allocation2 + $0x4f0] sm:$0xff]  ;;  %1706 = vst [vmem:[#allocation5 + $0x498] sm:$0xff] %v1194_v5 }
  0x75   :  { %1707 = vst [vmem:[#allocation5 + $0x4a0] sm:$0xff] %v1195_v6  ;;  %1708 = vst [vmem:[#allocation5 + $0x4a8] sm:$0xff] %v1196_v7  ;;  %v1198_v17 = vmin.f32 %v686_v8, 15.0  ;;  %v690_v18 = vmax.f32 %v178_v9, 0.0  ;;  %v691_v19 = vmax.f32 %v179_v10, 0.0  ;;  %v692_v20 = vmax.f32 %v180_v15, 0.0 }
  0x76   :  { %v182_v21 = vld [vmem:[#allocation2 + $0x4f8] sm:$0xff]  ;;  %v183_v22 = vld [vmem:[#allocation2 + $0x500] sm:$0xff]  ;;  %1709 = vst [vmem:[#allocation5 + $0x4b0] sm:$0xff] %v1197_v11  ;;  %v1199_v23 = vmin.f32 %v687_v12, 15.0  ;;  %v1200_v24 = vmin.f32 %v688_v13, 15.0  ;;  %v1201_v25 = vmin.f32 %v689_v14, 15.0 }
  0x77   :  { %v693_v26 = vmax.f32 %v181_v16, 0.0  ;;  %v184_v27 = vld [vmem:[#allocation2 + $0x508] sm:$0xff]  ;;  %v185_v28 = vld [vmem:[#allocation2 + $0x510] sm:$0xff]  ;;  %1710 = vst [vmem:[#allocation5 + $0x4b8] sm:$0xff] %v1198_v17  ;;  %v1202_v29 = vmin.f32 %v690_v18, 15.0  ;;  %v1203_v30 = vmin.f32 %v691_v19, 15.0 }
  0x78   :  { %v1204_v31 = vmin.f32 %v692_v20, 15.0  ;;  %v694_v32 = vmax.f32 %v182_v21, 0.0  ;;  %v186_v33 = vld [vmem:[#allocation2 + $0x518] sm:$0xff]  ;;  %v187_v34 = vld [vmem:[#allocation2 + $0x520] sm:$0xff]  ;;  %1711 = vst [vmem:[#allocation5 + $0x4c0] sm:$0xff] %v1199_v23  ;;  %1712 = vst [vmem:[#allocation5 + $0x4c8] sm:$0xff] %v1200_v24 }
  0x79   :  { %1713 = vst [vmem:[#allocation5 + $0x4d0] sm:$0xff] %v1201_v25  ;;  %v1205_v35 = vmin.f32 %v693_v26, 15.0  ;;  %v695_v36 = vmax.f32 %v183_v22, 0.0  ;;  %v696_v37 = vmax.f32 %v184_v27, 0.0  ;;  %v697_v38 = vmax.f32 %v185_v28, 0.0  ;;  %v188_v39 = vld [vmem:[#allocation2 + $0x528] sm:$0xff] }
  0x7a   :  { %v189_v40 = vld [vmem:[#allocation2 + $0x530] sm:$0xff]  ;;  %1714 = vst [vmem:[#allocation5 + $0x4d8] sm:$0xff] %v1202_v29  ;;  %1715 = vst [vmem:[#allocation5 + $0x4e0] sm:$0xff] %v1203_v30  ;;  %v1206_v41 = vmin.f32 %v694_v32, 15.0  ;;  %v698_v42 = vmax.f32 %v186_v33, 0.0  ;;  %v699_v43 = vmax.f32 %v187_v34, 0.0 }
  0x7b   :  { %1716 = vst [vmem:[#allocation5 + $0x4e8] sm:$0xff] %v1204_v31  ;;  %v700_v44 = vmax.f32 %v188_v39, 0.0  ;;  %v190_v45 = vld [vmem:[#allocation2 + $0x538] sm:$0xff]  ;;  %v191_v46 = vld [vmem:[#allocation2 + $0x540] sm:$0xff]  ;;  %1717 = vst [vmem:[#allocation5 + $0x4f0] sm:$0xff] %v1205_v35  ;;  %v1207_v47 = vmin.f32 %v695_v36, 15.0 }
  0x7c   :  { %v1208_v48 = vmin.f32 %v696_v37, 15.0  ;;  %v1209_v49 = vmin.f32 %v697_v38, 15.0  ;;  %v701_v50 = vmax.f32 %v189_v40, 0.0  ;;  %v192_v51 = vld [vmem:[#allocation2 + $0x548] sm:$0xff]  ;;  %v193_v52 = vld [vmem:[#allocation2 + $0x550] sm:$0xff]  ;;  %1718 = vst [vmem:[#allocation5 + $0x4f8] sm:$0xff] %v1206_v41 }
  0x7d   :  { %v1210_v53 = vmin.f32 %v698_v42, 15.0  ;;  %v1211_v54 = vmin.f32 %v699_v43, 15.0  ;;  %v1212_v55 = vmin.f32 %v700_v44, 15.0  ;;  %v702_v56 = vmax.f32 %v190_v45, 0.0  ;;  %v194_v57 = vld [vmem:[#allocation2 + $0x558] sm:$0xff]  ;;  %v195_v58 = vld [vmem:[#allocation2 + $0x560] sm:$0xff] }
  0x7e   :  { %1719 = vst [vmem:[#allocation5 + $0x500] sm:$0xff] %v1207_v47  ;;  %1720 = vst [vmem:[#allocation5 + $0x508] sm:$0xff] %v1208_v48  ;;  %v1213_v59 = vmin.f32 %v701_v50, 15.0  ;;  %v703_v60 = vmax.f32 %v191_v46, 0.0  ;;  %v704_v61 = vmax.f32 %v192_v51, 0.0  ;;  %v705_v62 = vmax.f32 %v193_v52, 0.0 }
  0x7f   :  { %1721 = vst [vmem:[#allocation5 + $0x510] sm:$0xff] %v1209_v49  ;;  %v196_v63 = vld [vmem:[#allocation2 + $0x568] sm:$0xff]  ;;  %v197_v0 = vld [vmem:[#allocation2 + $0x570] sm:$0xff]  ;;  %1722 = vst [vmem:[#allocation5 + $0x518] sm:$0xff] %v1210_v53  ;;  %v1214_v1 = vmin.f32 %v702_v56, 15.0  ;;  %v706_v2 = vmax.f32 %v194_v57, 0.0 }
  0x80   :  { %1723 = vst [vmem:[#allocation5 + $0x520] sm:$0xff] %v1211_v54  ;;  %1724 = vst [vmem:[#allocation5 + $0x528] sm:$0xff] %v1212_v55  ;;  %v707_v3 = vmax.f32 %v195_v58, 0.0  ;;  %v708_v4 = vmax.f32 %v196_v63, 0.0  ;;  %v198_v5 = vld [vmem:[#allocation2 + $0x578] sm:$0xff]  ;;  %v199_v6 = vld [vmem:[#allocation2 + $0x580] sm:$0xff] }
  0x81   :  { %1725 = vst [vmem:[#allocation5 + $0x530] sm:$0xff] %v1213_v59  ;;  %v1215_v7 = vmin.f32 %v703_v60, 15.0  ;;  %v1216_v8 = vmin.f32 %v704_v61, 15.0  ;;  %v1217_v9 = vmin.f32 %v705_v62, 15.0  ;;  %v709_v10 = vmax.f32 %v197_v0, 0.0  ;;  %v200_v11 = vld [vmem:[#allocation2 + $0x588] sm:$0xff] }
  0x82   :  { %v201_v12 = vld [vmem:[#allocation2 + $0x590] sm:$0xff]  ;;  %1726 = vst [vmem:[#allocation5 + $0x538] sm:$0xff] %v1214_v1  ;;  %v1218_v13 = vmin.f32 %v706_v2, 15.0  ;;  %v1219_v14 = vmin.f32 %v707_v3, 15.0  ;;  %v1220_v15 = vmin.f32 %v708_v4, 15.0  ;;  %v710_v16 = vmax.f32 %v198_v5, 0.0 }
  0x83   :  { %v202_v17 = vld [vmem:[#allocation2 + $0x598] sm:$0xff]  ;;  %v203_v18 = vld [vmem:[#allocation2 + $0x5a0] sm:$0xff]  ;;  %1727 = vst [vmem:[#allocation5 + $0x540] sm:$0xff] %v1215_v7  ;;  %1728 = vst [vmem:[#allocation5 + $0x548] sm:$0xff] %v1216_v8  ;;  %v1221_v19 = vmin.f32 %v709_v10, 15.0  ;;  %v711_v20 = vmax.f32 %v199_v6, 0.0 }
  0x84   :  { %1729 = vst [vmem:[#allocation5 + $0x550] sm:$0xff] %v1217_v9  ;;  %v712_v21 = vmax.f32 %v200_v11, 0.0  ;;  %v713_v22 = vmax.f32 %v201_v12, 0.0  ;;  %v204_v23 = vld [vmem:[#allocation2 + $0x5a8] sm:$0xff]  ;;  %v205_v24 = vld [vmem:[#allocation2 + $0x5b0] sm:$0xff]  ;;  %1730 = vst [vmem:[#allocation5 + $0x558] sm:$0xff] %v1218_v13 }
  0x85   :  { %1731 = vst [vmem:[#allocation5 + $0x560] sm:$0xff] %v1219_v14  ;;  %1732 = vst [vmem:[#allocation5 + $0x568] sm:$0xff] %v1220_v15  ;;  %v1222_v25 = vmin.f32 %v710_v16, 15.0  ;;  %v714_v26 = vmax.f32 %v202_v17, 0.0  ;;  %v715_v27 = vmax.f32 %v203_v18, 0.0  ;;  %v716_v28 = vmax.f32 %v204_v23, 0.0 }
  0x86   :  { %v206_v29 = vld [vmem:[#allocation2 + $0x5b8] sm:$0xff]  ;;  %v207_v30 = vld [vmem:[#allocation2 + $0x5c0] sm:$0xff]  ;;  %1733 = vst [vmem:[#allocation5 + $0x570] sm:$0xff] %v1221_v19  ;;  %v1223_v31 = vmin.f32 %v711_v20, 15.0  ;;  %v1224_v32 = vmin.f32 %v712_v21, 15.0  ;;  %v1225_v33 = vmin.f32 %v713_v22, 15.0 }
  0x87   :  { %v717_v34 = vmax.f32 %v205_v24, 0.0  ;;  %v208_v35 = vld [vmem:[#allocation2 + $0x5c8] sm:$0xff]  ;;  %v209_v36 = vld [vmem:[#allocation2 + $0x5d0] sm:$0xff]  ;;  %1734 = vst [vmem:[#allocation5 + $0x578] sm:$0xff] %v1222_v25  ;;  %v1226_v37 = vmin.f32 %v714_v26, 15.0  ;;  %v1227_v38 = vmin.f32 %v715_v27, 15.0 }
  0x88   :  { %v1228_v39 = vmin.f32 %v716_v28, 15.0  ;;  %v718_v40 = vmax.f32 %v206_v29, 0.0  ;;  %v210_v41 = vld [vmem:[#allocation2 + $0x5d8] sm:$0xff]  ;;  %v211_v42 = vld [vmem:[#allocation2 + $0x5e0] sm:$0xff]  ;;  %1735 = vst [vmem:[#allocation5 + $0x580] sm:$0xff] %v1223_v31  ;;  %1736 = vst [vmem:[#allocation5 + $0x588] sm:$0xff] %v1224_v32 }
  0x89   :  { %1737 = vst [vmem:[#allocation5 + $0x590] sm:$0xff] %v1225_v33  ;;  %v1229_v43 = vmin.f32 %v717_v34, 15.0  ;;  %v719_v44 = vmax.f32 %v207_v30, 0.0  ;;  %v720_v45 = vmax.f32 %v208_v35, 0.0  ;;  %v721_v46 = vmax.f32 %v209_v36, 0.0  ;;  %v212_v47 = vld [vmem:[#allocation2 + $0x5e8] sm:$0xff] }
  0x8a   :  { %v213_v48 = vld [vmem:[#allocation2 + $0x5f0] sm:$0xff]  ;;  %1738 = vst [vmem:[#allocation5 + $0x598] sm:$0xff] %v1226_v37  ;;  %1739 = vst [vmem:[#allocation5 + $0x5a0] sm:$0xff] %v1227_v38  ;;  %v1230_v49 = vmin.f32 %v718_v40, 15.0  ;;  %v722_v50 = vmax.f32 %v210_v41, 0.0  ;;  %v723_v51 = vmax.f32 %v211_v42, 0.0 }
  0x8b   :  { %1740 = vst [vmem:[#allocation5 + $0x5a8] sm:$0xff] %v1228_v39  ;;  %v724_v52 = vmax.f32 %v212_v47, 0.0  ;;  %v214_v53 = vld [vmem:[#allocation2 + $0x5f8] sm:$0xff]  ;;  %v215_v54 = vld [vmem:[#allocation2 + $0x600] sm:$0xff]  ;;  %1741 = vst [vmem:[#allocation5 + $0x5b0] sm:$0xff] %v1229_v43  ;;  %v1231_v55 = vmin.f32 %v719_v44, 15.0 }
  0x8c   :  { %v1232_v56 = vmin.f32 %v720_v45, 15.0  ;;  %v1233_v57 = vmin.f32 %v721_v46, 15.0  ;;  %v725_v58 = vmax.f32 %v213_v48, 0.0  ;;  %v216_v59 = vld [vmem:[#allocation2 + $0x608] sm:$0xff]  ;;  %v217_v60 = vld [vmem:[#allocation2 + $0x610] sm:$0xff]  ;;  %1742 = vst [vmem:[#allocation5 + $0x5b8] sm:$0xff] %v1230_v49 }
  0x8d   :  { %v1234_v61 = vmin.f32 %v722_v50, 15.0  ;;  %v1235_v62 = vmin.f32 %v723_v51, 15.0  ;;  %v1236_v63 = vmin.f32 %v724_v52, 15.0  ;;  %v726_v0 = vmax.f32 %v214_v53, 0.0  ;;  %v218_v1 = vld [vmem:[#allocation2 + $0x618] sm:$0xff]  ;;  %v219_v2 = vld [vmem:[#allocation2 + $0x620] sm:$0xff] }
  0x8e   :  { %1743 = vst [vmem:[#allocation5 + $0x5c0] sm:$0xff] %v1231_v55  ;;  %1744 = vst [vmem:[#allocation5 + $0x5c8] sm:$0xff] %v1232_v56  ;;  %v1237_v3 = vmin.f32 %v725_v58, 15.0  ;;  %v727_v4 = vmax.f32 %v215_v54, 0.0  ;;  %v728_v5 = vmax.f32 %v216_v59, 0.0  ;;  %v729_v6 = vmax.f32 %v217_v60, 0.0 }
  0x8f   :  { %1745 = vst [vmem:[#allocation5 + $0x5d0] sm:$0xff] %v1233_v57  ;;  %v220_v7 = vld [vmem:[#allocation2 + $0x628] sm:$0xff]  ;;  %v221_v8 = vld [vmem:[#allocation2 + $0x630] sm:$0xff]  ;;  %1746 = vst [vmem:[#allocation5 + $0x5d8] sm:$0xff] %v1234_v61  ;;  %v1238_v9 = vmin.f32 %v726_v0, 15.0  ;;  %v730_v10 = vmax.f32 %v218_v1, 0.0 }
  0x90   :  { %1747 = vst [vmem:[#allocation5 + $0x5e0] sm:$0xff] %v1235_v62  ;;  %1748 = vst [vmem:[#allocation5 + $0x5e8] sm:$0xff] %v1236_v63  ;;  %v731_v11 = vmax.f32 %v219_v2, 0.0  ;;  %v732_v12 = vmax.f32 %v220_v7, 0.0  ;;  %v222_v13 = vld [vmem:[#allocation2 + $0x638] sm:$0xff]  ;;  %v223_v14 = vld [vmem:[#allocation2 + $0x640] sm:$0xff] }
  0x91   :  { %1749 = vst [vmem:[#allocation5 + $0x5f0] sm:$0xff] %v1237_v3  ;;  %v1239_v15 = vmin.f32 %v727_v4, 15.0  ;;  %v1240_v16 = vmin.f32 %v728_v5, 15.0  ;;  %v1241_v17 = vmin.f32 %v729_v6, 15.0  ;;  %v733_v18 = vmax.f32 %v221_v8, 0.0  ;;  %v224_v19 = vld [vmem:[#allocation2 + $0x648] sm:$0xff] }
  0x92   :  { %v225_v20 = vld [vmem:[#allocation2 + $0x650] sm:$0xff]  ;;  %1750 = vst [vmem:[#allocation5 + $0x5f8] sm:$0xff] %v1238_v9  ;;  %v1242_v21 = vmin.f32 %v730_v10, 15.0  ;;  %v1243_v22 = vmin.f32 %v731_v11, 15.0  ;;  %v1244_v23 = vmin.f32 %v732_v12, 15.0  ;;  %v734_v24 = vmax.f32 %v222_v13, 0.0 }
  0x93   :  { %v226_v25 = vld [vmem:[#allocation2 + $0x658] sm:$0xff]  ;;  %v227_v26 = vld [vmem:[#allocation2 + $0x660] sm:$0xff]  ;;  %1751 = vst [vmem:[#allocation5 + $0x600] sm:$0xff] %v1239_v15  ;;  %1752 = vst [vmem:[#allocation5 + $0x608] sm:$0xff] %v1240_v16  ;;  %v1245_v27 = vmin.f32 %v733_v18, 15.0  ;;  %v735_v28 = vmax.f32 %v223_v14, 0.0 }
  0x94   :  { %1753 = vst [vmem:[#allocation5 + $0x610] sm:$0xff] %v1241_v17  ;;  %v736_v29 = vmax.f32 %v224_v19, 0.0  ;;  %v737_v30 = vmax.f32 %v225_v20, 0.0  ;;  %v228_v31 = vld [vmem:[#allocation2 + $0x668] sm:$0xff]  ;;  %v229_v32 = vld [vmem:[#allocation2 + $0x670] sm:$0xff]  ;;  %1754 = vst [vmem:[#allocation5 + $0x618] sm:$0xff] %v1242_v21 }
  0x95   :  { %1755 = vst [vmem:[#allocation5 + $0x620] sm:$0xff] %v1243_v22  ;;  %1756 = vst [vmem:[#allocation5 + $0x628] sm:$0xff] %v1244_v23  ;;  %v1246_v33 = vmin.f32 %v734_v24, 15.0  ;;  %v738_v34 = vmax.f32 %v226_v25, 0.0  ;;  %v739_v35 = vmax.f32 %v227_v26, 0.0  ;;  %v740_v36 = vmax.f32 %v228_v31, 0.0 }
  0x96   :  { %v230_v37 = vld [vmem:[#allocation2 + $0x678] sm:$0xff]  ;;  %v231_v38 = vld [vmem:[#allocation2 + $0x680] sm:$0xff]  ;;  %1757 = vst [vmem:[#allocation5 + $0x630] sm:$0xff] %v1245_v27  ;;  %v1247_v39 = vmin.f32 %v735_v28, 15.0  ;;  %v1248_v40 = vmin.f32 %v736_v29, 15.0  ;;  %v1249_v41 = vmin.f32 %v737_v30, 15.0 }
  0x97   :  { %v741_v42 = vmax.f32 %v229_v32, 0.0  ;;  %v232_v43 = vld [vmem:[#allocation2 + $0x688] sm:$0xff]  ;;  %v233_v44 = vld [vmem:[#allocation2 + $0x690] sm:$0xff]  ;;  %1758 = vst [vmem:[#allocation5 + $0x638] sm:$0xff] %v1246_v33  ;;  %v1250_v45 = vmin.f32 %v738_v34, 15.0  ;;  %v1251_v46 = vmin.f32 %v739_v35, 15.0 }
  0x98   :  { %v1252_v47 = vmin.f32 %v740_v36, 15.0  ;;  %v742_v48 = vmax.f32 %v230_v37, 0.0  ;;  %v234_v49 = vld [vmem:[#allocation2 + $0x698] sm:$0xff]  ;;  %v235_v50 = vld [vmem:[#allocation2 + $0x6a0] sm:$0xff]  ;;  %1759 = vst [vmem:[#allocation5 + $0x640] sm:$0xff] %v1247_v39  ;;  %1760 = vst [vmem:[#allocation5 + $0x648] sm:$0xff] %v1248_v40 }
  0x99   :  { %1761 = vst [vmem:[#allocation5 + $0x650] sm:$0xff] %v1249_v41  ;;  %v1253_v51 = vmin.f32 %v741_v42, 15.0  ;;  %v743_v52 = vmax.f32 %v231_v38, 0.0  ;;  %v744_v53 = vmax.f32 %v232_v43, 0.0  ;;  %v745_v54 = vmax.f32 %v233_v44, 0.0  ;;  %v236_v55 = vld [vmem:[#allocation2 + $0x6a8] sm:$0xff] }
  0x9a   :  { %v237_v56 = vld [vmem:[#allocation2 + $0x6b0] sm:$0xff]  ;;  %1762 = vst [vmem:[#allocation5 + $0x658] sm:$0xff] %v1250_v45  ;;  %1763 = vst [vmem:[#allocation5 + $0x660] sm:$0xff] %v1251_v46  ;;  %v1254_v57 = vmin.f32 %v742_v48, 15.0  ;;  %v746_v58 = vmax.f32 %v234_v49, 0.0  ;;  %v747_v59 = vmax.f32 %v235_v50, 0.0 }
  0x9b   :  { %1764 = vst [vmem:[#allocation5 + $0x668] sm:$0xff] %v1252_v47  ;;  %v748_v60 = vmax.f32 %v236_v55, 0.0  ;;  %v238_v61 = vld [vmem:[#allocation2 + $0x6b8] sm:$0xff]  ;;  %v239_v62 = vld [vmem:[#allocation2 + $0x6c0] sm:$0xff]  ;;  %1765 = vst [vmem:[#allocation5 + $0x670] sm:$0xff] %v1253_v51  ;;  %v1255_v63 = vmin.f32 %v743_v52, 15.0 }
  0x9c   :  { %v1256_v0 = vmin.f32 %v744_v53, 15.0  ;;  %v1257_v1 = vmin.f32 %v745_v54, 15.0  ;;  %v749_v2 = vmax.f32 %v237_v56, 0.0  ;;  %v240_v3 = vld [vmem:[#allocation2 + $0x6c8] sm:$0xff]  ;;  %v241_v4 = vld [vmem:[#allocation2 + $0x6d0] sm:$0xff]  ;;  %1766 = vst [vmem:[#allocation5 + $0x678] sm:$0xff] %v1254_v57 }
  0x9d   :  { %v1258_v5 = vmin.f32 %v746_v58, 15.0  ;;  %v1259_v6 = vmin.f32 %v747_v59, 15.0  ;;  %v1260_v7 = vmin.f32 %v748_v60, 15.0  ;;  %v750_v8 = vmax.f32 %v238_v61, 0.0  ;;  %v242_v9 = vld [vmem:[#allocation2 + $0x6d8] sm:$0xff]  ;;  %v243_v10 = vld [vmem:[#allocation2 + $0x6e0] sm:$0xff] }
  0x9e   :  { %1767 = vst [vmem:[#allocation5 + $0x680] sm:$0xff] %v1255_v63  ;;  %1768 = vst [vmem:[#allocation5 + $0x688] sm:$0xff] %v1256_v0  ;;  %v1261_v11 = vmin.f32 %v749_v2, 15.0  ;;  %v751_v12 = vmax.f32 %v239_v62, 0.0  ;;  %v752_v13 = vmax.f32 %v240_v3, 0.0  ;;  %v753_v14 = vmax.f32 %v241_v4, 0.0 }
  0x9f   :  { %1769 = vst [vmem:[#allocation5 + $0x690] sm:$0xff] %v1257_v1  ;;  %v244_v15 = vld [vmem:[#allocation2 + $0x6e8] sm:$0xff]  ;;  %v245_v16 = vld [vmem:[#allocation2 + $0x6f0] sm:$0xff]  ;;  %1770 = vst [vmem:[#allocation5 + $0x698] sm:$0xff] %v1258_v5  ;;  %v1262_v17 = vmin.f32 %v750_v8, 15.0  ;;  %v754_v18 = vmax.f32 %v242_v9, 0.0 }
  0xa0   :  { %1771 = vst [vmem:[#allocation5 + $0x6a0] sm:$0xff] %v1259_v6  ;;  %1772 = vst [vmem:[#allocation5 + $0x6a8] sm:$0xff] %v1260_v7  ;;  %v755_v19 = vmax.f32 %v243_v10, 0.0  ;;  %v756_v20 = vmax.f32 %v244_v15, 0.0  ;;  %v246_v21 = vld [vmem:[#allocation2 + $0x6f8] sm:$0xff]  ;;  %v247_v22 = vld [vmem:[#allocation2 + $0x700] sm:$0xff] }
  0xa1   :  { %1773 = vst [vmem:[#allocation5 + $0x6b0] sm:$0xff] %v1261_v11  ;;  %v1263_v23 = vmin.f32 %v751_v12, 15.0  ;;  %v1264_v24 = vmin.f32 %v752_v13, 15.0  ;;  %v1265_v25 = vmin.f32 %v753_v14, 15.0  ;;  %v757_v26 = vmax.f32 %v245_v16, 0.0  ;;  %v248_v27 = vld [vmem:[#allocation2 + $0x708] sm:$0xff] }
  0xa2   :  { %v249_v28 = vld [vmem:[#allocation2 + $0x710] sm:$0xff]  ;;  %1774 = vst [vmem:[#allocation5 + $0x6b8] sm:$0xff] %v1262_v17  ;;  %v1266_v29 = vmin.f32 %v754_v18, 15.0  ;;  %v1267_v30 = vmin.f32 %v755_v19, 15.0  ;;  %v1268_v31 = vmin.f32 %v756_v20, 15.0  ;;  %v758_v32 = vmax.f32 %v246_v21, 0.0 }
  0xa3   :  { %v250_v33 = vld [vmem:[#allocation2 + $0x718] sm:$0xff]  ;;  %v251_v34 = vld [vmem:[#allocation2 + $0x720] sm:$0xff]  ;;  %1775 = vst [vmem:[#allocation5 + $0x6c0] sm:$0xff] %v1263_v23  ;;  %1776 = vst [vmem:[#allocation5 + $0x6c8] sm:$0xff] %v1264_v24  ;;  %v1269_v35 = vmin.f32 %v757_v26, 15.0  ;;  %v759_v36 = vmax.f32 %v247_v22, 0.0 }
  0xa4   :  { %1777 = vst [vmem:[#allocation5 + $0x6d0] sm:$0xff] %v1265_v25  ;;  %v760_v37 = vmax.f32 %v248_v27, 0.0  ;;  %v761_v38 = vmax.f32 %v249_v28, 0.0  ;;  %v252_v39 = vld [vmem:[#allocation2 + $0x728] sm:$0xff]  ;;  %v253_v40 = vld [vmem:[#allocation2 + $0x730] sm:$0xff]  ;;  %1778 = vst [vmem:[#allocation5 + $0x6d8] sm:$0xff] %v1266_v29 }
  0xa5   :  { %1779 = vst [vmem:[#allocation5 + $0x6e0] sm:$0xff] %v1267_v30  ;;  %1780 = vst [vmem:[#allocation5 + $0x6e8] sm:$0xff] %v1268_v31  ;;  %v1270_v41 = vmin.f32 %v758_v32, 15.0  ;;  %v762_v42 = vmax.f32 %v250_v33, 0.0  ;;  %v763_v43 = vmax.f32 %v251_v34, 0.0  ;;  %v764_v44 = vmax.f32 %v252_v39, 0.0 }
  0xa6   :  { %v254_v45 = vld [vmem:[#allocation2 + $0x738] sm:$0xff]  ;;  %v255_v46 = vld [vmem:[#allocation2 + $0x740] sm:$0xff]  ;;  %1781 = vst [vmem:[#allocation5 + $0x6f0] sm:$0xff] %v1269_v35  ;;  %v1271_v47 = vmin.f32 %v759_v36, 15.0  ;;  %v1272_v48 = vmin.f32 %v760_v37, 15.0  ;;  %v1273_v49 = vmin.f32 %v761_v38, 15.0 }
  0xa7   :  { %v765_v50 = vmax.f32 %v253_v40, 0.0  ;;  %v256_v51 = vld [vmem:[#allocation2 + $0x748] sm:$0xff]  ;;  %v257_v52 = vld [vmem:[#allocation2 + $0x750] sm:$0xff]  ;;  %1782 = vst [vmem:[#allocation5 + $0x6f8] sm:$0xff] %v1270_v41  ;;  %v1274_v53 = vmin.f32 %v762_v42, 15.0  ;;  %v1275_v54 = vmin.f32 %v763_v43, 15.0 }
  0xa8   :  { %v1276_v55 = vmin.f32 %v764_v44, 15.0  ;;  %v766_v56 = vmax.f32 %v254_v45, 0.0  ;;  %v258_v57 = vld [vmem:[#allocation2 + $0x758] sm:$0xff]  ;;  %v259_v58 = vld [vmem:[#allocation2 + $0x760] sm:$0xff]  ;;  %1783 = vst [vmem:[#allocation5 + $0x700] sm:$0xff] %v1271_v47  ;;  %1784 = vst [vmem:[#allocation5 + $0x708] sm:$0xff] %v1272_v48 }
  0xa9   :  { %1785 = vst [vmem:[#allocation5 + $0x710] sm:$0xff] %v1273_v49  ;;  %v1277_v59 = vmin.f32 %v765_v50, 15.0  ;;  %v767_v60 = vmax.f32 %v255_v46, 0.0  ;;  %v768_v61 = vmax.f32 %v256_v51, 0.0  ;;  %v769_v62 = vmax.f32 %v257_v52, 0.0  ;;  %v260_v63 = vld [vmem:[#allocation2 + $0x768] sm:$0xff] }
  0xaa   :  { %v261_v0 = vld [vmem:[#allocation2 + $0x770] sm:$0xff]  ;;  %1786 = vst [vmem:[#allocation5 + $0x718] sm:$0xff] %v1274_v53  ;;  %1787 = vst [vmem:[#allocation5 + $0x720] sm:$0xff] %v1275_v54  ;;  %v1278_v1 = vmin.f32 %v766_v56, 15.0  ;;  %v770_v2 = vmax.f32 %v258_v57, 0.0  ;;  %v771_v3 = vmax.f32 %v259_v58, 0.0 }
  0xab   :  { %1788 = vst [vmem:[#allocation5 + $0x728] sm:$0xff] %v1276_v55  ;;  %v772_v4 = vmax.f32 %v260_v63, 0.0  ;;  %v262_v5 = vld [vmem:[#allocation2 + $0x778] sm:$0xff]  ;;  %v263_v6 = vld [vmem:[#allocation2 + $0x780] sm:$0xff]  ;;  %1789 = vst [vmem:[#allocation5 + $0x730] sm:$0xff] %v1277_v59  ;;  %v1279_v7 = vmin.f32 %v767_v60, 15.0 }
  0xac   :  { %v1280_v8 = vmin.f32 %v768_v61, 15.0  ;;  %v1281_v9 = vmin.f32 %v769_v62, 15.0  ;;  %v773_v10 = vmax.f32 %v261_v0, 0.0  ;;  %v264_v11 = vld [vmem:[#allocation2 + $0x788] sm:$0xff]  ;;  %v265_v12 = vld [vmem:[#allocation2 + $0x790] sm:$0xff]  ;;  %1790 = vst [vmem:[#allocation5 + $0x738] sm:$0xff] %v1278_v1 }
  0xad   :  { %v1282_v13 = vmin.f32 %v770_v2, 15.0  ;;  %v1283_v14 = vmin.f32 %v771_v3, 15.0  ;;  %v1284_v15 = vmin.f32 %v772_v4, 15.0  ;;  %v774_v16 = vmax.f32 %v262_v5, 0.0  ;;  %v266_v17 = vld [vmem:[#allocation2 + $0x798] sm:$0xff]  ;;  %v267_v18 = vld [vmem:[#allocation2 + $0x7a0] sm:$0xff] }
  0xae   :  { %1791 = vst [vmem:[#allocation5 + $0x740] sm:$0xff] %v1279_v7  ;;  %1792 = vst [vmem:[#allocation5 + $0x748] sm:$0xff] %v1280_v8  ;;  %v1285_v19 = vmin.f32 %v773_v10, 15.0  ;;  %v775_v20 = vmax.f32 %v263_v6, 0.0  ;;  %v776_v21 = vmax.f32 %v264_v11, 0.0  ;;  %v777_v22 = vmax.f32 %v265_v12, 0.0 }
  0xaf   :  { %1793 = vst [vmem:[#allocation5 + $0x750] sm:$0xff] %v1281_v9  ;;  %v268_v23 = vld [vmem:[#allocation2 + $0x7a8] sm:$0xff]  ;;  %v269_v24 = vld [vmem:[#allocation2 + $0x7b0] sm:$0xff]  ;;  %1794 = vst [vmem:[#allocation5 + $0x758] sm:$0xff] %v1282_v13  ;;  %v1286_v25 = vmin.f32 %v774_v16, 15.0  ;;  %v778_v26 = vmax.f32 %v266_v17, 0.0 }
  0xb0   :  { %1795 = vst [vmem:[#allocation5 + $0x760] sm:$0xff] %v1283_v14  ;;  %1796 = vst [vmem:[#allocation5 + $0x768] sm:$0xff] %v1284_v15  ;;  %v779_v27 = vmax.f32 %v267_v18, 0.0  ;;  %v780_v28 = vmax.f32 %v268_v23, 0.0  ;;  %v270_v29 = vld [vmem:[#allocation2 + $0x7b8] sm:$0xff]  ;;  %v271_v30 = vld [vmem:[#allocation2 + $0x7c0] sm:$0xff] }
  0xb1   :  { %1797 = vst [vmem:[#allocation5 + $0x770] sm:$0xff] %v1285_v19  ;;  %v1287_v31 = vmin.f32 %v775_v20, 15.0  ;;  %v1288_v32 = vmin.f32 %v776_v21, 15.0  ;;  %v1289_v33 = vmin.f32 %v777_v22, 15.0  ;;  %v781_v34 = vmax.f32 %v269_v24, 0.0  ;;  %v272_v35 = vld [vmem:[#allocation2 + $0x7c8] sm:$0xff] }
  0xb2   :  { %v273_v36 = vld [vmem:[#allocation2 + $0x7d0] sm:$0xff]  ;;  %1798 = vst [vmem:[#allocation5 + $0x778] sm:$0xff] %v1286_v25  ;;  %v1290_v37 = vmin.f32 %v778_v26, 15.0  ;;  %v1291_v38 = vmin.f32 %v779_v27, 15.0  ;;  %v1292_v39 = vmin.f32 %v780_v28, 15.0  ;;  %v782_v40 = vmax.f32 %v270_v29, 0.0 }
  0xb3   :  { %v274_v41 = vld [vmem:[#allocation2 + $0x7d8] sm:$0xff]  ;;  %v275_v42 = vld [vmem:[#allocation2 + $0x7e0] sm:$0xff]  ;;  %1799 = vst [vmem:[#allocation5 + $0x780] sm:$0xff] %v1287_v31  ;;  %1800 = vst [vmem:[#allocation5 + $0x788] sm:$0xff] %v1288_v32  ;;  %v1293_v43 = vmin.f32 %v781_v34, 15.0  ;;  %v783_v44 = vmax.f32 %v271_v30, 0.0 }
  0xb4   :  { %1801 = vst [vmem:[#allocation5 + $0x790] sm:$0xff] %v1289_v33  ;;  %v784_v45 = vmax.f32 %v272_v35, 0.0  ;;  %v785_v46 = vmax.f32 %v273_v36, 0.0  ;;  %v276_v47 = vld [vmem:[#allocation2 + $0x7e8] sm:$0xff]  ;;  %v277_v48 = vld [vmem:[#allocation2 + $0x7f0] sm:$0xff]  ;;  %1802 = vst [vmem:[#allocation5 + $0x798] sm:$0xff] %v1290_v37 }
  0xb5   :  { %1803 = vst [vmem:[#allocation5 + $0x7a0] sm:$0xff] %v1291_v38  ;;  %1804 = vst [vmem:[#allocation5 + $0x7a8] sm:$0xff] %v1292_v39  ;;  %v1294_v49 = vmin.f32 %v782_v40, 15.0  ;;  %v786_v50 = vmax.f32 %v274_v41, 0.0  ;;  %v787_v51 = vmax.f32 %v275_v42, 0.0  ;;  %v788_v52 = vmax.f32 %v276_v47, 0.0 }
  0xb6   :  { %v278_v53 = vld [vmem:[#allocation2 + $0x7f8] sm:$0xff]  ;;  %v279_v54 = vld [vmem:[#allocation2 + $0x800] sm:$0xff]  ;;  %1805 = vst [vmem:[#allocation5 + $0x7b0] sm:$0xff] %v1293_v43  ;;  %v1295_v55 = vmin.f32 %v783_v44, 15.0  ;;  %v1296_v56 = vmin.f32 %v784_v45, 15.0  ;;  %v1297_v57 = vmin.f32 %v785_v46, 15.0 }
  0xb7   :  { %v789_v58 = vmax.f32 %v277_v48, 0.0  ;;  %v280_v59 = vld [vmem:[#allocation2 + $0x808] sm:$0xff]  ;;  %v281_v60 = vld [vmem:[#allocation2 + $0x810] sm:$0xff]  ;;  %1806 = vst [vmem:[#allocation5 + $0x7b8] sm:$0xff] %v1294_v49  ;;  %v1298_v61 = vmin.f32 %v786_v50, 15.0  ;;  %v1299_v62 = vmin.f32 %v787_v51, 15.0 }
  0xb8   :  { %v1300_v63 = vmin.f32 %v788_v52, 15.0  ;;  %v790_v0 = vmax.f32 %v278_v53, 0.0  ;;  %v282_v1 = vld [vmem:[#allocation2 + $0x818] sm:$0xff]  ;;  %v283_v2 = vld [vmem:[#allocation2 + $0x820] sm:$0xff]  ;;  %1807 = vst [vmem:[#allocation5 + $0x7c0] sm:$0xff] %v1295_v55  ;;  %1808 = vst [vmem:[#allocation5 + $0x7c8] sm:$0xff] %v1296_v56 }
  0xb9   :  { %1809 = vst [vmem:[#allocation5 + $0x7d0] sm:$0xff] %v1297_v57  ;;  %v1301_v3 = vmin.f32 %v789_v58, 15.0  ;;  %v791_v4 = vmax.f32 %v279_v54, 0.0  ;;  %v792_v5 = vmax.f32 %v280_v59, 0.0  ;;  %v793_v6 = vmax.f32 %v281_v60, 0.0  ;;  %v284_v7 = vld [vmem:[#allocation2 + $0x828] sm:$0xff] }
  0xba   :  { %v285_v8 = vld [vmem:[#allocation2 + $0x830] sm:$0xff]  ;;  %1810 = vst [vmem:[#allocation5 + $0x7d8] sm:$0xff] %v1298_v61  ;;  %1811 = vst [vmem:[#allocation5 + $0x7e0] sm:$0xff] %v1299_v62  ;;  %v1302_v9 = vmin.f32 %v790_v0, 15.0  ;;  %v794_v10 = vmax.f32 %v282_v1, 0.0  ;;  %v795_v11 = vmax.f32 %v283_v2, 0.0 }
  0xbb   :  { %1812 = vst [vmem:[#allocation5 + $0x7e8] sm:$0xff] %v1300_v63  ;;  %v796_v12 = vmax.f32 %v284_v7, 0.0  ;;  %v286_v13 = vld [vmem:[#allocation2 + $0x838] sm:$0xff]  ;;  %v287_v14 = vld [vmem:[#allocation2 + $0x840] sm:$0xff]  ;;  %1813 = vst [vmem:[#allocation5 + $0x7f0] sm:$0xff] %v1301_v3  ;;  %v1303_v15 = vmin.f32 %v791_v4, 15.0 }
  0xbc   :  { %v1304_v16 = vmin.f32 %v792_v5, 15.0  ;;  %v1305_v17 = vmin.f32 %v793_v6, 15.0  ;;  %v797_v18 = vmax.f32 %v285_v8, 0.0  ;;  %v288_v19 = vld [vmem:[#allocation2 + $0x848] sm:$0xff]  ;;  %v289_v20 = vld [vmem:[#allocation2 + $0x850] sm:$0xff]  ;;  %1814 = vst [vmem:[#allocation5 + $0x7f8] sm:$0xff] %v1302_v9 }
  0xbd   :  { %v1306_v21 = vmin.f32 %v794_v10, 15.0  ;;  %v1307_v22 = vmin.f32 %v795_v11, 15.0  ;;  %v1308_v23 = vmin.f32 %v796_v12, 15.0  ;;  %v798_v24 = vmax.f32 %v286_v13, 0.0  ;;  %v290_v25 = vld [vmem:[#allocation2 + $0x858] sm:$0xff]  ;;  %v291_v26 = vld [vmem:[#allocation2 + $0x860] sm:$0xff] }
  0xbe   :  { %1815 = vst [vmem:[#allocation5 + $0x800] sm:$0xff] %v1303_v15  ;;  %1816 = vst [vmem:[#allocation5 + $0x808] sm:$0xff] %v1304_v16  ;;  %v1309_v27 = vmin.f32 %v797_v18, 15.0  ;;  %v799_v28 = vmax.f32 %v287_v14, 0.0  ;;  %v800_v29 = vmax.f32 %v288_v19, 0.0  ;;  %v801_v30 = vmax.f32 %v289_v20, 0.0 }
  0xbf   :  { %1817 = vst [vmem:[#allocation5 + $0x810] sm:$0xff] %v1305_v17  ;;  %v292_v31 = vld [vmem:[#allocation2 + $0x868] sm:$0xff]  ;;  %v293_v32 = vld [vmem:[#allocation2 + $0x870] sm:$0xff]  ;;  %1818 = vst [vmem:[#allocation5 + $0x818] sm:$0xff] %v1306_v21  ;;  %v1310_v33 = vmin.f32 %v798_v24, 15.0  ;;  %v802_v34 = vmax.f32 %v290_v25, 0.0 }
  0xc0   :  { %1819 = vst [vmem:[#allocation5 + $0x820] sm:$0xff] %v1307_v22  ;;  %1820 = vst [vmem:[#allocation5 + $0x828] sm:$0xff] %v1308_v23  ;;  %v803_v35 = vmax.f32 %v291_v26, 0.0  ;;  %v804_v36 = vmax.f32 %v292_v31, 0.0  ;;  %v294_v37 = vld [vmem:[#allocation2 + $0x878] sm:$0xff]  ;;  %v295_v38 = vld [vmem:[#allocation2 + $0x880] sm:$0xff] }
  0xc1   :  { %1821 = vst [vmem:[#allocation5 + $0x830] sm:$0xff] %v1309_v27  ;;  %v1311_v39 = vmin.f32 %v799_v28, 15.0  ;;  %v1312_v40 = vmin.f32 %v800_v29, 15.0  ;;  %v1313_v41 = vmin.f32 %v801_v30, 15.0  ;;  %v805_v42 = vmax.f32 %v293_v32, 0.0  ;;  %v296_v43 = vld [vmem:[#allocation2 + $0x888] sm:$0xff] }
  0xc2   :  { %v297_v44 = vld [vmem:[#allocation2 + $0x890] sm:$0xff]  ;;  %1822 = vst [vmem:[#allocation5 + $0x838] sm:$0xff] %v1310_v33  ;;  %v1314_v45 = vmin.f32 %v802_v34, 15.0  ;;  %v1315_v46 = vmin.f32 %v803_v35, 15.0  ;;  %v1316_v47 = vmin.f32 %v804_v36, 15.0  ;;  %v806_v48 = vmax.f32 %v294_v37, 0.0 }
  0xc3   :  { %v298_v49 = vld [vmem:[#allocation2 + $0x898] sm:$0xff]  ;;  %v299_v50 = vld [vmem:[#allocation2 + $0x8a0] sm:$0xff]  ;;  %1823 = vst [vmem:[#allocation5 + $0x840] sm:$0xff] %v1311_v39  ;;  %1824 = vst [vmem:[#allocation5 + $0x848] sm:$0xff] %v1312_v40  ;;  %v1317_v51 = vmin.f32 %v805_v42, 15.0  ;;  %v807_v52 = vmax.f32 %v295_v38, 0.0 }
  0xc4   :  { %1825 = vst [vmem:[#allocation5 + $0x850] sm:$0xff] %v1313_v41  ;;  %v808_v53 = vmax.f32 %v296_v43, 0.0  ;;  %v809_v54 = vmax.f32 %v297_v44, 0.0  ;;  %v300_v55 = vld [vmem:[#allocation2 + $0x8a8] sm:$0xff]  ;;  %v301_v56 = vld [vmem:[#allocation2 + $0x8b0] sm:$0xff]  ;;  %1826 = vst [vmem:[#allocation5 + $0x858] sm:$0xff] %v1314_v45 }
  0xc5   :  { %1827 = vst [vmem:[#allocation5 + $0x860] sm:$0xff] %v1315_v46  ;;  %1828 = vst [vmem:[#allocation5 + $0x868] sm:$0xff] %v1316_v47  ;;  %v1318_v57 = vmin.f32 %v806_v48, 15.0  ;;  %v810_v58 = vmax.f32 %v298_v49, 0.0  ;;  %v811_v59 = vmax.f32 %v299_v50, 0.0  ;;  %v812_v60 = vmax.f32 %v300_v55, 0.0 }
  0xc6   :  { %v302_v61 = vld [vmem:[#allocation2 + $0x8b8] sm:$0xff]  ;;  %v303_v62 = vld [vmem:[#allocation2 + $0x8c0] sm:$0xff]  ;;  %1829 = vst [vmem:[#allocation5 + $0x870] sm:$0xff] %v1317_v51  ;;  %v1319_v63 = vmin.f32 %v807_v52, 15.0  ;;  %v1320_v0 = vmin.f32 %v808_v53, 15.0  ;;  %v1321_v1 = vmin.f32 %v809_v54, 15.0 }
  0xc7   :  { %v813_v2 = vmax.f32 %v301_v56, 0.0  ;;  %v304_v3 = vld [vmem:[#allocation2 + $0x8c8] sm:$0xff]  ;;  %v305_v4 = vld [vmem:[#allocation2 + $0x8d0] sm:$0xff]  ;;  %1830 = vst [vmem:[#allocation5 + $0x878] sm:$0xff] %v1318_v57  ;;  %v1322_v5 = vmin.f32 %v810_v58, 15.0  ;;  %v1323_v6 = vmin.f32 %v811_v59, 15.0 }
  0xc8   :  { %v1324_v7 = vmin.f32 %v812_v60, 15.0  ;;  %v814_v8 = vmax.f32 %v302_v61, 0.0  ;;  %v306_v9 = vld [vmem:[#allocation2 + $0x8d8] sm:$0xff]  ;;  %v307_v10 = vld [vmem:[#allocation2 + $0x8e0] sm:$0xff]  ;;  %1831 = vst [vmem:[#allocation5 + $0x880] sm:$0xff] %v1319_v63  ;;  %1832 = vst [vmem:[#allocation5 + $0x888] sm:$0xff] %v1320_v0 }
  0xc9   :  { %1833 = vst [vmem:[#allocation5 + $0x890] sm:$0xff] %v1321_v1  ;;  %v1325_v11 = vmin.f32 %v813_v2, 15.0  ;;  %v815_v12 = vmax.f32 %v303_v62, 0.0  ;;  %v816_v13 = vmax.f32 %v304_v3, 0.0  ;;  %v817_v14 = vmax.f32 %v305_v4, 0.0  ;;  %v308_v15 = vld [vmem:[#allocation2 + $0x8e8] sm:$0xff] }
  0xca   :  { %v309_v16 = vld [vmem:[#allocation2 + $0x8f0] sm:$0xff]  ;;  %1834 = vst [vmem:[#allocation5 + $0x898] sm:$0xff] %v1322_v5  ;;  %1835 = vst [vmem:[#allocation5 + $0x8a0] sm:$0xff] %v1323_v6  ;;  %v1326_v17 = vmin.f32 %v814_v8, 15.0  ;;  %v818_v18 = vmax.f32 %v306_v9, 0.0  ;;  %v819_v19 = vmax.f32 %v307_v10, 0.0 }
  0xcb   :  { %1836 = vst [vmem:[#allocation5 + $0x8a8] sm:$0xff] %v1324_v7  ;;  %v820_v20 = vmax.f32 %v308_v15, 0.0  ;;  %v310_v21 = vld [vmem:[#allocation2 + $0x8f8] sm:$0xff]  ;;  %v311_v22 = vld [vmem:[#allocation2 + $0x900] sm:$0xff]  ;;  %1837 = vst [vmem:[#allocation5 + $0x8b0] sm:$0xff] %v1325_v11  ;;  %v1327_v23 = vmin.f32 %v815_v12, 15.0 }
  0xcc   :  { %v1328_v24 = vmin.f32 %v816_v13, 15.0  ;;  %v1329_v25 = vmin.f32 %v817_v14, 15.0  ;;  %v821_v26 = vmax.f32 %v309_v16, 0.0  ;;  %v312_v27 = vld [vmem:[#allocation2 + $0x908] sm:$0xff]  ;;  %v313_v28 = vld [vmem:[#allocation2 + $0x910] sm:$0xff]  ;;  %1838 = vst [vmem:[#allocation5 + $0x8b8] sm:$0xff] %v1326_v17 }
  0xcd   :  { %v1330_v29 = vmin.f32 %v818_v18, 15.0  ;;  %v1331_v30 = vmin.f32 %v819_v19, 15.0  ;;  %v1332_v31 = vmin.f32 %v820_v20, 15.0  ;;  %v822_v32 = vmax.f32 %v310_v21, 0.0  ;;  %v314_v33 = vld [vmem:[#allocation2 + $0x918] sm:$0xff]  ;;  %v315_v34 = vld [vmem:[#allocation2 + $0x920] sm:$0xff] }
  0xce   :  { %1839 = vst [vmem:[#allocation5 + $0x8c0] sm:$0xff] %v1327_v23  ;;  %1840 = vst [vmem:[#allocation5 + $0x8c8] sm:$0xff] %v1328_v24  ;;  %v1333_v35 = vmin.f32 %v821_v26, 15.0  ;;  %v823_v36 = vmax.f32 %v311_v22, 0.0  ;;  %v824_v37 = vmax.f32 %v312_v27, 0.0  ;;  %v825_v38 = vmax.f32 %v313_v28, 0.0 }
  0xcf   :  { %1841 = vst [vmem:[#allocation5 + $0x8d0] sm:$0xff] %v1329_v25  ;;  %v316_v39 = vld [vmem:[#allocation2 + $0x928] sm:$0xff]  ;;  %v317_v40 = vld [vmem:[#allocation2 + $0x930] sm:$0xff]  ;;  %1842 = vst [vmem:[#allocation5 + $0x8d8] sm:$0xff] %v1330_v29  ;;  %v1334_v41 = vmin.f32 %v822_v32, 15.0  ;;  %v826_v42 = vmax.f32 %v314_v33, 0.0 }
  0xd0   :  { %1843 = vst [vmem:[#allocation5 + $0x8e0] sm:$0xff] %v1331_v30  ;;  %1844 = vst [vmem:[#allocation5 + $0x8e8] sm:$0xff] %v1332_v31  ;;  %v827_v43 = vmax.f32 %v315_v34, 0.0  ;;  %v828_v44 = vmax.f32 %v316_v39, 0.0  ;;  %v318_v45 = vld [vmem:[#allocation2 + $0x938] sm:$0xff]  ;;  %v319_v46 = vld [vmem:[#allocation2 + $0x940] sm:$0xff] }
  0xd1   :  { %1845 = vst [vmem:[#allocation5 + $0x8f0] sm:$0xff] %v1333_v35  ;;  %v1335_v47 = vmin.f32 %v823_v36, 15.0  ;;  %v1336_v48 = vmin.f32 %v824_v37, 15.0  ;;  %v1337_v49 = vmin.f32 %v825_v38, 15.0  ;;  %v829_v50 = vmax.f32 %v317_v40, 0.0  ;;  %v320_v51 = vld [vmem:[#allocation2 + $0x948] sm:$0xff] }
  0xd2   :  { %v321_v52 = vld [vmem:[#allocation2 + $0x950] sm:$0xff]  ;;  %1846 = vst [vmem:[#allocation5 + $0x8f8] sm:$0xff] %v1334_v41  ;;  %v1338_v53 = vmin.f32 %v826_v42, 15.0  ;;  %v1339_v54 = vmin.f32 %v827_v43, 15.0  ;;  %v1340_v55 = vmin.f32 %v828_v44, 15.0  ;;  %v830_v56 = vmax.f32 %v318_v45, 0.0 }
  0xd3   :  { %v322_v57 = vld [vmem:[#allocation2 + $0x958] sm:$0xff]  ;;  %v323_v58 = vld [vmem:[#allocation2 + $0x960] sm:$0xff]  ;;  %1847 = vst [vmem:[#allocation5 + $0x900] sm:$0xff] %v1335_v47  ;;  %1848 = vst [vmem:[#allocation5 + $0x908] sm:$0xff] %v1336_v48  ;;  %v1341_v59 = vmin.f32 %v829_v50, 15.0  ;;  %v831_v60 = vmax.f32 %v319_v46, 0.0 }
  0xd4   :  { %1849 = vst [vmem:[#allocation5 + $0x910] sm:$0xff] %v1337_v49  ;;  %v832_v61 = vmax.f32 %v320_v51, 0.0  ;;  %v833_v62 = vmax.f32 %v321_v52, 0.0  ;;  %v324_v63 = vld [vmem:[#allocation2 + $0x968] sm:$0xff]  ;;  %v325_v0 = vld [vmem:[#allocation2 + $0x970] sm:$0xff]  ;;  %1850 = vst [vmem:[#allocation5 + $0x918] sm:$0xff] %v1338_v53 }
  0xd5   :  { %1851 = vst [vmem:[#allocation5 + $0x920] sm:$0xff] %v1339_v54  ;;  %1852 = vst [vmem:[#allocation5 + $0x928] sm:$0xff] %v1340_v55  ;;  %v1342_v1 = vmin.f32 %v830_v56, 15.0  ;;  %v834_v2 = vmax.f32 %v322_v57, 0.0  ;;  %v835_v3 = vmax.f32 %v323_v58, 0.0  ;;  %v836_v4 = vmax.f32 %v324_v63, 0.0 }
  0xd6   :  { %v326_v5 = vld [vmem:[#allocation2 + $0x978] sm:$0xff]  ;;  %v327_v6 = vld [vmem:[#allocation2 + $0x980] sm:$0xff]  ;;  %1853 = vst [vmem:[#allocation5 + $0x930] sm:$0xff] %v1341_v59  ;;  %v1343_v7 = vmin.f32 %v831_v60, 15.0  ;;  %v1344_v8 = vmin.f32 %v832_v61, 15.0  ;;  %v1345_v9 = vmin.f32 %v833_v62, 15.0 }
  0xd7   :  { %v837_v10 = vmax.f32 %v325_v0, 0.0  ;;  %v328_v11 = vld [vmem:[#allocation2 + $0x988] sm:$0xff]  ;;  %v329_v12 = vld [vmem:[#allocation2 + $0x990] sm:$0xff]  ;;  %1854 = vst [vmem:[#allocation5 + $0x938] sm:$0xff] %v1342_v1  ;;  %v1346_v13 = vmin.f32 %v834_v2, 15.0  ;;  %v1347_v14 = vmin.f32 %v835_v3, 15.0 }
  0xd8   :  { %v1348_v15 = vmin.f32 %v836_v4, 15.0  ;;  %v838_v16 = vmax.f32 %v326_v5, 0.0  ;;  %v330_v17 = vld [vmem:[#allocation2 + $0x998] sm:$0xff]  ;;  %v331_v18 = vld [vmem:[#allocation2 + $0x9a0] sm:$0xff]  ;;  %1855 = vst [vmem:[#allocation5 + $0x940] sm:$0xff] %v1343_v7  ;;  %1856 = vst [vmem:[#allocation5 + $0x948] sm:$0xff] %v1344_v8 }
  0xd9   :  { %1857 = vst [vmem:[#allocation5 + $0x950] sm:$0xff] %v1345_v9  ;;  %v1349_v19 = vmin.f32 %v837_v10, 15.0  ;;  %v839_v20 = vmax.f32 %v327_v6, 0.0  ;;  %v840_v21 = vmax.f32 %v328_v11, 0.0  ;;  %v841_v22 = vmax.f32 %v329_v12, 0.0  ;;  %v332_v23 = vld [vmem:[#allocation2 + $0x9a8] sm:$0xff] }
  0xda   :  { %v333_v24 = vld [vmem:[#allocation2 + $0x9b0] sm:$0xff]  ;;  %1858 = vst [vmem:[#allocation5 + $0x958] sm:$0xff] %v1346_v13  ;;  %1859 = vst [vmem:[#allocation5 + $0x960] sm:$0xff] %v1347_v14  ;;  %v1350_v25 = vmin.f32 %v838_v16, 15.0  ;;  %v842_v26 = vmax.f32 %v330_v17, 0.0  ;;  %v843_v27 = vmax.f32 %v331_v18, 0.0 }
  0xdb   :  { %1860 = vst [vmem:[#allocation5 + $0x968] sm:$0xff] %v1348_v15  ;;  %v844_v28 = vmax.f32 %v332_v23, 0.0  ;;  %v334_v29 = vld [vmem:[#allocation2 + $0x9b8] sm:$0xff]  ;;  %v335_v30 = vld [vmem:[#allocation2 + $0x9c0] sm:$0xff]  ;;  %1861 = vst [vmem:[#allocation5 + $0x970] sm:$0xff] %v1349_v19  ;;  %v1351_v31 = vmin.f32 %v839_v20, 15.0 }
  0xdc   :  { %v1352_v32 = vmin.f32 %v840_v21, 15.0  ;;  %v1353_v33 = vmin.f32 %v841_v22, 15.0  ;;  %v845_v34 = vmax.f32 %v333_v24, 0.0  ;;  %v336_v35 = vld [vmem:[#allocation2 + $0x9c8] sm:$0xff]  ;;  %v337_v36 = vld [vmem:[#allocation2 + $0x9d0] sm:$0xff]  ;;  %1862 = vst [vmem:[#allocation5 + $0x978] sm:$0xff] %v1350_v25 }
  0xdd   :  { %v1354_v37 = vmin.f32 %v842_v26, 15.0  ;;  %v1355_v38 = vmin.f32 %v843_v27, 15.0  ;;  %v1356_v39 = vmin.f32 %v844_v28, 15.0  ;;  %v846_v40 = vmax.f32 %v334_v29, 0.0  ;;  %v338_v41 = vld [vmem:[#allocation2 + $0x9d8] sm:$0xff]  ;;  %v339_v42 = vld [vmem:[#allocation2 + $0x9e0] sm:$0xff] }
  0xde   :  { %1863 = vst [vmem:[#allocation5 + $0x980] sm:$0xff] %v1351_v31  ;;  %1864 = vst [vmem:[#allocation5 + $0x988] sm:$0xff] %v1352_v32  ;;  %v1357_v43 = vmin.f32 %v845_v34, 15.0  ;;  %v847_v44 = vmax.f32 %v335_v30, 0.0  ;;  %v848_v45 = vmax.f32 %v336_v35, 0.0  ;;  %v849_v46 = vmax.f32 %v337_v36, 0.0 }
  0xdf   :  { %1865 = vst [vmem:[#allocation5 + $0x990] sm:$0xff] %v1353_v33  ;;  %v340_v47 = vld [vmem:[#allocation2 + $0x9e8] sm:$0xff]  ;;  %v341_v48 = vld [vmem:[#allocation2 + $0x9f0] sm:$0xff]  ;;  %1866 = vst [vmem:[#allocation5 + $0x998] sm:$0xff] %v1354_v37  ;;  %v1358_v49 = vmin.f32 %v846_v40, 15.0  ;;  %v850_v50 = vmax.f32 %v338_v41, 0.0 }
  0xe0   :  { %1867 = vst [vmem:[#allocation5 + $0x9a0] sm:$0xff] %v1355_v38  ;;  %1868 = vst [vmem:[#allocation5 + $0x9a8] sm:$0xff] %v1356_v39  ;;  %v851_v51 = vmax.f32 %v339_v42, 0.0  ;;  %v852_v52 = vmax.f32 %v340_v47, 0.0  ;;  %v342_v53 = vld [vmem:[#allocation2 + $0x9f8] sm:$0xff]  ;;  %v343_v54 = vld [vmem:[#allocation2 + $0xa00] sm:$0xff] }
  0xe1   :  { %1869 = vst [vmem:[#allocation5 + $0x9b0] sm:$0xff] %v1357_v43  ;;  %v1359_v55 = vmin.f32 %v847_v44, 15.0  ;;  %v1360_v56 = vmin.f32 %v848_v45, 15.0  ;;  %v1361_v57 = vmin.f32 %v849_v46, 15.0  ;;  %v853_v58 = vmax.f32 %v341_v48, 0.0  ;;  %v344_v59 = vld [vmem:[#allocation2 + $0xa08] sm:$0xff] }
  0xe2   :  { %v345_v60 = vld [vmem:[#allocation2 + $0xa10] sm:$0xff]  ;;  %1870 = vst [vmem:[#allocation5 + $0x9b8] sm:$0xff] %v1358_v49  ;;  %v1362_v61 = vmin.f32 %v850_v50, 15.0  ;;  %v1363_v62 = vmin.f32 %v851_v51, 15.0  ;;  %v1364_v63 = vmin.f32 %v852_v52, 15.0  ;;  %v854_v0 = vmax.f32 %v342_v53, 0.0 }
  0xe3   :  { %v346_v1 = vld [vmem:[#allocation2 + $0xa18] sm:$0xff]  ;;  %v347_v2 = vld [vmem:[#allocation2 + $0xa20] sm:$0xff]  ;;  %1871 = vst [vmem:[#allocation5 + $0x9c0] sm:$0xff] %v1359_v55  ;;  %1872 = vst [vmem:[#allocation5 + $0x9c8] sm:$0xff] %v1360_v56  ;;  %v1365_v3 = vmin.f32 %v853_v58, 15.0  ;;  %v855_v4 = vmax.f32 %v343_v54, 0.0 }
  0xe4   :  { %1873 = vst [vmem:[#allocation5 + $0x9d0] sm:$0xff] %v1361_v57  ;;  %v856_v5 = vmax.f32 %v344_v59, 0.0  ;;  %v857_v6 = vmax.f32 %v345_v60, 0.0  ;;  %v348_v7 = vld [vmem:[#allocation2 + $0xa28] sm:$0xff]  ;;  %v349_v8 = vld [vmem:[#allocation2 + $0xa30] sm:$0xff]  ;;  %1874 = vst [vmem:[#allocation5 + $0x9d8] sm:$0xff] %v1362_v61 }
  0xe5   :  { %1875 = vst [vmem:[#allocation5 + $0x9e0] sm:$0xff] %v1363_v62  ;;  %1876 = vst [vmem:[#allocation5 + $0x9e8] sm:$0xff] %v1364_v63  ;;  %v1366_v9 = vmin.f32 %v854_v0, 15.0  ;;  %v858_v10 = vmax.f32 %v346_v1, 0.0  ;;  %v859_v11 = vmax.f32 %v347_v2, 0.0  ;;  %v860_v12 = vmax.f32 %v348_v7, 0.0 }
  0xe6   :  { %v350_v13 = vld [vmem:[#allocation2 + $0xa38] sm:$0xff]  ;;  %v351_v14 = vld [vmem:[#allocation2 + $0xa40] sm:$0xff]  ;;  %1877 = vst [vmem:[#allocation5 + $0x9f0] sm:$0xff] %v1365_v3  ;;  %v1367_v15 = vmin.f32 %v855_v4, 15.0  ;;  %v1368_v16 = vmin.f32 %v856_v5, 15.0  ;;  %v1369_v17 = vmin.f32 %v857_v6, 15.0 }
  0xe7   :  { %v861_v18 = vmax.f32 %v349_v8, 0.0  ;;  %v352_v19 = vld [vmem:[#allocation2 + $0xa48] sm:$0xff]  ;;  %v353_v20 = vld [vmem:[#allocation2 + $0xa50] sm:$0xff]  ;;  %1878 = vst [vmem:[#allocation5 + $0x9f8] sm:$0xff] %v1366_v9  ;;  %v1370_v21 = vmin.f32 %v858_v10, 15.0  ;;  %v1371_v22 = vmin.f32 %v859_v11, 15.0 }
  0xe8   :  { %v1372_v23 = vmin.f32 %v860_v12, 15.0  ;;  %v862_v24 = vmax.f32 %v350_v13, 0.0  ;;  %v354_v25 = vld [vmem:[#allocation2 + $0xa58] sm:$0xff]  ;;  %v355_v26 = vld [vmem:[#allocation2 + $0xa60] sm:$0xff]  ;;  %1879 = vst [vmem:[#allocation5 + $0xa00] sm:$0xff] %v1367_v15  ;;  %1880 = vst [vmem:[#allocation5 + $0xa08] sm:$0xff] %v1368_v16 }
  0xe9   :  { %1881 = vst [vmem:[#allocation5 + $0xa10] sm:$0xff] %v1369_v17  ;;  %v1373_v27 = vmin.f32 %v861_v18, 15.0  ;;  %v863_v28 = vmax.f32 %v351_v14, 0.0  ;;  %v864_v29 = vmax.f32 %v352_v19, 0.0  ;;  %v865_v30 = vmax.f32 %v353_v20, 0.0  ;;  %v356_v31 = vld [vmem:[#allocation2 + $0xa68] sm:$0xff] }
  0xea   :  { %v357_v32 = vld [vmem:[#allocation2 + $0xa70] sm:$0xff]  ;;  %1882 = vst [vmem:[#allocation5 + $0xa18] sm:$0xff] %v1370_v21  ;;  %1883 = vst [vmem:[#allocation5 + $0xa20] sm:$0xff] %v1371_v22  ;;  %v1374_v33 = vmin.f32 %v862_v24, 15.0  ;;  %v866_v34 = vmax.f32 %v354_v25, 0.0  ;;  %v867_v35 = vmax.f32 %v355_v26, 0.0 }
  0xeb   :  { %1884 = vst [vmem:[#allocation5 + $0xa28] sm:$0xff] %v1372_v23  ;;  %v868_v36 = vmax.f32 %v356_v31, 0.0  ;;  %v358_v37 = vld [vmem:[#allocation2 + $0xa78] sm:$0xff]  ;;  %v359_v38 = vld [vmem:[#allocation2 + $0xa80] sm:$0xff]  ;;  %1885 = vst [vmem:[#allocation5 + $0xa30] sm:$0xff] %v1373_v27  ;;  %v1375_v39 = vmin.f32 %v863_v28, 15.0 }
  0xec   :  { %v1376_v40 = vmin.f32 %v864_v29, 15.0  ;;  %v1377_v41 = vmin.f32 %v865_v30, 15.0  ;;  %v869_v42 = vmax.f32 %v357_v32, 0.0  ;;  %v360_v43 = vld [vmem:[#allocation2 + $0xa88] sm:$0xff]  ;;  %v361_v44 = vld [vmem:[#allocation2 + $0xa90] sm:$0xff]  ;;  %1886 = vst [vmem:[#allocation5 + $0xa38] sm:$0xff] %v1374_v33 }
  0xed   :  { %v1378_v45 = vmin.f32 %v866_v34, 15.0  ;;  %v1379_v46 = vmin.f32 %v867_v35, 15.0  ;;  %v1380_v47 = vmin.f32 %v868_v36, 15.0  ;;  %v870_v48 = vmax.f32 %v358_v37, 0.0  ;;  %v362_v49 = vld [vmem:[#allocation2 + $0xa98] sm:$0xff]  ;;  %v363_v50 = vld [vmem:[#allocation2 + $0xaa0] sm:$0xff] }
  0xee   :  { %1887 = vst [vmem:[#allocation5 + $0xa40] sm:$0xff] %v1375_v39  ;;  %1888 = vst [vmem:[#allocation5 + $0xa48] sm:$0xff] %v1376_v40  ;;  %v1381_v51 = vmin.f32 %v869_v42, 15.0  ;;  %v871_v52 = vmax.f32 %v359_v38, 0.0  ;;  %v872_v53 = vmax.f32 %v360_v43, 0.0  ;;  %v873_v54 = vmax.f32 %v361_v44, 0.0 }
  0xef   :  { %1889 = vst [vmem:[#allocation5 + $0xa50] sm:$0xff] %v1377_v41  ;;  %v364_v55 = vld [vmem:[#allocation2 + $0xaa8] sm:$0xff]  ;;  %v365_v56 = vld [vmem:[#allocation2 + $0xab0] sm:$0xff]  ;;  %1890 = vst [vmem:[#allocation5 + $0xa58] sm:$0xff] %v1378_v45  ;;  %v1382_v57 = vmin.f32 %v870_v48, 15.0  ;;  %v874_v58 = vmax.f32 %v362_v49, 0.0 }
  0xf0   :  { %1891 = vst [vmem:[#allocation5 + $0xa60] sm:$0xff] %v1379_v46  ;;  %1892 = vst [vmem:[#allocation5 + $0xa68] sm:$0xff] %v1380_v47  ;;  %v875_v59 = vmax.f32 %v363_v50, 0.0  ;;  %v876_v60 = vmax.f32 %v364_v55, 0.0  ;;  %v366_v61 = vld [vmem:[#allocation2 + $0xab8] sm:$0xff]  ;;  %v367_v62 = vld [vmem:[#allocation2 + $0xac0] sm:$0xff] }
  0xf1   :  { %1893 = vst [vmem:[#allocation5 + $0xa70] sm:$0xff] %v1381_v51  ;;  %v1383_v63 = vmin.f32 %v871_v52, 15.0  ;;  %v1384_v0 = vmin.f32 %v872_v53, 15.0  ;;  %v1385_v1 = vmin.f32 %v873_v54, 15.0  ;;  %v877_v2 = vmax.f32 %v365_v56, 0.0  ;;  %v368_v3 = vld [vmem:[#allocation2 + $0xac8] sm:$0xff] }
  0xf2   :  { %v369_v4 = vld [vmem:[#allocation2 + $0xad0] sm:$0xff]  ;;  %1894 = vst [vmem:[#allocation5 + $0xa78] sm:$0xff] %v1382_v57  ;;  %v1386_v5 = vmin.f32 %v874_v58, 15.0  ;;  %v1387_v6 = vmin.f32 %v875_v59, 15.0  ;;  %v1388_v7 = vmin.f32 %v876_v60, 15.0  ;;  %v878_v8 = vmax.f32 %v366_v61, 0.0 }
  0xf3   :  { %v370_v9 = vld [vmem:[#allocation2 + $0xad8] sm:$0xff]  ;;  %v371_v10 = vld [vmem:[#allocation2 + $0xae0] sm:$0xff]  ;;  %1895 = vst [vmem:[#allocation5 + $0xa80] sm:$0xff] %v1383_v63  ;;  %1896 = vst [vmem:[#allocation5 + $0xa88] sm:$0xff] %v1384_v0  ;;  %v1389_v11 = vmin.f32 %v877_v2, 15.0  ;;  %v879_v12 = vmax.f32 %v367_v62, 0.0 }
  0xf4   :  { %1897 = vst [vmem:[#allocation5 + $0xa90] sm:$0xff] %v1385_v1  ;;  %v880_v13 = vmax.f32 %v368_v3, 0.0  ;;  %v881_v14 = vmax.f32 %v369_v4, 0.0  ;;  %v372_v15 = vld [vmem:[#allocation2 + $0xae8] sm:$0xff]  ;;  %v373_v16 = vld [vmem:[#allocation2 + $0xaf0] sm:$0xff]  ;;  %1898 = vst [vmem:[#allocation5 + $0xa98] sm:$0xff] %v1386_v5 }
  0xf5   :  { %1899 = vst [vmem:[#allocation5 + $0xaa0] sm:$0xff] %v1387_v6  ;;  %1900 = vst [vmem:[#allocation5 + $0xaa8] sm:$0xff] %v1388_v7  ;;  %v1390_v17 = vmin.f32 %v878_v8, 15.0  ;;  %v882_v18 = vmax.f32 %v370_v9, 0.0  ;;  %v883_v19 = vmax.f32 %v371_v10, 0.0  ;;  %v884_v20 = vmax.f32 %v372_v15, 0.0 }
  0xf6   :  { %v374_v21 = vld [vmem:[#allocation2 + $0xaf8] sm:$0xff]  ;;  %v375_v22 = vld [vmem:[#allocation2 + $0xb00] sm:$0xff]  ;;  %1901 = vst [vmem:[#allocation5 + $0xab0] sm:$0xff] %v1389_v11  ;;  %v1391_v23 = vmin.f32 %v879_v12, 15.0  ;;  %v1392_v24 = vmin.f32 %v880_v13, 15.0  ;;  %v1393_v25 = vmin.f32 %v881_v14, 15.0 }
  0xf7   :  { %v885_v26 = vmax.f32 %v373_v16, 0.0  ;;  %v376_v27 = vld [vmem:[#allocation2 + $0xb08] sm:$0xff]  ;;  %v377_v28 = vld [vmem:[#allocation2 + $0xb10] sm:$0xff]  ;;  %1902 = vst [vmem:[#allocation5 + $0xab8] sm:$0xff] %v1390_v17  ;;  %v1394_v29 = vmin.f32 %v882_v18, 15.0  ;;  %v1395_v30 = vmin.f32 %v883_v19, 15.0 }
  0xf8   :  { %v1396_v31 = vmin.f32 %v884_v20, 15.0  ;;  %v886_v32 = vmax.f32 %v374_v21, 0.0  ;;  %v378_v33 = vld [vmem:[#allocation2 + $0xb18] sm:$0xff]  ;;  %v379_v34 = vld [vmem:[#allocation2 + $0xb20] sm:$0xff]  ;;  %1903 = vst [vmem:[#allocation5 + $0xac0] sm:$0xff] %v1391_v23  ;;  %1904 = vst [vmem:[#allocation5 + $0xac8] sm:$0xff] %v1392_v24 }
  0xf9   :  { %1905 = vst [vmem:[#allocation5 + $0xad0] sm:$0xff] %v1393_v25  ;;  %v1397_v35 = vmin.f32 %v885_v26, 15.0  ;;  %v887_v36 = vmax.f32 %v375_v22, 0.0  ;;  %v888_v37 = vmax.f32 %v376_v27, 0.0  ;;  %v889_v38 = vmax.f32 %v377_v28, 0.0  ;;  %v380_v39 = vld [vmem:[#allocation2 + $0xb28] sm:$0xff] }
  0xfa   :  { %v381_v40 = vld [vmem:[#allocation2 + $0xb30] sm:$0xff]  ;;  %1906 = vst [vmem:[#allocation5 + $0xad8] sm:$0xff] %v1394_v29  ;;  %1907 = vst [vmem:[#allocation5 + $0xae0] sm:$0xff] %v1395_v30  ;;  %v1398_v41 = vmin.f32 %v886_v32, 15.0  ;;  %v890_v42 = vmax.f32 %v378_v33, 0.0  ;;  %v891_v43 = vmax.f32 %v379_v34, 0.0 }
  0xfb   :  { %1908 = vst [vmem:[#allocation5 + $0xae8] sm:$0xff] %v1396_v31  ;;  %v892_v44 = vmax.f32 %v380_v39, 0.0  ;;  %v382_v45 = vld [vmem:[#allocation2 + $0xb38] sm:$0xff]  ;;  %v383_v46 = vld [vmem:[#allocation2 + $0xb40] sm:$0xff]  ;;  %1909 = vst [vmem:[#allocation5 + $0xaf0] sm:$0xff] %v1397_v35  ;;  %v1399_v47 = vmin.f32 %v887_v36, 15.0 }
  0xfc   :  { %v1400_v48 = vmin.f32 %v888_v37, 15.0  ;;  %v1401_v49 = vmin.f32 %v889_v38, 15.0  ;;  %v893_v50 = vmax.f32 %v381_v40, 0.0  ;;  %v384_v51 = vld [vmem:[#allocation2 + $0xb48] sm:$0xff]  ;;  %v385_v52 = vld [vmem:[#allocation2 + $0xb50] sm:$0xff]  ;;  %1910 = vst [vmem:[#allocation5 + $0xaf8] sm:$0xff] %v1398_v41 }
  0xfd   :  { %v1402_v53 = vmin.f32 %v890_v42, 15.0  ;;  %v1403_v54 = vmin.f32 %v891_v43, 15.0  ;;  %v1404_v55 = vmin.f32 %v892_v44, 15.0  ;;  %v894_v56 = vmax.f32 %v382_v45, 0.0  ;;  %v386_v57 = vld [vmem:[#allocation2 + $0xb58] sm:$0xff]  ;;  %v387_v58 = vld [vmem:[#allocation2 + $0xb60] sm:$0xff] }
  0xfe   :  { %1911 = vst [vmem:[#allocation5 + $0xb00] sm:$0xff] %v1399_v47  ;;  %1912 = vst [vmem:[#allocation5 + $0xb08] sm:$0xff] %v1400_v48  ;;  %v1405_v59 = vmin.f32 %v893_v50, 15.0  ;;  %v895_v60 = vmax.f32 %v383_v46, 0.0  ;;  %v896_v61 = vmax.f32 %v384_v51, 0.0  ;;  %v897_v62 = vmax.f32 %v385_v52, 0.0 }
  0xff   :  { %1913 = vst [vmem:[#allocation5 + $0xb10] sm:$0xff] %v1401_v49  ;;  %v388_v63 = vld [vmem:[#allocation2 + $0xb68] sm:$0xff]  ;;  %v389_v0 = vld [vmem:[#allocation2 + $0xb70] sm:$0xff]  ;;  %1914 = vst [vmem:[#allocation5 + $0xb18] sm:$0xff] %v1402_v53  ;;  %v1406_v1 = vmin.f32 %v894_v56, 15.0  ;;  %v898_v2 = vmax.f32 %v386_v57, 0.0 }
 0x100   :  { %1915 = vst [vmem:[#allocation5 + $0xb20] sm:$0xff] %v1403_v54  ;;  %1916 = vst [vmem:[#allocation5 + $0xb28] sm:$0xff] %v1404_v55  ;;  %v899_v3 = vmax.f32 %v387_v58, 0.0  ;;  %v900_v4 = vmax.f32 %v388_v63, 0.0  ;;  %v390_v5 = vld [vmem:[#allocation2 + $0xb78] sm:$0xff]  ;;  %v391_v6 = vld [vmem:[#allocation2 + $0xb80] sm:$0xff] }
 0x101   :  { %1917 = vst [vmem:[#allocation5 + $0xb30] sm:$0xff] %v1405_v59  ;;  %v1407_v7 = vmin.f32 %v895_v60, 15.0  ;;  %v1408_v8 = vmin.f32 %v896_v61, 15.0  ;;  %v1409_v9 = vmin.f32 %v897_v62, 15.0  ;;  %v901_v10 = vmax.f32 %v389_v0, 0.0  ;;  %v392_v11 = vld [vmem:[#allocation2 + $0xb88] sm:$0xff] }
 0x102   :  { %v393_v12 = vld [vmem:[#allocation2 + $0xb90] sm:$0xff]  ;;  %1918 = vst [vmem:[#allocation5 + $0xb38] sm:$0xff] %v1406_v1  ;;  %v1410_v13 = vmin.f32 %v898_v2, 15.0  ;;  %v1411_v14 = vmin.f32 %v899_v3, 15.0  ;;  %v1412_v15 = vmin.f32 %v900_v4, 15.0  ;;  %v902_v16 = vmax.f32 %v390_v5, 0.0 }
 0x103   :  { %v394_v17 = vld [vmem:[#allocation2 + $0xb98] sm:$0xff]  ;;  %v395_v18 = vld [vmem:[#allocation2 + $0xba0] sm:$0xff]  ;;  %1919 = vst [vmem:[#allocation5 + $0xb40] sm:$0xff] %v1407_v7  ;;  %1920 = vst [vmem:[#allocation5 + $0xb48] sm:$0xff] %v1408_v8  ;;  %v1413_v19 = vmin.f32 %v901_v10, 15.0  ;;  %v903_v20 = vmax.f32 %v391_v6, 0.0 }
 0x104   :  { %1921 = vst [vmem:[#allocation5 + $0xb50] sm:$0xff] %v1409_v9  ;;  %v904_v21 = vmax.f32 %v392_v11, 0.0  ;;  %v905_v22 = vmax.f32 %v393_v12, 0.0  ;;  %v396_v23 = vld [vmem:[#allocation2 + $0xba8] sm:$0xff]  ;;  %v397_v24 = vld [vmem:[#allocation2 + $0xbb0] sm:$0xff]  ;;  %1922 = vst [vmem:[#allocation5 + $0xb58] sm:$0xff] %v1410_v13 }
 0x105   :  { %1923 = vst [vmem:[#allocation5 + $0xb60] sm:$0xff] %v1411_v14  ;;  %1924 = vst [vmem:[#allocation5 + $0xb68] sm:$0xff] %v1412_v15  ;;  %v1414_v25 = vmin.f32 %v902_v16, 15.0  ;;  %v906_v26 = vmax.f32 %v394_v17, 0.0  ;;  %v907_v27 = vmax.f32 %v395_v18, 0.0  ;;  %v908_v28 = vmax.f32 %v396_v23, 0.0 }
 0x106   :  { %v398_v29 = vld [vmem:[#allocation2 + $0xbb8] sm:$0xff]  ;;  %v399_v30 = vld [vmem:[#allocation2 + $0xbc0] sm:$0xff]  ;;  %1925 = vst [vmem:[#allocation5 + $0xb70] sm:$0xff] %v1413_v19  ;;  %v1415_v31 = vmin.f32 %v903_v20, 15.0  ;;  %v1416_v32 = vmin.f32 %v904_v21, 15.0  ;;  %v1417_v33 = vmin.f32 %v905_v22, 15.0 }
 0x107   :  { %v909_v34 = vmax.f32 %v397_v24, 0.0  ;;  %v400_v35 = vld [vmem:[#allocation2 + $0xbc8] sm:$0xff]  ;;  %v401_v36 = vld [vmem:[#allocation2 + $0xbd0] sm:$0xff]  ;;  %1926 = vst [vmem:[#allocation5 + $0xb78] sm:$0xff] %v1414_v25  ;;  %v1418_v37 = vmin.f32 %v906_v26, 15.0  ;;  %v1419_v38 = vmin.f32 %v907_v27, 15.0 }
 0x108   :  { %v1420_v39 = vmin.f32 %v908_v28, 15.0  ;;  %v910_v40 = vmax.f32 %v398_v29, 0.0  ;;  %v402_v41 = vld [vmem:[#allocation2 + $0xbd8] sm:$0xff]  ;;  %v403_v42 = vld [vmem:[#allocation2 + $0xbe0] sm:$0xff]  ;;  %1927 = vst [vmem:[#allocation5 + $0xb80] sm:$0xff] %v1415_v31  ;;  %1928 = vst [vmem:[#allocation5 + $0xb88] sm:$0xff] %v1416_v32 }
 0x109   :  { %1929 = vst [vmem:[#allocation5 + $0xb90] sm:$0xff] %v1417_v33  ;;  %v1421_v43 = vmin.f32 %v909_v34, 15.0  ;;  %v911_v44 = vmax.f32 %v399_v30, 0.0  ;;  %v912_v45 = vmax.f32 %v400_v35, 0.0  ;;  %v913_v46 = vmax.f32 %v401_v36, 0.0  ;;  %v404_v47 = vld [vmem:[#allocation2 + $0xbe8] sm:$0xff] }
 0x10a   :  { %v405_v48 = vld [vmem:[#allocation2 + $0xbf0] sm:$0xff]  ;;  %1930 = vst [vmem:[#allocation5 + $0xb98] sm:$0xff] %v1418_v37  ;;  %1931 = vst [vmem:[#allocation5 + $0xba0] sm:$0xff] %v1419_v38  ;;  %v1422_v49 = vmin.f32 %v910_v40, 15.0  ;;  %v914_v50 = vmax.f32 %v402_v41, 0.0  ;;  %v915_v51 = vmax.f32 %v403_v42, 0.0 }
 0x10b   :  { %1932 = vst [vmem:[#allocation5 + $0xba8] sm:$0xff] %v1420_v39  ;;  %v916_v52 = vmax.f32 %v404_v47, 0.0  ;;  %v406_v53 = vld [vmem:[#allocation2 + $0xbf8] sm:$0xff]  ;;  %v407_v54 = vld [vmem:[#allocation2 + $0xc00] sm:$0xff]  ;;  %1933 = vst [vmem:[#allocation5 + $0xbb0] sm:$0xff] %v1421_v43  ;;  %v1423_v55 = vmin.f32 %v911_v44, 15.0 }
 0x10c   :  { %v1424_v56 = vmin.f32 %v912_v45, 15.0  ;;  %v1425_v57 = vmin.f32 %v913_v46, 15.0  ;;  %v917_v58 = vmax.f32 %v405_v48, 0.0  ;;  %v408_v59 = vld [vmem:[#allocation2 + $0xc08] sm:$0xff]  ;;  %v409_v60 = vld [vmem:[#allocation2 + $0xc10] sm:$0xff]  ;;  %1934 = vst [vmem:[#allocation5 + $0xbb8] sm:$0xff] %v1422_v49 }
 0x10d   :  { %v1426_v61 = vmin.f32 %v914_v50, 15.0  ;;  %v1427_v62 = vmin.f32 %v915_v51, 15.0  ;;  %v1428_v63 = vmin.f32 %v916_v52, 15.0  ;;  %v918_v0 = vmax.f32 %v406_v53, 0.0  ;;  %v410_v1 = vld [vmem:[#allocation2 + $0xc18] sm:$0xff]  ;;  %v411_v2 = vld [vmem:[#allocation2 + $0xc20] sm:$0xff] }
 0x10e   :  { %1935 = vst [vmem:[#allocation5 + $0xbc0] sm:$0xff] %v1423_v55  ;;  %1936 = vst [vmem:[#allocation5 + $0xbc8] sm:$0xff] %v1424_v56  ;;  %v1429_v3 = vmin.f32 %v917_v58, 15.0  ;;  %v919_v4 = vmax.f32 %v407_v54, 0.0  ;;  %v920_v5 = vmax.f32 %v408_v59, 0.0  ;;  %v921_v6 = vmax.f32 %v409_v60, 0.0 }
 0x10f   :  { %1937 = vst [vmem:[#allocation5 + $0xbd0] sm:$0xff] %v1425_v57  ;;  %v412_v7 = vld [vmem:[#allocation2 + $0xc28] sm:$0xff]  ;;  %v413_v8 = vld [vmem:[#allocation2 + $0xc30] sm:$0xff]  ;;  %1938 = vst [vmem:[#allocation5 + $0xbd8] sm:$0xff] %v1426_v61  ;;  %v1430_v9 = vmin.f32 %v918_v0, 15.0  ;;  %v922_v10 = vmax.f32 %v410_v1, 0.0 }
 0x110   :  { %1939 = vst [vmem:[#allocation5 + $0xbe0] sm:$0xff] %v1427_v62  ;;  %1940 = vst [vmem:[#allocation5 + $0xbe8] sm:$0xff] %v1428_v63  ;;  %v923_v11 = vmax.f32 %v411_v2, 0.0  ;;  %v924_v12 = vmax.f32 %v412_v7, 0.0  ;;  %v414_v13 = vld [vmem:[#allocation2 + $0xc38] sm:$0xff]  ;;  %v415_v14 = vld [vmem:[#allocation2 + $0xc40] sm:$0xff] }
 0x111   :  { %1941 = vst [vmem:[#allocation5 + $0xbf0] sm:$0xff] %v1429_v3  ;;  %v1431_v15 = vmin.f32 %v919_v4, 15.0  ;;  %v1432_v16 = vmin.f32 %v920_v5, 15.0  ;;  %v1433_v17 = vmin.f32 %v921_v6, 15.0  ;;  %v925_v18 = vmax.f32 %v413_v8, 0.0  ;;  %v416_v19 = vld [vmem:[#allocation2 + $0xc48] sm:$0xff] }
 0x112   :  { %v417_v20 = vld [vmem:[#allocation2 + $0xc50] sm:$0xff]  ;;  %1942 = vst [vmem:[#allocation5 + $0xbf8] sm:$0xff] %v1430_v9  ;;  %v1434_v21 = vmin.f32 %v922_v10, 15.0  ;;  %v1435_v22 = vmin.f32 %v923_v11, 15.0  ;;  %v1436_v23 = vmin.f32 %v924_v12, 15.0  ;;  %v926_v24 = vmax.f32 %v414_v13, 0.0 }
 0x113   :  { %v418_v25 = vld [vmem:[#allocation2 + $0xc58] sm:$0xff]  ;;  %v419_v26 = vld [vmem:[#allocation2 + $0xc60] sm:$0xff]  ;;  %1943 = vst [vmem:[#allocation5 + $0xc00] sm:$0xff] %v1431_v15  ;;  %1944 = vst [vmem:[#allocation5 + $0xc08] sm:$0xff] %v1432_v16  ;;  %v1437_v27 = vmin.f32 %v925_v18, 15.0  ;;  %v927_v28 = vmax.f32 %v415_v14, 0.0 }
 0x114   :  { %1945 = vst [vmem:[#allocation5 + $0xc10] sm:$0xff] %v1433_v17  ;;  %v928_v29 = vmax.f32 %v416_v19, 0.0  ;;  %v929_v30 = vmax.f32 %v417_v20, 0.0  ;;  %v420_v31 = vld [vmem:[#allocation2 + $0xc68] sm:$0xff]  ;;  %v421_v32 = vld [vmem:[#allocation2 + $0xc70] sm:$0xff]  ;;  %1946 = vst [vmem:[#allocation5 + $0xc18] sm:$0xff] %v1434_v21 }
 0x115   :  { %1947 = vst [vmem:[#allocation5 + $0xc20] sm:$0xff] %v1435_v22  ;;  %1948 = vst [vmem:[#allocation5 + $0xc28] sm:$0xff] %v1436_v23  ;;  %v1438_v33 = vmin.f32 %v926_v24, 15.0  ;;  %v930_v34 = vmax.f32 %v418_v25, 0.0  ;;  %v931_v35 = vmax.f32 %v419_v26, 0.0  ;;  %v932_v36 = vmax.f32 %v420_v31, 0.0 }
 0x116   :  { %v422_v37 = vld [vmem:[#allocation2 + $0xc78] sm:$0xff]  ;;  %v423_v38 = vld [vmem:[#allocation2 + $0xc80] sm:$0xff]  ;;  %1949 = vst [vmem:[#allocation5 + $0xc30] sm:$0xff] %v1437_v27  ;;  %v1439_v39 = vmin.f32 %v927_v28, 15.0  ;;  %v1440_v40 = vmin.f32 %v928_v29, 15.0  ;;  %v1441_v41 = vmin.f32 %v929_v30, 15.0 }
 0x117   :  { %v933_v42 = vmax.f32 %v421_v32, 0.0  ;;  %v424_v43 = vld [vmem:[#allocation2 + $0xc88] sm:$0xff]  ;;  %v425_v44 = vld [vmem:[#allocation2 + $0xc90] sm:$0xff]  ;;  %1950 = vst [vmem:[#allocation5 + $0xc38] sm:$0xff] %v1438_v33  ;;  %v1442_v45 = vmin.f32 %v930_v34, 15.0  ;;  %v1443_v46 = vmin.f32 %v931_v35, 15.0 }
 0x118   :  { %v1444_v47 = vmin.f32 %v932_v36, 15.0  ;;  %v934_v48 = vmax.f32 %v422_v37, 0.0  ;;  %v426_v49 = vld [vmem:[#allocation2 + $0xc98] sm:$0xff]  ;;  %v427_v50 = vld [vmem:[#allocation2 + $0xca0] sm:$0xff]  ;;  %1951 = vst [vmem:[#allocation5 + $0xc40] sm:$0xff] %v1439_v39  ;;  %1952 = vst [vmem:[#allocation5 + $0xc48] sm:$0xff] %v1440_v40 }
 0x119   :  { %1953 = vst [vmem:[#allocation5 + $0xc50] sm:$0xff] %v1441_v41  ;;  %v1445_v51 = vmin.f32 %v933_v42, 15.0  ;;  %v935_v52 = vmax.f32 %v423_v38, 0.0  ;;  %v936_v53 = vmax.f32 %v424_v43, 0.0  ;;  %v937_v54 = vmax.f32 %v425_v44, 0.0  ;;  %v428_v55 = vld [vmem:[#allocation2 + $0xca8] sm:$0xff] }
 0x11a   :  { %v429_v56 = vld [vmem:[#allocation2 + $0xcb0] sm:$0xff]  ;;  %1954 = vst [vmem:[#allocation5 + $0xc58] sm:$0xff] %v1442_v45  ;;  %1955 = vst [vmem:[#allocation5 + $0xc60] sm:$0xff] %v1443_v46  ;;  %v1446_v57 = vmin.f32 %v934_v48, 15.0  ;;  %v938_v58 = vmax.f32 %v426_v49, 0.0  ;;  %v939_v59 = vmax.f32 %v427_v50, 0.0 }
 0x11b   :  { %1956 = vst [vmem:[#allocation5 + $0xc68] sm:$0xff] %v1444_v47  ;;  %v940_v60 = vmax.f32 %v428_v55, 0.0  ;;  %v430_v61 = vld [vmem:[#allocation2 + $0xcb8] sm:$0xff]  ;;  %v431_v62 = vld [vmem:[#allocation2 + $0xcc0] sm:$0xff]  ;;  %1957 = vst [vmem:[#allocation5 + $0xc70] sm:$0xff] %v1445_v51  ;;  %v1447_v63 = vmin.f32 %v935_v52, 15.0 }
 0x11c   :  { %v1448_v0 = vmin.f32 %v936_v53, 15.0  ;;  %v1449_v1 = vmin.f32 %v937_v54, 15.0  ;;  %v941_v2 = vmax.f32 %v429_v56, 0.0  ;;  %v432_v3 = vld [vmem:[#allocation2 + $0xcc8] sm:$0xff]  ;;  %v433_v4 = vld [vmem:[#allocation2 + $0xcd0] sm:$0xff]  ;;  %1958 = vst [vmem:[#allocation5 + $0xc78] sm:$0xff] %v1446_v57 }
 0x11d   :  { %v1450_v5 = vmin.f32 %v938_v58, 15.0  ;;  %v1451_v6 = vmin.f32 %v939_v59, 15.0  ;;  %v1452_v7 = vmin.f32 %v940_v60, 15.0  ;;  %v942_v8 = vmax.f32 %v430_v61, 0.0  ;;  %v434_v9 = vld [vmem:[#allocation2 + $0xcd8] sm:$0xff]  ;;  %v435_v10 = vld [vmem:[#allocation2 + $0xce0] sm:$0xff] }
 0x11e   :  { %1959 = vst [vmem:[#allocation5 + $0xc80] sm:$0xff] %v1447_v63  ;;  %1960 = vst [vmem:[#allocation5 + $0xc88] sm:$0xff] %v1448_v0  ;;  %v1453_v11 = vmin.f32 %v941_v2, 15.0  ;;  %v943_v12 = vmax.f32 %v431_v62, 0.0  ;;  %v944_v13 = vmax.f32 %v432_v3, 0.0  ;;  %v945_v14 = vmax.f32 %v433_v4, 0.0 }
 0x11f   :  { %1961 = vst [vmem:[#allocation5 + $0xc90] sm:$0xff] %v1449_v1  ;;  %v436_v15 = vld [vmem:[#allocation2 + $0xce8] sm:$0xff]  ;;  %v437_v16 = vld [vmem:[#allocation2 + $0xcf0] sm:$0xff]  ;;  %1962 = vst [vmem:[#allocation5 + $0xc98] sm:$0xff] %v1450_v5  ;;  %v1454_v17 = vmin.f32 %v942_v8, 15.0  ;;  %v946_v18 = vmax.f32 %v434_v9, 0.0 }
 0x120   :  { %1963 = vst [vmem:[#allocation5 + $0xca0] sm:$0xff] %v1451_v6  ;;  %1964 = vst [vmem:[#allocation5 + $0xca8] sm:$0xff] %v1452_v7  ;;  %v947_v19 = vmax.f32 %v435_v10, 0.0  ;;  %v948_v20 = vmax.f32 %v436_v15, 0.0  ;;  %v438_v21 = vld [vmem:[#allocation2 + $0xcf8] sm:$0xff]  ;;  %v439_v22 = vld [vmem:[#allocation2 + $0xd00] sm:$0xff] }
 0x121   :  { %1965 = vst [vmem:[#allocation5 + $0xcb0] sm:$0xff] %v1453_v11  ;;  %v1455_v23 = vmin.f32 %v943_v12, 15.0  ;;  %v1456_v24 = vmin.f32 %v944_v13, 15.0  ;;  %v1457_v25 = vmin.f32 %v945_v14, 15.0  ;;  %v949_v26 = vmax.f32 %v437_v16, 0.0  ;;  %v440_v27 = vld [vmem:[#allocation2 + $0xd08] sm:$0xff] }
 0x122   :  { %v441_v28 = vld [vmem:[#allocation2 + $0xd10] sm:$0xff]  ;;  %1966 = vst [vmem:[#allocation5 + $0xcb8] sm:$0xff] %v1454_v17  ;;  %v1458_v29 = vmin.f32 %v946_v18, 15.0  ;;  %v1459_v30 = vmin.f32 %v947_v19, 15.0  ;;  %v1460_v31 = vmin.f32 %v948_v20, 15.0  ;;  %v950_v32 = vmax.f32 %v438_v21, 0.0 }
 0x123   :  { %v442_v33 = vld [vmem:[#allocation2 + $0xd18] sm:$0xff]  ;;  %v443_v34 = vld [vmem:[#allocation2 + $0xd20] sm:$0xff]  ;;  %1967 = vst [vmem:[#allocation5 + $0xcc0] sm:$0xff] %v1455_v23  ;;  %1968 = vst [vmem:[#allocation5 + $0xcc8] sm:$0xff] %v1456_v24  ;;  %v1461_v35 = vmin.f32 %v949_v26, 15.0  ;;  %v951_v36 = vmax.f32 %v439_v22, 0.0 }
 0x124   :  { %1969 = vst [vmem:[#allocation5 + $0xcd0] sm:$0xff] %v1457_v25  ;;  %v952_v37 = vmax.f32 %v440_v27, 0.0  ;;  %v953_v38 = vmax.f32 %v441_v28, 0.0  ;;  %v444_v39 = vld [vmem:[#allocation2 + $0xd28] sm:$0xff]  ;;  %v445_v40 = vld [vmem:[#allocation2 + $0xd30] sm:$0xff]  ;;  %1970 = vst [vmem:[#allocation5 + $0xcd8] sm:$0xff] %v1458_v29 }
 0x125   :  { %1971 = vst [vmem:[#allocation5 + $0xce0] sm:$0xff] %v1459_v30  ;;  %1972 = vst [vmem:[#allocation5 + $0xce8] sm:$0xff] %v1460_v31  ;;  %v1462_v41 = vmin.f32 %v950_v32, 15.0  ;;  %v954_v42 = vmax.f32 %v442_v33, 0.0  ;;  %v955_v43 = vmax.f32 %v443_v34, 0.0  ;;  %v956_v44 = vmax.f32 %v444_v39, 0.0 }
 0x126   :  { %v446_v45 = vld [vmem:[#allocation2 + $0xd38] sm:$0xff]  ;;  %v447_v46 = vld [vmem:[#allocation2 + $0xd40] sm:$0xff]  ;;  %1973 = vst [vmem:[#allocation5 + $0xcf0] sm:$0xff] %v1461_v35  ;;  %v1463_v47 = vmin.f32 %v951_v36, 15.0  ;;  %v1464_v48 = vmin.f32 %v952_v37, 15.0  ;;  %v1465_v49 = vmin.f32 %v953_v38, 15.0 }
 0x127   :  { %v957_v50 = vmax.f32 %v445_v40, 0.0  ;;  %v448_v51 = vld [vmem:[#allocation2 + $0xd48] sm:$0xff]  ;;  %v449_v52 = vld [vmem:[#allocation2 + $0xd50] sm:$0xff]  ;;  %1974 = vst [vmem:[#allocation5 + $0xcf8] sm:$0xff] %v1462_v41  ;;  %v1466_v53 = vmin.f32 %v954_v42, 15.0  ;;  %v1467_v54 = vmin.f32 %v955_v43, 15.0 }
 0x128   :  { %v1468_v55 = vmin.f32 %v956_v44, 15.0  ;;  %v958_v56 = vmax.f32 %v446_v45, 0.0  ;;  %v450_v57 = vld [vmem:[#allocation2 + $0xd58] sm:$0xff]  ;;  %v451_v58 = vld [vmem:[#allocation2 + $0xd60] sm:$0xff]  ;;  %1975 = vst [vmem:[#allocation5 + $0xd00] sm:$0xff] %v1463_v47  ;;  %1976 = vst [vmem:[#allocation5 + $0xd08] sm:$0xff] %v1464_v48 }
 0x129   :  { %1977 = vst [vmem:[#allocation5 + $0xd10] sm:$0xff] %v1465_v49  ;;  %v1469_v59 = vmin.f32 %v957_v50, 15.0  ;;  %v959_v60 = vmax.f32 %v447_v46, 0.0  ;;  %v960_v61 = vmax.f32 %v448_v51, 0.0  ;;  %v961_v62 = vmax.f32 %v449_v52, 0.0  ;;  %v452_v63 = vld [vmem:[#allocation2 + $0xd68] sm:$0xff] }
 0x12a   :  { %v453_v0 = vld [vmem:[#allocation2 + $0xd70] sm:$0xff]  ;;  %1978 = vst [vmem:[#allocation5 + $0xd18] sm:$0xff] %v1466_v53  ;;  %1979 = vst [vmem:[#allocation5 + $0xd20] sm:$0xff] %v1467_v54  ;;  %v1470_v1 = vmin.f32 %v958_v56, 15.0  ;;  %v962_v2 = vmax.f32 %v450_v57, 0.0  ;;  %v963_v3 = vmax.f32 %v451_v58, 0.0 }
 0x12b   :  { %1980 = vst [vmem:[#allocation5 + $0xd28] sm:$0xff] %v1468_v55  ;;  %v964_v4 = vmax.f32 %v452_v63, 0.0  ;;  %v454_v5 = vld [vmem:[#allocation2 + $0xd78] sm:$0xff]  ;;  %v455_v6 = vld [vmem:[#allocation2 + $0xd80] sm:$0xff]  ;;  %1981 = vst [vmem:[#allocation5 + $0xd30] sm:$0xff] %v1469_v59  ;;  %v1471_v7 = vmin.f32 %v959_v60, 15.0 }
 0x12c   :  { %v1472_v8 = vmin.f32 %v960_v61, 15.0  ;;  %v1473_v9 = vmin.f32 %v961_v62, 15.0  ;;  %v965_v10 = vmax.f32 %v453_v0, 0.0  ;;  %v456_v11 = vld [vmem:[#allocation2 + $0xd88] sm:$0xff]  ;;  %v457_v12 = vld [vmem:[#allocation2 + $0xd90] sm:$0xff]  ;;  %1982 = vst [vmem:[#allocation5 + $0xd38] sm:$0xff] %v1470_v1 }
 0x12d   :  { %v1474_v13 = vmin.f32 %v962_v2, 15.0  ;;  %v1475_v14 = vmin.f32 %v963_v3, 15.0  ;;  %v1476_v15 = vmin.f32 %v964_v4, 15.0  ;;  %v966_v16 = vmax.f32 %v454_v5, 0.0  ;;  %v458_v17 = vld [vmem:[#allocation2 + $0xd98] sm:$0xff]  ;;  %v459_v18 = vld [vmem:[#allocation2 + $0xda0] sm:$0xff] }
 0x12e   :  { %1983 = vst [vmem:[#allocation5 + $0xd40] sm:$0xff] %v1471_v7  ;;  %1984 = vst [vmem:[#allocation5 + $0xd48] sm:$0xff] %v1472_v8  ;;  %v1477_v19 = vmin.f32 %v965_v10, 15.0  ;;  %v967_v20 = vmax.f32 %v455_v6, 0.0  ;;  %v968_v21 = vmax.f32 %v456_v11, 0.0  ;;  %v969_v22 = vmax.f32 %v457_v12, 0.0 }
 0x12f   :  { %1985 = vst [vmem:[#allocation5 + $0xd50] sm:$0xff] %v1473_v9  ;;  %v460_v23 = vld [vmem:[#allocation2 + $0xda8] sm:$0xff]  ;;  %v461_v24 = vld [vmem:[#allocation2 + $0xdb0] sm:$0xff]  ;;  %1986 = vst [vmem:[#allocation5 + $0xd58] sm:$0xff] %v1474_v13  ;;  %v1478_v25 = vmin.f32 %v966_v16, 15.0  ;;  %v970_v26 = vmax.f32 %v458_v17, 0.0 }
 0x130   :  { %1987 = vst [vmem:[#allocation5 + $0xd60] sm:$0xff] %v1475_v14  ;;  %1988 = vst [vmem:[#allocation5 + $0xd68] sm:$0xff] %v1476_v15  ;;  %v971_v27 = vmax.f32 %v459_v18, 0.0  ;;  %v972_v28 = vmax.f32 %v460_v23, 0.0  ;;  %v462_v29 = vld [vmem:[#allocation2 + $0xdb8] sm:$0xff]  ;;  %v463_v30 = vld [vmem:[#allocation2 + $0xdc0] sm:$0xff] }
 0x131   :  { %1989 = vst [vmem:[#allocation5 + $0xd70] sm:$0xff] %v1477_v19  ;;  %v1479_v31 = vmin.f32 %v967_v20, 15.0  ;;  %v1480_v32 = vmin.f32 %v968_v21, 15.0  ;;  %v1481_v33 = vmin.f32 %v969_v22, 15.0  ;;  %v973_v34 = vmax.f32 %v461_v24, 0.0  ;;  %v464_v35 = vld [vmem:[#allocation2 + $0xdc8] sm:$0xff] }
 0x132   :  { %v465_v36 = vld [vmem:[#allocation2 + $0xdd0] sm:$0xff]  ;;  %1990 = vst [vmem:[#allocation5 + $0xd78] sm:$0xff] %v1478_v25  ;;  %v1482_v37 = vmin.f32 %v970_v26, 15.0  ;;  %v1483_v38 = vmin.f32 %v971_v27, 15.0  ;;  %v1484_v39 = vmin.f32 %v972_v28, 15.0  ;;  %v974_v40 = vmax.f32 %v462_v29, 0.0 }
 0x133   :  { %v466_v41 = vld [vmem:[#allocation2 + $0xdd8] sm:$0xff]  ;;  %v467_v42 = vld [vmem:[#allocation2 + $0xde0] sm:$0xff]  ;;  %1991 = vst [vmem:[#allocation5 + $0xd80] sm:$0xff] %v1479_v31  ;;  %1992 = vst [vmem:[#allocation5 + $0xd88] sm:$0xff] %v1480_v32  ;;  %v1485_v43 = vmin.f32 %v973_v34, 15.0  ;;  %v975_v44 = vmax.f32 %v463_v30, 0.0 }
 0x134   :  { %1993 = vst [vmem:[#allocation5 + $0xd90] sm:$0xff] %v1481_v33  ;;  %v976_v45 = vmax.f32 %v464_v35, 0.0  ;;  %v977_v46 = vmax.f32 %v465_v36, 0.0  ;;  %v468_v47 = vld [vmem:[#allocation2 + $0xde8] sm:$0xff]  ;;  %v469_v48 = vld [vmem:[#allocation2 + $0xdf0] sm:$0xff]  ;;  %1994 = vst [vmem:[#allocation5 + $0xd98] sm:$0xff] %v1482_v37 }
 0x135   :  { %1995 = vst [vmem:[#allocation5 + $0xda0] sm:$0xff] %v1483_v38  ;;  %1996 = vst [vmem:[#allocation5 + $0xda8] sm:$0xff] %v1484_v39  ;;  %v1486_v49 = vmin.f32 %v974_v40, 15.0  ;;  %v978_v50 = vmax.f32 %v466_v41, 0.0  ;;  %v979_v51 = vmax.f32 %v467_v42, 0.0  ;;  %v980_v52 = vmax.f32 %v468_v47, 0.0 }
 0x136   :  { %v470_v53 = vld [vmem:[#allocation2 + $0xdf8] sm:$0xff]  ;;  %v471_v54 = vld [vmem:[#allocation2 + $0xe00] sm:$0xff]  ;;  %1997 = vst [vmem:[#allocation5 + $0xdb0] sm:$0xff] %v1485_v43  ;;  %v1487_v55 = vmin.f32 %v975_v44, 15.0  ;;  %v1488_v56 = vmin.f32 %v976_v45, 15.0  ;;  %v1489_v57 = vmin.f32 %v977_v46, 15.0 }
 0x137   :  { %v981_v58 = vmax.f32 %v469_v48, 0.0  ;;  %v472_v59 = vld [vmem:[#allocation2 + $0xe08] sm:$0xff]  ;;  %v473_v60 = vld [vmem:[#allocation2 + $0xe10] sm:$0xff]  ;;  %1998 = vst [vmem:[#allocation5 + $0xdb8] sm:$0xff] %v1486_v49  ;;  %v1490_v61 = vmin.f32 %v978_v50, 15.0  ;;  %v1491_v62 = vmin.f32 %v979_v51, 15.0 }
 0x138   :  { %v1492_v63 = vmin.f32 %v980_v52, 15.0  ;;  %v982_v0 = vmax.f32 %v470_v53, 0.0  ;;  %v474_v1 = vld [vmem:[#allocation2 + $0xe18] sm:$0xff]  ;;  %v475_v2 = vld [vmem:[#allocation2 + $0xe20] sm:$0xff]  ;;  %1999 = vst [vmem:[#allocation5 + $0xdc0] sm:$0xff] %v1487_v55  ;;  %2000 = vst [vmem:[#allocation5 + $0xdc8] sm:$0xff] %v1488_v56 }
 0x139   :  { %2001 = vst [vmem:[#allocation5 + $0xdd0] sm:$0xff] %v1489_v57  ;;  %v1493_v3 = vmin.f32 %v981_v58, 15.0  ;;  %v983_v4 = vmax.f32 %v471_v54, 0.0  ;;  %v984_v5 = vmax.f32 %v472_v59, 0.0  ;;  %v985_v6 = vmax.f32 %v473_v60, 0.0  ;;  %v476_v7 = vld [vmem:[#allocation2 + $0xe28] sm:$0xff] }
 0x13a   :  { %v477_v8 = vld [vmem:[#allocation2 + $0xe30] sm:$0xff]  ;;  %2002 = vst [vmem:[#allocation5 + $0xdd8] sm:$0xff] %v1490_v61  ;;  %2003 = vst [vmem:[#allocation5 + $0xde0] sm:$0xff] %v1491_v62  ;;  %v1494_v9 = vmin.f32 %v982_v0, 15.0  ;;  %v986_v10 = vmax.f32 %v474_v1, 0.0  ;;  %v987_v11 = vmax.f32 %v475_v2, 0.0 }
 0x13b   :  { %2004 = vst [vmem:[#allocation5 + $0xde8] sm:$0xff] %v1492_v63  ;;  %v988_v12 = vmax.f32 %v476_v7, 0.0  ;;  %v478_v13 = vld [vmem:[#allocation2 + $0xe38] sm:$0xff]  ;;  %v479_v14 = vld [vmem:[#allocation2 + $0xe40] sm:$0xff]  ;;  %2005 = vst [vmem:[#allocation5 + $0xdf0] sm:$0xff] %v1493_v3  ;;  %v1495_v15 = vmin.f32 %v983_v4, 15.0 }
 0x13c   :  { %v1496_v16 = vmin.f32 %v984_v5, 15.0  ;;  %v1497_v17 = vmin.f32 %v985_v6, 15.0  ;;  %v989_v18 = vmax.f32 %v477_v8, 0.0  ;;  %v480_v19 = vld [vmem:[#allocation2 + $0xe48] sm:$0xff]  ;;  %v481_v20 = vld [vmem:[#allocation2 + $0xe50] sm:$0xff]  ;;  %2006 = vst [vmem:[#allocation5 + $0xdf8] sm:$0xff] %v1494_v9 }
 0x13d   :  { %v1498_v21 = vmin.f32 %v986_v10, 15.0  ;;  %v1499_v22 = vmin.f32 %v987_v11, 15.0  ;;  %v1500_v23 = vmin.f32 %v988_v12, 15.0  ;;  %v990_v24 = vmax.f32 %v478_v13, 0.0  ;;  %v482_v25 = vld [vmem:[#allocation2 + $0xe58] sm:$0xff]  ;;  %v483_v26 = vld [vmem:[#allocation2 + $0xe60] sm:$0xff] }
 0x13e   :  { %2007 = vst [vmem:[#allocation5 + $0xe00] sm:$0xff] %v1495_v15  ;;  %2008 = vst [vmem:[#allocation5 + $0xe08] sm:$0xff] %v1496_v16  ;;  %v1501_v27 = vmin.f32 %v989_v18, 15.0  ;;  %v991_v28 = vmax.f32 %v479_v14, 0.0  ;;  %v992_v29 = vmax.f32 %v480_v19, 0.0  ;;  %v993_v30 = vmax.f32 %v481_v20, 0.0 }
 0x13f   :  { %2009 = vst [vmem:[#allocation5 + $0xe10] sm:$0xff] %v1497_v17  ;;  %v484_v31 = vld [vmem:[#allocation2 + $0xe68] sm:$0xff]  ;;  %v485_v32 = vld [vmem:[#allocation2 + $0xe70] sm:$0xff]  ;;  %2010 = vst [vmem:[#allocation5 + $0xe18] sm:$0xff] %v1498_v21  ;;  %v1502_v33 = vmin.f32 %v990_v24, 15.0  ;;  %v994_v34 = vmax.f32 %v482_v25, 0.0 }
 0x140   :  { %2011 = vst [vmem:[#allocation5 + $0xe20] sm:$0xff] %v1499_v22  ;;  %2012 = vst [vmem:[#allocation5 + $0xe28] sm:$0xff] %v1500_v23  ;;  %v995_v35 = vmax.f32 %v483_v26, 0.0  ;;  %v996_v36 = vmax.f32 %v484_v31, 0.0  ;;  %v486_v37 = vld [vmem:[#allocation2 + $0xe78] sm:$0xff]  ;;  %v487_v38 = vld [vmem:[#allocation2 + $0xe80] sm:$0xff] }
 0x141   :  { %2013 = vst [vmem:[#allocation5 + $0xe30] sm:$0xff] %v1501_v27  ;;  %v1503_v39 = vmin.f32 %v991_v28, 15.0  ;;  %v1504_v40 = vmin.f32 %v992_v29, 15.0  ;;  %v1505_v41 = vmin.f32 %v993_v30, 15.0  ;;  %v997_v42 = vmax.f32 %v485_v32, 0.0  ;;  %v488_v43 = vld [vmem:[#allocation2 + $0xe88] sm:$0xff] }
 0x142   :  { %v489_v44 = vld [vmem:[#allocation2 + $0xe90] sm:$0xff]  ;;  %2014 = vst [vmem:[#allocation5 + $0xe38] sm:$0xff] %v1502_v33  ;;  %v1506_v45 = vmin.f32 %v994_v34, 15.0  ;;  %v1507_v46 = vmin.f32 %v995_v35, 15.0  ;;  %v1508_v47 = vmin.f32 %v996_v36, 15.0  ;;  %v998_v48 = vmax.f32 %v486_v37, 0.0 }
 0x143   :  { %v490_v49 = vld [vmem:[#allocation2 + $0xe98] sm:$0xff]  ;;  %v491_v50 = vld [vmem:[#allocation2 + $0xea0] sm:$0xff]  ;;  %2015 = vst [vmem:[#allocation5 + $0xe40] sm:$0xff] %v1503_v39  ;;  %2016 = vst [vmem:[#allocation5 + $0xe48] sm:$0xff] %v1504_v40  ;;  %v1509_v51 = vmin.f32 %v997_v42, 15.0  ;;  %v999_v52 = vmax.f32 %v487_v38, 0.0 }
 0x144   :  { %2017 = vst [vmem:[#allocation5 + $0xe50] sm:$0xff] %v1505_v41  ;;  %v1000_v53 = vmax.f32 %v488_v43, 0.0  ;;  %v1001_v54 = vmax.f32 %v489_v44, 0.0  ;;  %v492_v55 = vld [vmem:[#allocation2 + $0xea8] sm:$0xff]  ;;  %v493_v56 = vld [vmem:[#allocation2 + $0xeb0] sm:$0xff]  ;;  %2018 = vst [vmem:[#allocation5 + $0xe58] sm:$0xff] %v1506_v45 }
 0x145   :  { %2019 = vst [vmem:[#allocation5 + $0xe60] sm:$0xff] %v1507_v46  ;;  %2020 = vst [vmem:[#allocation5 + $0xe68] sm:$0xff] %v1508_v47  ;;  %v1510_v57 = vmin.f32 %v998_v48, 15.0  ;;  %v1002_v58 = vmax.f32 %v490_v49, 0.0  ;;  %v1003_v59 = vmax.f32 %v491_v50, 0.0  ;;  %v1004_v60 = vmax.f32 %v492_v55, 0.0 }
 0x146   :  { %v494_v61 = vld [vmem:[#allocation2 + $0xeb8] sm:$0xff]  ;;  %v495_v62 = vld [vmem:[#allocation2 + $0xec0] sm:$0xff]  ;;  %2021 = vst [vmem:[#allocation5 + $0xe70] sm:$0xff] %v1509_v51  ;;  %v1511_v63 = vmin.f32 %v999_v52, 15.0  ;;  %v1512_v0 = vmin.f32 %v1000_v53, 15.0  ;;  %v1513_v1 = vmin.f32 %v1001_v54, 15.0 }
 0x147   :  { %v1005_v2 = vmax.f32 %v493_v56, 0.0  ;;  %v496_v3 = vld [vmem:[#allocation2 + $0xec8] sm:$0xff]  ;;  %v497_v4 = vld [vmem:[#allocation2 + $0xed0] sm:$0xff]  ;;  %2022 = vst [vmem:[#allocation5 + $0xe78] sm:$0xff] %v1510_v57  ;;  %v1514_v5 = vmin.f32 %v1002_v58, 15.0  ;;  %v1515_v6 = vmin.f32 %v1003_v59, 15.0 }
 0x148   :  { %v1516_v7 = vmin.f32 %v1004_v60, 15.0  ;;  %v1006_v8 = vmax.f32 %v494_v61, 0.0  ;;  %v498_v9 = vld [vmem:[#allocation2 + $0xed8] sm:$0xff]  ;;  %v499_v10 = vld [vmem:[#allocation2 + $0xee0] sm:$0xff]  ;;  %2023 = vst [vmem:[#allocation5 + $0xe80] sm:$0xff] %v1511_v63  ;;  %2024 = vst [vmem:[#allocation5 + $0xe88] sm:$0xff] %v1512_v0 }
 0x149   :  { %2025 = vst [vmem:[#allocation5 + $0xe90] sm:$0xff] %v1513_v1  ;;  %v1517_v11 = vmin.f32 %v1005_v2, 15.0  ;;  %v1007_v12 = vmax.f32 %v495_v62, 0.0  ;;  %v1008_v13 = vmax.f32 %v496_v3, 0.0  ;;  %v1009_v14 = vmax.f32 %v497_v4, 0.0  ;;  %v500_v15 = vld [vmem:[#allocation2 + $0xee8] sm:$0xff] }
 0x14a   :  { %v501_v16 = vld [vmem:[#allocation2 + $0xef0] sm:$0xff]  ;;  %2026 = vst [vmem:[#allocation5 + $0xe98] sm:$0xff] %v1514_v5  ;;  %2027 = vst [vmem:[#allocation5 + $0xea0] sm:$0xff] %v1515_v6  ;;  %v1518_v17 = vmin.f32 %v1006_v8, 15.0  ;;  %v1010_v18 = vmax.f32 %v498_v9, 0.0  ;;  %v1011_v19 = vmax.f32 %v499_v10, 0.0 }
 0x14b   :  { %2028 = vst [vmem:[#allocation5 + $0xea8] sm:$0xff] %v1516_v7  ;;  %v1012_v20 = vmax.f32 %v500_v15, 0.0  ;;  %v502_v21 = vld [vmem:[#allocation2 + $0xef8] sm:$0xff]  ;;  %v503_v22 = vld [vmem:[#allocation2 + $0xf00] sm:$0xff]  ;;  %2029 = vst [vmem:[#allocation5 + $0xeb0] sm:$0xff] %v1517_v11  ;;  %v1519_v23 = vmin.f32 %v1007_v12, 15.0 }
 0x14c   :  { %v1520_v24 = vmin.f32 %v1008_v13, 15.0  ;;  %v1521_v25 = vmin.f32 %v1009_v14, 15.0  ;;  %v1013_v26 = vmax.f32 %v501_v16, 0.0  ;;  %v504_v27 = vld [vmem:[#allocation2 + $0xf08] sm:$0xff]  ;;  %v505_v28 = vld [vmem:[#allocation2 + $0xf10] sm:$0xff]  ;;  %2030 = vst [vmem:[#allocation5 + $0xeb8] sm:$0xff] %v1518_v17 }
 0x14d   :  { %v1522_v29 = vmin.f32 %v1010_v18, 15.0  ;;  %v1523_v30 = vmin.f32 %v1011_v19, 15.0  ;;  %v1524_v31 = vmin.f32 %v1012_v20, 15.0  ;;  %v1014_v32 = vmax.f32 %v502_v21, 0.0  ;;  %v506_v33 = vld [vmem:[#allocation2 + $0xf18] sm:$0xff]  ;;  %v507_v34 = vld [vmem:[#allocation2 + $0xf20] sm:$0xff] }
 0x14e   :  { %2031 = vst [vmem:[#allocation5 + $0xec0] sm:$0xff] %v1519_v23  ;;  %2032 = vst [vmem:[#allocation5 + $0xec8] sm:$0xff] %v1520_v24  ;;  %v1525_v35 = vmin.f32 %v1013_v26, 15.0  ;;  %v1015_v36 = vmax.f32 %v503_v22, 0.0  ;;  %v1016_v37 = vmax.f32 %v504_v27, 0.0  ;;  %v1017_v38 = vmax.f32 %v505_v28, 0.0 }
 0x14f   :  { %2033 = vst [vmem:[#allocation5 + $0xed0] sm:$0xff] %v1521_v25  ;;  %v508_v39 = vld [vmem:[#allocation2 + $0xf28] sm:$0xff]  ;;  %v509_v40 = vld [vmem:[#allocation2 + $0xf30] sm:$0xff]  ;;  %2034 = vst [vmem:[#allocation5 + $0xed8] sm:$0xff] %v1522_v29  ;;  %v1526_v41 = vmin.f32 %v1014_v32, 15.0  ;;  %v1018_v42 = vmax.f32 %v506_v33, 0.0 }
 0x150   :  { %2035 = vst [vmem:[#allocation5 + $0xee0] sm:$0xff] %v1523_v30  ;;  %2036 = vst [vmem:[#allocation5 + $0xee8] sm:$0xff] %v1524_v31  ;;  %v1019_v43 = vmax.f32 %v507_v34, 0.0  ;;  %v1020_v44 = vmax.f32 %v508_v39, 0.0  ;;  %v510_v45 = vld [vmem:[#allocation2 + $0xf38] sm:$0xff]  ;;  %v511_v46 = vld [vmem:[#allocation2 + $0xf40] sm:$0xff] }
 0x151   :  { %2037 = vst [vmem:[#allocation5 + $0xef0] sm:$0xff] %v1525_v35  ;;  %v1527_v47 = vmin.f32 %v1015_v36, 15.0  ;;  %v1528_v48 = vmin.f32 %v1016_v37, 15.0  ;;  %v1529_v49 = vmin.f32 %v1017_v38, 15.0  ;;  %v1021_v50 = vmax.f32 %v509_v40, 0.0  ;;  %v512_v51 = vld [vmem:[#allocation2 + $0xf48] sm:$0xff] }
 0x152   :  { %v513_v52 = vld [vmem:[#allocation2 + $0xf50] sm:$0xff]  ;;  %2038 = vst [vmem:[#allocation5 + $0xef8] sm:$0xff] %v1526_v41  ;;  %v1530_v53 = vmin.f32 %v1018_v42, 15.0  ;;  %v1531_v54 = vmin.f32 %v1019_v43, 15.0  ;;  %v1532_v55 = vmin.f32 %v1020_v44, 15.0  ;;  %v1022_v56 = vmax.f32 %v510_v45, 0.0 }
 0x153   :  { %v514_v57 = vld [vmem:[#allocation2 + $0xf58] sm:$0xff]  ;;  %v515_v58 = vld [vmem:[#allocation2 + $0xf60] sm:$0xff]  ;;  %2039 = vst [vmem:[#allocation5 + $0xf00] sm:$0xff] %v1527_v47  ;;  %2040 = vst [vmem:[#allocation5 + $0xf08] sm:$0xff] %v1528_v48  ;;  %v1533_v59 = vmin.f32 %v1021_v50, 15.0  ;;  %v1023_v60 = vmax.f32 %v511_v46, 0.0 }
 0x154   :  { %2041 = vst [vmem:[#allocation5 + $0xf10] sm:$0xff] %v1529_v49  ;;  %v1024_v61 = vmax.f32 %v512_v51, 0.0  ;;  %v1025_v62 = vmax.f32 %v513_v52, 0.0  ;;  %v516_v63 = vld [vmem:[#allocation2 + $0xf68] sm:$0xff]  ;;  %v517_v0 = vld [vmem:[#allocation2 + $0xf70] sm:$0xff]  ;;  %2042 = vst [vmem:[#allocation5 + $0xf18] sm:$0xff] %v1530_v53 }
 0x155   :  { %2043 = vst [vmem:[#allocation5 + $0xf20] sm:$0xff] %v1531_v54  ;;  %2044 = vst [vmem:[#allocation5 + $0xf28] sm:$0xff] %v1532_v55  ;;  %v1534_v1 = vmin.f32 %v1022_v56, 15.0  ;;  %v1026_v2 = vmax.f32 %v514_v57, 0.0  ;;  %v1027_v3 = vmax.f32 %v515_v58, 0.0  ;;  %v1028_v4 = vmax.f32 %v516_v63, 0.0 }
 0x156   :  { %v518_v5 = vld [vmem:[#allocation2 + $0xf78] sm:$0xff]  ;;  %v519_v6 = vld [vmem:[#allocation2 + $0xf80] sm:$0xff]  ;;  %2045 = vst [vmem:[#allocation5 + $0xf30] sm:$0xff] %v1533_v59  ;;  %v1535_v7 = vmin.f32 %v1023_v60, 15.0  ;;  %v1536_v8 = vmin.f32 %v1024_v61, 15.0  ;;  %v1537_v9 = vmin.f32 %v1025_v62, 15.0 }
 0x157   :  { %v1029_v10 = vmax.f32 %v517_v0, 0.0  ;;  %v520_v11 = vld [vmem:[#allocation2 + $0xf88] sm:$0xff]  ;;  %v521_v12 = vld [vmem:[#allocation2 + $0xf90] sm:$0xff]  ;;  %2046 = vst [vmem:[#allocation5 + $0xf38] sm:$0xff] %v1534_v1  ;;  %v1538_v13 = vmin.f32 %v1026_v2, 15.0  ;;  %v1539_v14 = vmin.f32 %v1027_v3, 15.0 }
 0x158   :  { %v1540_v15 = vmin.f32 %v1028_v4, 15.0  ;;  %v1030_v16 = vmax.f32 %v518_v5, 0.0  ;;  %v522_v17 = vld [vmem:[#allocation2 + $0xf98] sm:$0xff]  ;;  %v523_v18 = vld [vmem:[#allocation2 + $0xfa0] sm:$0xff]  ;;  %2047 = vst [vmem:[#allocation5 + $0xf40] sm:$0xff] %v1535_v7  ;;  %2048 = vst [vmem:[#allocation5 + $0xf48] sm:$0xff] %v1536_v8 }
 0x159   :  { %2049 = vst [vmem:[#allocation5 + $0xf50] sm:$0xff] %v1537_v9  ;;  %v1541_v19 = vmin.f32 %v1029_v10, 15.0  ;;  %v1031_v20 = vmax.f32 %v519_v6, 0.0  ;;  %v1032_v21 = vmax.f32 %v520_v11, 0.0  ;;  %v1033_v22 = vmax.f32 %v521_v12, 0.0  ;;  %v524_v23 = vld [vmem:[#allocation2 + $0xfa8] sm:$0xff] }
 0x15a   :  { %v525_v24 = vld [vmem:[#allocation2 + $0xfb0] sm:$0xff]  ;;  %2050 = vst [vmem:[#allocation5 + $0xf58] sm:$0xff] %v1538_v13  ;;  %2051 = vst [vmem:[#allocation5 + $0xf60] sm:$0xff] %v1539_v14  ;;  %v1542_v25 = vmin.f32 %v1030_v16, 15.0  ;;  %v1034_v26 = vmax.f32 %v522_v17, 0.0  ;;  %v1035_v27 = vmax.f32 %v523_v18, 0.0 }
 0x15b   :  { %2052 = vst [vmem:[#allocation5 + $0xf68] sm:$0xff] %v1540_v15  ;;  %v1036_v28 = vmax.f32 %v524_v23, 0.0  ;;  %v526_v29 = vld [vmem:[#allocation2 + $0xfb8] sm:$0xff]  ;;  %v527_v30 = vld [vmem:[#allocation2 + $0xfc0] sm:$0xff]  ;;  %2053 = vst [vmem:[#allocation5 + $0xf70] sm:$0xff] %v1541_v19  ;;  %v1543_v31 = vmin.f32 %v1031_v20, 15.0 }
 0x15c   :  { %v1544_v32 = vmin.f32 %v1032_v21, 15.0  ;;  %v1545_v33 = vmin.f32 %v1033_v22, 15.0  ;;  %v1037_v34 = vmax.f32 %v525_v24, 0.0  ;;  %v528_v35 = vld [vmem:[#allocation2 + $0xfc8] sm:$0xff]  ;;  %v529_v36 = vld [vmem:[#allocation2 + $0xfd0] sm:$0xff]  ;;  %2054 = vst [vmem:[#allocation5 + $0xf78] sm:$0xff] %v1542_v25 }
 0x15d   :  { %v1546_v37 = vmin.f32 %v1034_v26, 15.0  ;;  %v1547_v38 = vmin.f32 %v1035_v27, 15.0  ;;  %v1548_v39 = vmin.f32 %v1036_v28, 15.0  ;;  %v1038_v40 = vmax.f32 %v526_v29, 0.0  ;;  %v530_v41 = vld [vmem:[#allocation2 + $0xfd8] sm:$0xff]  ;;  %v531_v42 = vld [vmem:[#allocation2 + $0xfe0] sm:$0xff] }
 0x15e   :  { %2055 = vst [vmem:[#allocation5 + $0xf80] sm:$0xff] %v1543_v31  ;;  %2056 = vst [vmem:[#allocation5 + $0xf88] sm:$0xff] %v1544_v32  ;;  %v1549_v43 = vmin.f32 %v1037_v34, 15.0  ;;  %v1039_v44 = vmax.f32 %v527_v30, 0.0  ;;  %v1040_v45 = vmax.f32 %v528_v35, 0.0  ;;  %v1041_v46 = vmax.f32 %v529_v36, 0.0 }
 0x15f   :  { %2057 = vst [vmem:[#allocation5 + $0xf90] sm:$0xff] %v1545_v33  ;;  %v532_v47 = vld [vmem:[#allocation2 + $0xfe8] sm:$0xff]  ;;  %v533_v48 = vld [vmem:[#allocation2 + $0xff0] sm:$0xff]  ;;  %2058 = vst [vmem:[#allocation5 + $0xf98] sm:$0xff] %v1546_v37  ;;  %v1550_v49 = vmin.f32 %v1038_v40, 15.0  ;;  %v1042_v50 = vmax.f32 %v530_v41, 0.0 }
 0x160   :  { %2059 = vst [vmem:[#allocation5 + $0xfa0] sm:$0xff] %v1547_v38  ;;  %2060 = vst [vmem:[#allocation5 + $0xfa8] sm:$0xff] %v1548_v39  ;;  %v1043_v51 = vmax.f32 %v531_v42, 0.0  ;;  %v1044_v52 = vmax.f32 %v532_v47, 0.0  ;;  %v534_v53 = vld [vmem:[#allocation2 + $0xff8] sm:$0xff]  ;;  %v1551_v54 = vmin.f32 %v1039_v44, 15.0 }
 0x161   :  { %2061 = vst [vmem:[#allocation5 + $0xfb0] sm:$0xff] %v1549_v43  ;;  %v1552_v55 = vmin.f32 %v1040_v45, 15.0  ;;  %v1553_v56 = vmin.f32 %v1041_v46, 15.0  ;;  %v1045_v57 = vmax.f32 %v533_v48, 0.0  ;;  %2062 = vst [vmem:[#allocation5 + $0xfb8] sm:$0xff] %v1550_v49  ;;  %v1554_v58 = vmin.f32 %v1042_v50, 15.0 }
 0x162   :  { %v1555_v59 = vmin.f32 %v1043_v51, 15.0  ;;  %v1556_v60 = vmin.f32 %v1044_v52, 15.0  ;;  %v1046_v61 = vmax.f32 %v534_v53, 0.0  ;;  %2063 = vst [vmem:[#allocation5 + $0xfc0] sm:$0xff] %v1551_v54  ;;  %s2112_s14 = scalar_lea.vmem %s2077_s13, 65536 }
 0x163   :  { %2064 = vst [vmem:[#allocation5 + $0xfc8] sm:$0xff] %v1552_v55  ;;  %2065 = vst [vmem:[#allocation5 + $0xfd0] sm:$0xff] %v1553_v56  ;;  %v1557_v62 = vmin.f32 %v1045_v57, 15.0  ;;  %p2113_p5 = scmp.ne.s32.totalorder %s2077_s13, %s2112_s14  ;;  %p2118_p7 = scmp.lt.s32.totalorder %s2112_s14, %s2112_s14 }
 0x164   :  { %2066 = vst [vmem:[#allocation5 + $0xfd8] sm:$0xff] %v1554_v58  ;;  %2067 = vst [vmem:[#allocation5 + $0xfe0] sm:$0xff] %v1555_v59  ;;  %v1558_v63 = vmin.f32 %v1046_v61, 15.0 }
 0x165   :  { %2068 = vst [vmem:[#allocation5 + $0xfe8] sm:$0xff] %v1556_v60  ;;  %2069 = vst [vmem:[#allocation5 + $0xff0] sm:$0xff] %v1557_v62  ;;  %p2119_p8 = por %p2118_p7, %p2117_p6 }
 0x166   :  { %2070 = vst [vmem:[#allocation5 + $0xff8] sm:$0xff] %v1558_v63 }
 0x167   :  { %p2120_p9 = pnand %p2119_p8, %p2113_p5 }
 0x169   :  { %2123 = shalt.err (!%p2120_p9)
}
 0x16a   :  { %2082 = dma.vmem_to_hbm [thread:$0]  %s2077_s13, 65536, %s2163_s1, [#allocation4], %s2137_s9, %s2137_s9, %s2138_s10  }
 0x16b   :  { %2134 = dma.done.wait [#allocation4], 65536  }
 0x16c   :  { %2135 = vsyncadd [#allocation4], 4294901760 }
 0x16d   :  { %2086 = vsyncpa [#allocation3], 1 }
 0x16e   :  { %2087 = vsyncpa [#allocation4], 1 }

</bundles_post_ra>
